<compile_context>
chip_gen: v5e
topology: v5e:2x2
jax: 0.10.0
libtpu: 0.0.40
codegen_flags: <defaults>
</compile_context>

<pallas_src>
import math
import functools

import jax
import jax.numpy as jnp
from jax.experimental import pallas as pl
from jax.experimental.pallas import tpu as pltpu

BN_EPS = 1e-5
_VMEM_LIMIT = 32 * 1024 * 1024     # > v5e's 16MiB scoped default, < v7x 64MiB
_TM_TARGET = 1024                  # im2col row-tile target (multiple of 8)


# ----------------------------------------------------------------------------
# Pallas kernels
# ----------------------------------------------------------------------------
def _conv_bn_kernel(relu: bool, has_res: bool):
    """im2col conv (BN scale pre-folded into weights) + bias (+res) (+ReLU)."""
    if has_res:
        def kernel(p_ref, w_ref, b_ref, r_ref, o_ref):
            acc = jnp.dot(p_ref[...], w_ref[...],
                          preferred_element_type=jnp.float32)
            acc = acc + b_ref[...] + r_ref[...]
            if relu:
                acc = jnp.maximum(acc, 0.0)
            o_ref[...] = acc
    else:
        def kernel(p_ref, w_ref, b_ref, o_ref):
            acc = jnp.dot(p_ref[...], w_ref[...],
                          preferred_element_type=jnp.float32)
            acc = acc + b_ref[...]
            if relu:
                acc = jnp.maximum(acc, 0.0)
            o_ref[...] = acc
    return kernel


def _tail_kernel(p_ref, w_ref, b_ref, r_ref, wfc_ref, bfc_ref, o_ref, pool_ref):
    """Fused cb/rb conv2 + shortcut add + ReLU + global avg-pool + fc.

    Grid is over the batch; step b processes the H*W im2col rows of sample b,
    accumulates its pooled feature row into a VMEM scratch, and the last step
    does the tiny (N, 128) x (128, classes) matmul.
    """
    b = pl.program_id(0)
    acc = jnp.dot(p_ref[...], w_ref[...], preferred_element_type=jnp.float32)
    act = jnp.maximum(acc + b_ref[...] + r_ref[...], 0.0)        # (HW, 128)
    pool_ref[pl.ds(b, 1), :] = jnp.mean(act, axis=0, keepdims=True)

    @pl.when(b == pl.num_programs(0) - 1)
    def _():
        o_ref[...] = (jnp.dot(pool_ref[...], wfc_ref[...],
                              preferred_element_type=jnp.float32)
                      + bfc_ref[...])


# ----------------------------------------------------------------------------
# Glue: im2col, tiled conv wrapper, block / network composition
# ----------------------------------------------------------------------------
def _im2col(x, stride):
    """x: (N, H, W, C) NHWC -> (N*Ho*Wo, 9*C) in bf16, patch order (ky,kx,c)."""
    x = x.astype(jnp.bfloat16)
    N, H, W, C = x.shape
    Ho = (H + 2 - 3) // stride + 1
    Wo = (W + 2 - 3) // stride + 1
    xp = jnp.pad(x, ((0, 0), (1, 1), (1, 1), (0, 0)))
    cols = []
    for ky in range(3):
        for kx in range(3):
            cols.append(
                xp[:,
                   ky:ky + (Ho - 1) * stride + 1:stride,
                   kx:kx + (Wo - 1) * stride + 1:stride,
                   :])
    p = jnp.concatenate(cols, axis=-1)              # (N, Ho, Wo, 9*C) bf16
    return p.reshape(N * Ho * Wo, 9 * C), Ho, Wo


def _fold_bn(bn):
    gamma, beta, mean, var = bn
    scale = gamma / jnp.sqrt(var + BN_EPS)
    bias = beta - mean * scale
    return scale, bias


def _pick_tile(M, target=_TM_TARGET):
    """Largest multiple of 8 <= target that divides M (fallback: full M)."""
    t = min(target, M)
    t -= t % 8
    while t >= 8:
        if M % t == 0:
            return t
        t -= 8
    return M


def _run_conv_bn(patches, wmat, bias, residual, relu):
    M, K = patches.shape
    Cout = wmat.shape[1]
    TM = _pick_tile(M)
    grid = (M // TM,)

    args = [patches, wmat, bias.reshape(1, Cout).astype(jnp.float32)]
    in_specs = [
        pl.BlockSpec((TM, K), lambda i: (i, 0)),        # patch tile (pipelined)
        pl.BlockSpec((K, Cout), lambda i: (0, 0)),      # weights resident
        pl.BlockSpec((1, Cout), lambda i: (0, 0)),      # bias resident
    ]
    if residual is not None:
        args.append(residual.astype(jnp.float32))
        in_specs.append(pl.BlockSpec((TM, Cout), lambda i: (i, 0)))

    kernel = _conv_bn_kernel(relu, residual is not None)
    return pl.pallas_call(
        kernel,
        out_shape=jax.ShapeDtypeStruct((M, Cout), jnp.float32),
        grid=grid,
        in_specs=in_specs,
        out_specs=pl.BlockSpec((TM, Cout), lambda i: (i, 0)),
        compiler_params=pltpu.CompilerParams(
            dimension_semantics=("parallel",),          # independent M tiles
            vmem_limit_bytes=_VMEM_LIMIT),
    )(*args)


def conv3x3_bn(x, w, bn, stride, residual=None, relu=True):
    """3x3 conv (pad=1, no bias) + BatchNorm (+ residual, ReLU). NHWC, f32 out."""
    N, H, W, Cin = x.shape
    Cout = w.shape[-1]
    scale, bias = _fold_bn(bn)
    wmat = (w * scale).reshape(9 * Cin, Cout).astype(jnp.bfloat16)
    patches, Ho, Wo = _im2col(x, stride)
    res = (residual.reshape(N * Ho * Wo, Cout)
           if residual is not None else None)
    out = _run_conv_bn(patches, wmat, bias, res, relu)
    return out.reshape(N, Ho, Wo, Cout)


def basic_block(x, p, stride):
    in_planes = x.shape[-1]
    planes = p["w1"].shape[-1]
    out = conv3x3_bn(x, p["w1"], p["bn1"], stride, residual=None, relu=True)
    if stride != 1 or in_planes != planes:
        # Option A shortcut: spatial ::2 subsample + zero channel pad.
        sc = x[:, ::2, ::2, :]
        pad = planes // 4
        sc = jnp.pad(sc, ((0, 0), (0, 0), (0, 0), (pad, pad)))
    else:
        sc = x
    # conv2 + bn2 + shortcut add + ReLU, all fused in the kernel.
    out = conv3x3_bn(out, p["w2"], p["bn2"], 1, residual=sc, relu=True)
    return out


def bbn_resnet_forward(params, x_nchw):
    # NCHW -> NHWC
    x = jnp.transpose(x_nchw, (0, 2, 3, 1)).astype(jnp.float32)
    # NormalizeByChannelMeanStd
    mean = jnp.array([0.485, 0.456, 0.406], jnp.float32)
    std = jnp.array([0.229, 0.224, 0.225], jnp.float32)
    x = (x - mean) / std

    # stem: conv1 + bn1 + ReLU
    out = conv3x3_bn(x, params["conv1_w"], params["bn1"], 1,
                     residual=None, relu=True)

    for p in params["layer1"]:
        out = basic_block(out, p, p["stride"])
    for p in params["layer2"]:
        out = basic_block(out, p, p["stride"])
    for p in params["layer3"]:
        out = basic_block(out, p, p["stride"])

    # ------------------------------------------------------------------
    # Fused dual branch (cb_block + rb_block), stride 1, identity shortcut.
    # ------------------------------------------------------------------
    cb, rb = params["cb_block"], params["rb_block"]

    # conv1 of both branches shares the same input -> one 128-wide conv
    # (lane-dense output, one pallas_call instead of two).
    w1c = jnp.concatenate([cb["w1"], rb["w1"]], axis=-1)          # (3,3,64,128)
    bn1c = tuple(jnp.concatenate([a, b]) for a, b in zip(cb["bn1"], rb["bn1"]))
    out1c = conv3x3_bn(out, w1c, bn1c, 1, residual=None, relu=True)  # (N,H,W,128)

    # conv2 of both branches as one block-diagonal matmul; epilogue fuses
    # shortcut add + ReLU + global avg-pool + fc.
    N, H, W, _ = out1c.shape
    HW = H * W
    z = jnp.zeros_like(cb["w2"])                                  # (3,3,64,64)
    w2d = jnp.concatenate(
        [jnp.concatenate([cb["w2"], z], axis=-1),                 # cin 0..63
         jnp.concatenate([z, rb["w2"]], axis=-1)],                # cin 64..127
        axis=2)                                                   # (3,3,128,128)
    s_cb, b_cb = _fold_bn(cb["bn2"])
    s_rb, b_rb = _fold_bn(rb["bn2"])
    scale2 = jnp.concatenate([s_cb, s_rb])
    bias2 = jnp.concatenate([b_cb, b_rb]).reshape(1, 128).astype(jnp.float32)
    w2d = (w2d * scale2).reshape(9 * 128, 128).astype(jnp.bfloat16)

    patches2, _, _ = _im2col(out1c, 1)                            # (N*HW, 1152)
    res_tail = jnp.concatenate([out, out], axis=-1)               # identity sc
    res_tail = res_tail.reshape(N * HW, 128).astype(jnp.float32)

    wfc = params["fc_w"].T.astype(jnp.float32)                    # (128, classes)
    bfc = params["fc_b"].reshape(1, -1).astype(jnp.float32)
    num_classes = wfc.shape[1]
    Kc = 9 * 128

    logits = pl.pallas_call(
        _tail_kernel,
        out_shape=jax.ShapeDtypeStruct((N, num_classes), jnp.float32),
        grid=(N,),
        in_specs=[
            pl.BlockSpec((HW, Kc), lambda b: (b, 0)),     # per-sample patches
            pl.BlockSpec((Kc, 128), lambda b: (0, 0)),    # block-diag weights
            pl.BlockSpec((1, 128), lambda b: (0, 0)),     # bias
            pl.BlockSpec((HW, 128), lambda b: (b, 0)),    # residual
            pl.BlockSpec((128, num_classes), lambda b: (0, 0)),   # fc weight
            pl.BlockSpec((1, num_classes), lambda b: (0, 0)),     # fc bias
        ],
        out_specs=pl.BlockSpec((N, num_classes), lambda b: (0, 0)),
        scratch_shapes=[pltpu.VMEM((N, 128), jnp.float32)],
        compiler_params=pltpu.CompilerParams(
            dimension_semantics=("arbitrary",),           # output/scratch carried
            vmem_limit_bytes=_VMEM_LIMIT),
    )(patches2, w2d, bias2, res_tail, wfc, bfc)
    return logits


# ----------------------------------------------------------------------------
# Deterministic parameter initialization (mirrors __init__ shapes)
# ----------------------------------------------------------------------------
class _KeyGen:
    def __init__(self, key):
        self._key = key
        self._i = 0

    def __call__(self):
        self._i += 1
        return jax.random.fold_in(self._key, self._i)


def _kaiming_conv(key, cin, cout):
    fan_in = 9 * cin
    std = math.sqrt(2.0 / fan_in)
    return jax.random.normal(key, (3, 3, cin, cout), jnp.float32) * std


def _init_bn(kg, c):
    gamma = 1.0 + 0.1 * jax.random.normal(kg(), (c,), jnp.float32)
    beta = 0.1 * jax.random.normal(kg(), (c,), jnp.float32)
    mean = 0.1 * jax.random.normal(kg(), (c,), jnp.float32)
    var = jax.random.uniform(kg(), (c,), jnp.float32, minval=0.5, maxval=1.5)
    return (gamma, beta, mean, var)


def _init_block(kg, cin, planes, stride):
    return {
        "stride": stride,
        "w1": _kaiming_conv(kg(), cin, planes),
        "bn1": _init_bn(kg, planes),
        "w2": _kaiming_conv(kg(), planes, planes),
        "bn2": _init_bn(kg, planes),
    }


def _make_layer(kg, in_planes, planes, n, stride):
    strides = [stride] + [1] * (n - 1)
    blocks = []
    for s in strides:
        blocks.append(_init_block(kg, in_planes, planes, s))
        in_planes = planes
    return blocks, in_planes


def init_params(key, num_blocks=(1, 1, 2), num_classes=10):
    kg = _KeyGen(key)
    params = {}
    in_planes = 16
    params["conv1_w"] = _kaiming_conv(kg(), 3, 16)
    params["bn1"] = _init_bn(kg, 16)
    params["layer1"], in_planes = _make_layer(kg, in_planes, 16,
                                              num_blocks[0], 1)
    params["layer2"], in_planes = _make_layer(kg, in_planes, 32,
                                              num_blocks[1], 2)
    params["layer3"], in_planes = _make_layer(kg, in_planes, 64,
                                              num_blocks[2] - 1, 2)
    params["cb_block"] = _init_block(kg, in_planes, in_planes, 1)
    params["rb_block"] = _init_block(kg, in_planes, in_planes, 1)
    # fc: Linear(128, num_classes); kaiming weight, small uniform bias.
    fan_in = 128
    params["fc_w"] = (jax.random.normal(kg(), (num_classes, 128), jnp.float32)
                      * math.sqrt(2.0 / fan_in))
    bound = 1.0 / math.sqrt(fan_in)
    params["fc_b"] = jax.random.uniform(kg(), (num_classes,), jnp.float32,
                                        minval=-bound, maxval=bound)
    return params


# ----------------------------------------------------------------------------
if __name__ == "__main__":
    key = jax.random.PRNGKey(0)
    params = init_params(key, num_blocks=(1, 1, 2), num_classes=10)

    # Small CIFAR-like input: batch=2, 3 channels, 16x16 spatial (NCHW).
    x = jax.random.normal(jax.random.fold_in(key, 12345),
                          (2, 3, 16, 16), jnp.float32)

    fwd = jax.jit(functools.partial(bbn_resnet_forward, params))
    logits = fwd(x)
    jax.block_until_ready(logits)

    assert logits.shape == (2, 10), logits.shape
    assert bool(jnp.all(jnp.isfinite(logits)))
    print("KERNEL_OK")
</pallas_src>

<mosaic_0001>
module attributes {stable_mosaic.version = 11 : i64} {
  func.func @kernel(%arg0: i32, %arg1: memref<512x27xbf16, #tpu.memory_space<vmem>>, %arg2: memref<27x16xbf16, #tpu.memory_space<vmem>>, %arg3: memref<1x16xf32, #tpu.memory_space<vmem>>, %arg4: memref<512x16xf32, #tpu.memory_space<vmem>>) attributes {dimension_semantics = [#tpu.dimension_semantics<parallel>], iteration_bounds = array<i64: 1>, scalar_prefetch = 0 : i64, scratch_operands = 0 : i64, tpu.core_type = #tpu.core_type<tc>, window_params = [{transform_indices = @transform_0, window_bounds = array<i64: 512, 27>}, {pipeline_mode = #tpu.pipeline_mode<synchronous>, transform_indices = @transform_1, window_bounds = array<i64: 27, 16>}, {pipeline_mode = #tpu.pipeline_mode<synchronous>, transform_indices = @transform_2, window_bounds = array<i64: 1, 16>}, {transform_indices = @transform_3, window_bounds = array<i64: 512, 16>}]} {
    %c0 = arith.constant 0 : index
    %c0_0 = arith.constant 0 : index
    %0 = vector.load %arg1[%c0, %c0_0] : memref<512x27xbf16, #tpu.memory_space<vmem>>, vector<512x27xbf16>
    %c0_1 = arith.constant 0 : index
    %c0_2 = arith.constant 0 : index
    %1 = vector.load %arg2[%c0_1, %c0_2] : memref<27x16xbf16, #tpu.memory_space<vmem>>, vector<27x16xbf16>
    %cst = arith.constant dense<0.000000e+00> : vector<512x16xf32>
    %2 = tpu.matmul %0, %1, %cst {dimension_numbers = #tpu.dot_dimension_numbers<[1], [0], [0], [1], [0, 0, 1, 1], [], []>} : vector<512x27xbf16>, vector<27x16xbf16>, vector<512x16xf32> -> vector<512x16xf32>
    %c0_3 = arith.constant 0 : index
    %c0_4 = arith.constant 0 : index
    %3 = vector.load %arg3[%c0_3, %c0_4] : memref<1x16xf32, #tpu.memory_space<vmem>>, vector<1x16xf32>
    %4 = vector.broadcast %3 : vector<1x16xf32> to vector<512x16xf32>
    %5 = arith.addf %2, %4 : vector<512x16xf32>
    %cst_5 = arith.constant 0.000000e+00 : f32
    %6 = vector.broadcast %cst_5 : f32 to vector<512x16xf32>
    %7 = arith.maximumf %5, %6 : vector<512x16xf32>
    %c0_6 = arith.constant 0 : index
    %c0_7 = arith.constant 0 : index
    %8 = vector.load %arg4[%c0_6, %c0_7] : memref<512x16xf32, #tpu.memory_space<vmem>>, vector<512x16xf32>
    tpu.vector_store %arg4[%c0_6, %c0_7], %7 {strides = array<i32>} : memref<512x16xf32, #tpu.memory_space<vmem>>, vector<512x16xf32>,
    return
  }
  func.func @transform_0(%arg0: i32) -> (i32, i32) {
    %c0_i32 = arith.constant 0 : i32
    %c0_i32_0 = arith.constant 0 : i32
    return %arg0, %c0_i32 : i32, i32
  }
  func.func @transform_1(%arg0: i32) -> (i32, i32) {
    %c0_i32 = arith.constant 0 : i32
    %c0_i32_0 = arith.constant 0 : i32
    %c0_i32_1 = arith.constant 0 : i32
    return %c0_i32, %c0_i32_0 : i32, i32
  }
  func.func @transform_2(%arg0: i32) -> (i32, i32) {
    %c0_i32 = arith.constant 0 : i32
    %c0_i32_0 = arith.constant 0 : i32
    %c0_i32_1 = arith.constant 0 : i32
    return %c0_i32, %c0_i32_0 : i32, i32
  }
  func.func @transform_3(%arg0: i32) -> (i32, i32) {
    %c0_i32 = arith.constant 0 : i32
    %c0_i32_0 = arith.constant 0 : i32
    return %arg0, %c0_i32 : i32, i32
  }
}

module attributes {stable_mosaic.version = 11 : i64} {
  func.func @kernel(%arg0: i32, %arg1: memref<512x144xbf16, #tpu.memory_space<vmem>>, %arg2: memref<144x16xbf16, #tpu.memory_space<vmem>>, %arg3: memref<1x16xf32, #tpu.memory_space<vmem>>, %arg4: memref<512x16xf32, #tpu.memory_space<vmem>>) attributes {dimension_semantics = [#tpu.dimension_semantics<parallel>], iteration_bounds = array<i64: 1>, scalar_prefetch = 0 : i64, scratch_operands = 0 : i64, tpu.core_type = #tpu.core_type<tc>, window_params = [{transform_indices = @transform_0, window_bounds = array<i64: 512, 144>}, {pipeline_mode = #tpu.pipeline_mode<synchronous>, transform_indices = @transform_1, window_bounds = array<i64: 144, 16>}, {pipeline_mode = #tpu.pipeline_mode<synchronous>, transform_indices = @transform_2, window_bounds = array<i64: 1, 16>}, {transform_indices = @transform_3, window_bounds = array<i64: 512, 16>}]} {
    %c0 = arith.constant 0 : index
    %c0_0 = arith.constant 0 : index
    %0 = vector.load %arg1[%c0, %c0_0] : memref<512x144xbf16, #tpu.memory_space<vmem>>, vector<512x144xbf16>
    %c0_1 = arith.constant 0 : index
    %c0_2 = arith.constant 0 : index
    %1 = vector.load %arg2[%c0_1, %c0_2] : memref<144x16xbf16, #tpu.memory_space<vmem>>, vector<144x16xbf16>
    %cst = arith.constant dense<0.000000e+00> : vector<512x16xf32>
    %2 = tpu.matmul %0, %1, %cst {dimension_numbers = #tpu.dot_dimension_numbers<[1], [0], [0], [1], [0, 0, 1, 1], [], []>} : vector<512x144xbf16>, vector<144x16xbf16>, vector<512x16xf32> -> vector<512x16xf32>
    %c0_3 = arith.constant 0 : index
    %c0_4 = arith.constant 0 : index
    %3 = vector.load %arg3[%c0_3, %c0_4] : memref<1x16xf32, #tpu.memory_space<vmem>>, vector<1x16xf32>
    %4 = vector.broadcast %3 : vector<1x16xf32> to vector<512x16xf32>
    %5 = arith.addf %2, %4 : vector<512x16xf32>
    %cst_5 = arith.constant 0.000000e+00 : f32
    %6 = vector.broadcast %cst_5 : f32 to vector<512x16xf32>
    %7 = arith.maximumf %5, %6 : vector<512x16xf32>
    %c0_6 = arith.constant 0 : index
    %c0_7 = arith.constant 0 : index
    %8 = vector.load %arg4[%c0_6, %c0_7] : memref<512x16xf32, #tpu.memory_space<vmem>>, vector<512x16xf32>
    tpu.vector_store %arg4[%c0_6, %c0_7], %7 {strides = array<i32>} : memref<512x16xf32, #tpu.memory_space<vmem>>, vector<512x16xf32>,
    return
  }
  func.func @transform_0(%arg0: i32) -> (i32, i32) {
    %c0_i32 = arith.constant 0 : i32
    %c0_i32_0 = arith.constant 0 : i32
    return %arg0, %c0_i32 : i32, i32
  }
  func.func @transform_1(%arg0: i32) -> (i32, i32) {
    %c0_i32 = arith.constant 0 : i32
    %c0_i32_0 = arith.constant 0 : i32
    %c0_i32_1 = arith.constant 0 : i32
    return %c0_i32, %c0_i32_0 : i32, i32
  }
  func.func @transform_2(%arg0: i32) -> (i32, i32) {
    %c0_i32 = arith.constant 0 : i32
    %c0_i32_0 = arith.constant 0 : i32
    %c0_i32_1 = arith.constant 0 : i32
    return %c0_i32, %c0_i32_0 : i32, i32
  }
  func.func @transform_3(%arg0: i32) -> (i32, i32) {
    %c0_i32 = arith.constant 0 : i32
    %c0_i32_0 = arith.constant 0 : i32
    return %arg0, %c0_i32 : i32, i32
  }
}

module attributes {stable_mosaic.version = 11 : i64} {
  func.func @kernel(%arg0: i32, %arg1: memref<512x144xbf16, #tpu.memory_space<vmem>>, %arg2: memref<144x16xbf16, #tpu.memory_space<vmem>>, %arg3: memref<1x16xf32, #tpu.memory_space<vmem>>, %arg4: memref<512x16xf32, #tpu.memory_space<vmem>>, %arg5: memref<512x16xf32, #tpu.memory_space<vmem>>) attributes {dimension_semantics = [#tpu.dimension_semantics<parallel>], iteration_bounds = array<i64: 1>, scalar_prefetch = 0 : i64, scratch_operands = 0 : i64, tpu.core_type = #tpu.core_type<tc>, window_params = [{transform_indices = @transform_0, window_bounds = array<i64: 512, 144>}, {pipeline_mode = #tpu.pipeline_mode<synchronous>, transform_indices = @transform_1, window_bounds = array<i64: 144, 16>}, {pipeline_mode = #tpu.pipeline_mode<synchronous>, transform_indices = @transform_2, window_bounds = array<i64: 1, 16>}, {transform_indices = @transform_3, window_bounds = array<i64: 512, 16>}, {transform_indices = @transform_4, window_bounds = array<i64: 512, 16>}]} {
    %c0 = arith.constant 0 : index
    %c0_0 = arith.constant 0 : index
    %0 = vector.load %arg1[%c0, %c0_0] : memref<512x144xbf16, #tpu.memory_space<vmem>>, vector<512x144xbf16>
    %c0_1 = arith.constant 0 : index
    %c0_2 = arith.constant 0 : index
    %1 = vector.load %arg2[%c0_1, %c0_2] : memref<144x16xbf16, #tpu.memory_space<vmem>>, vector<144x16xbf16>
    %cst = arith.constant dense<0.000000e+00> : vector<512x16xf32>
    %2 = tpu.matmul %0, %1, %cst {dimension_numbers = #tpu.dot_dimension_numbers<[1], [0], [0], [1], [0, 0, 1, 1], [], []>} : vector<512x144xbf16>, vector<144x16xbf16>, vector<512x16xf32> -> vector<512x16xf32>
    %c0_3 = arith.constant 0 : index
    %c0_4 = arith.constant 0 : index
    %3 = vector.load %arg3[%c0_3, %c0_4] : memref<1x16xf32, #tpu.memory_space<vmem>>, vector<1x16xf32>
    %4 = vector.broadcast %3 : vector<1x16xf32> to vector<512x16xf32>
    %5 = arith.addf %2, %4 : vector<512x16xf32>
    %c0_5 = arith.constant 0 : index
    %c0_6 = arith.constant 0 : index
    %6 = vector.load %arg4[%c0_5, %c0_6] : memref<512x16xf32, #tpu.memory_space<vmem>>, vector<512x16xf32>
    %7 = arith.addf %5, %6 : vector<512x16xf32>
    %cst_7 = arith.constant 0.000000e+00 : f32
    %8 = vector.broadcast %cst_7 : f32 to vector<512x16xf32>
    %9 = arith.maximumf %7, %8 : vector<512x16xf32>
    %c0_8 = arith.constant 0 : index
    %c0_9 = arith.constant 0 : index
    %10 = vector.load %arg5[%c0_8, %c0_9] : memref<512x16xf32, #tpu.memory_space<vmem>>, vector<512x16xf32>
    tpu.vector_store %arg5[%c0_8, %c0_9], %9 {strides = array<i32>} : memref<512x16xf32, #tpu.memory_space<vmem>>, vector<512x16xf32>,
    return
  }
  func.func @transform_0(%arg0: i32) -> (i32, i32) {
    %c0_i32 = arith.constant 0 : i32
    %c0_i32_0 = arith.constant 0 : i32
    return %arg0, %c0_i32 : i32, i32
  }
  func.func @transform_1(%arg0: i32) -> (i32, i32) {
    %c0_i32 = arith.constant 0 : i32
    %c0_i32_0 = arith.constant 0 : i32
    %c0_i32_1 = arith.constant 0 : i32
    return %c0_i32, %c0_i32_0 : i32, i32
  }
  func.func @transform_2(%arg0: i32) -> (i32, i32) {
    %c0_i32 = arith.constant 0 : i32
    %c0_i32_0 = arith.constant 0 : i32
    %c0_i32_1 = arith.constant 0 : i32
    return %c0_i32, %c0_i32_0 : i32, i32
  }
  func.func @transform_3(%arg0: i32) -> (i32, i32) {
    %c0_i32 = arith.constant 0 : i32
    %c0_i32_0 = arith.constant 0 : i32
    return %arg0, %c0_i32 : i32, i32
  }
  func.func @transform_4(%arg0: i32) -> (i32, i32) {
    %c0_i32 = arith.constant 0 : i32
    %c0_i32_0 = arith.constant 0 : i32
    return %arg0, %c0_i32 : i32, i32
  }
}

module attributes {stable_mosaic.version = 11 : i64} {
  func.func @kernel(%arg0: i32, %arg1: memref<128x144xbf16, #tpu.memory_space<vmem>>, %arg2: memref<144x32xbf16, #tpu.memory_space<vmem>>, %arg3: memref<1x32xf32, #tpu.memory_space<vmem>>, %arg4: memref<128x32xf32, #tpu.memory_space<vmem>>) attributes {dimension_semantics = [#tpu.dimension_semantics<parallel>], iteration_bounds = array<i64: 1>, scalar_prefetch = 0 : i64, scratch_operands = 0 : i64, tpu.core_type = #tpu.core_type<tc>, window_params = [{transform_indices = @transform_0, window_bounds = array<i64: 128, 144>}, {pipeline_mode = #tpu.pipeline_mode<synchronous>, transform_indices = @transform_1, window_bounds = array<i64: 144, 32>}, {pipeline_mode = #tpu.pipeline_mode<synchronous>, transform_indices = @transform_2, window_bounds = array<i64: 1, 32>}, {transform_indices = @transform_3, window_bounds = array<i64: 128, 32>}]} {
    %c0 = arith.constant 0 : index
    %c0_0 = arith.constant 0 : index
    %0 = vector.load %arg1[%c0, %c0_0] : memref<128x144xbf16, #tpu.memory_space<vmem>>, vector<128x144xbf16>
    %c0_1 = arith.constant 0 : index
    %c0_2 = arith.constant 0 : index
    %1 = vector.load %arg2[%c0_1, %c0_2] : memref<144x32xbf16, #tpu.memory_space<vmem>>, vector<144x32xbf16>
    %cst = arith.constant dense<0.000000e+00> : vector<128x32xf32>
    %2 = tpu.matmul %0, %1, %cst {dimension_numbers = #tpu.dot_dimension_numbers<[1], [0], [0], [1], [0, 0, 1, 1], [], []>} : vector<128x144xbf16>, vector<144x32xbf16>, vector<128x32xf32> -> vector<128x32xf32>
    %c0_3 = arith.constant 0 : index
    %c0_4 = arith.constant 0 : index
    %3 = vector.load %arg3[%c0_3, %c0_4] : memref<1x32xf32, #tpu.memory_space<vmem>>, vector<1x32xf32>
    %4 = vector.broadcast %3 : vector<1x32xf32> to vector<128x32xf32>
    %5 = arith.addf %2, %4 : vector<128x32xf32>
    %cst_5 = arith.constant 0.000000e+00 : f32
    %6 = vector.broadcast %cst_5 : f32 to vector<128x32xf32>
    %7 = arith.maximumf %5, %6 : vector<128x32xf32>
    %c0_6 = arith.constant 0 : index
    %c0_7 = arith.constant 0 : index
    %8 = vector.load %arg4[%c0_6, %c0_7] : memref<128x32xf32, #tpu.memory_space<vmem>>, vector<128x32xf32>
    tpu.vector_store %arg4[%c0_6, %c0_7], %7 {strides = array<i32>} : memref<128x32xf32, #tpu.memory_space<vmem>>, vector<128x32xf32>,
    return
  }
  func.func @transform_0(%arg0: i32) -> (i32, i32) {
    %c0_i32 = arith.constant 0 : i32
    %c0_i32_0 = arith.constant 0 : i32
    return %arg0, %c0_i32 : i32, i32
  }
  func.func @transform_1(%arg0: i32) -> (i32, i32) {
    %c0_i32 = arith.constant 0 : i32
    %c0_i32_0 = arith.constant 0 : i32
    %c0_i32_1 = arith.constant 0 : i32
    return %c0_i32, %c0_i32_0 : i32, i32
  }
  func.func @transform_2(%arg0: i32) -> (i32, i32) {
    %c0_i32 = arith.constant 0 : i32
    %c0_i32_0 = arith.constant 0 : i32
    %c0_i32_1 = arith.constant 0 : i32
    return %c0_i32, %c0_i32_0 : i32, i32
  }
  func.func @transform_3(%arg0: i32) -> (i32, i32) {
    %c0_i32 = arith.constant 0 : i32
    %c0_i32_0 = arith.constant 0 : i32
    return %arg0, %c0_i32 : i32, i32
  }
}

module attributes {stable_mosaic.version = 11 : i64} {
  func.func @kernel(%arg0: i32, %arg1: memref<128x288xbf16, #tpu.memory_space<vmem>>, %arg2: memref<288x32xbf16, #tpu.memory_space<vmem>>, %arg3: memref<1x32xf32, #tpu.memory_space<vmem>>, %arg4: memref<128x32xf32, #tpu.memory_space<vmem>>, %arg5: memref<128x32xf32, #tpu.memory_space<vmem>>) attributes {dimension_semantics = [#tpu.dimension_semantics<parallel>], iteration_bounds = array<i64: 1>, scalar_prefetch = 0 : i64, scratch_operands = 0 : i64, tpu.core_type = #tpu.core_type<tc>, window_params = [{transform_indices = @transform_0, window_bounds = array<i64: 128, 288>}, {pipeline_mode = #tpu.pipeline_mode<synchronous>, transform_indices = @transform_1, window_bounds = array<i64: 288, 32>}, {pipeline_mode = #tpu.pipeline_mode<synchronous>, transform_indices = @transform_2, window_bounds = array<i64: 1, 32>}, {transform_indices = @transform_3, window_bounds = array<i64: 128, 32>}, {transform_indices = @transform_4, window_bounds = array<i64: 128, 32>}]} {
    %c0 = arith.constant 0 : index
    %c0_0 = arith.constant 0 : index
    %0 = vector.load %arg1[%c0, %c0_0] : memref<128x288xbf16, #tpu.memory_space<vmem>>, vector<128x288xbf16>
    %c0_1 = arith.constant 0 : index
    %c0_2 = arith.constant 0 : index
    %1 = vector.load %arg2[%c0_1, %c0_2] : memref<288x32xbf16, #tpu.memory_space<vmem>>, vector<288x32xbf16>
    %cst = arith.constant dense<0.000000e+00> : vector<128x32xf32>
    %2 = tpu.matmul %0, %1, %cst {dimension_numbers = #tpu.dot_dimension_numbers<[1], [0], [0], [1], [0, 0, 1, 1], [], []>} : vector<128x288xbf16>, vector<288x32xbf16>, vector<128x32xf32> -> vector<128x32xf32>
    %c0_3 = arith.constant 0 : index
    %c0_4 = arith.constant 0 : index
    %3 = vector.load %arg3[%c0_3, %c0_4] : memref<1x32xf32, #tpu.memory_space<vmem>>, vector<1x32xf32>
    %4 = vector.broadcast %3 : vector<1x32xf32> to vector<128x32xf32>
    %5 = arith.addf %2, %4 : vector<128x32xf32>
    %c0_5 = arith.constant 0 : index
    %c0_6 = arith.constant 0 : index
    %6 = vector.load %arg4[%c0_5, %c0_6] : memref<128x32xf32, #tpu.memory_space<vmem>>, vector<128x32xf32>
    %7 = arith.addf %5, %6 : vector<128x32xf32>
    %cst_7 = arith.constant 0.000000e+00 : f32
    %8 = vector.broadcast %cst_7 : f32 to vector<128x32xf32>
    %9 = arith.maximumf %7, %8 : vector<128x32xf32>
    %c0_8 = arith.constant 0 : index
    %c0_9 = arith.constant 0 : index
    %10 = vector.load %arg5[%c0_8, %c0_9] : memref<128x32xf32, #tpu.memory_space<vmem>>, vector<128x32xf32>
    tpu.vector_store %arg5[%c0_8, %c0_9], %9 {strides = array<i32>} : memref<128x32xf32, #tpu.memory_space<vmem>>, vector<128x32xf32>,
    return
  }
  func.func @transform_0(%arg0: i32) -> (i32, i32) {
    %c0_i32 = arith.constant 0 : i32
    %c0_i32_0 = arith.constant 0 : i32
    return %arg0, %c0_i32 : i32, i32
  }
  func.func @transform_1(%arg0: i32) -> (i32, i32) {
    %c0_i32 = arith.constant 0 : i32
    %c0_i32_0 = arith.constant 0 : i32
    %c0_i32_1 = arith.constant 0 : i32
    return %c0_i32, %c0_i32_0 : i32, i32
  }
  func.func @transform_2(%arg0: i32) -> (i32, i32) {
    %c0_i32 = arith.constant 0 : i32
    %c0_i32_0 = arith.constant 0 : i32
    %c0_i32_1 = arith.constant 0 : i32
    return %c0_i32, %c0_i32_0 : i32, i32
  }
  func.func @transform_3(%arg0: i32) -> (i32, i32) {
    %c0_i32 = arith.constant 0 : i32
    %c0_i32_0 = arith.constant 0 : i32
    return %arg0, %c0_i32 : i32, i32
  }
  func.func @transform_4(%arg0: i32) -> (i32, i32) {
    %c0_i32 = arith.constant 0 : i32
    %c0_i32_0 = arith.constant 0 : i32
    return %arg0, %c0_i32 : i32, i32
  }
}

module attributes {stable_mosaic.version = 11 : i64} {
  func.func @kernel(%arg0: i32, %arg1: memref<32x288xbf16, #tpu.memory_space<vmem>>, %arg2: memref<288x64xbf16, #tpu.memory_space<vmem>>, %arg3: memref<1x64xf32, #tpu.memory_space<vmem>>, %arg4: memref<32x64xf32, #tpu.memory_space<vmem>>) attributes {dimension_semantics = [#tpu.dimension_semantics<parallel>], iteration_bounds = array<i64: 1>, scalar_prefetch = 0 : i64, scratch_operands = 0 : i64, tpu.core_type = #tpu.core_type<tc>, window_params = [{transform_indices = @transform_0, window_bounds = array<i64: 32, 288>}, {pipeline_mode = #tpu.pipeline_mode<synchronous>, transform_indices = @transform_1, window_bounds = array<i64: 288, 64>}, {pipeline_mode = #tpu.pipeline_mode<synchronous>, transform_indices = @transform_2, window_bounds = array<i64: 1, 64>}, {transform_indices = @transform_3, window_bounds = array<i64: 32, 64>}]} {
    %c0 = arith.constant 0 : index
    %c0_0 = arith.constant 0 : index
    %0 = vector.load %arg1[%c0, %c0_0] : memref<32x288xbf16, #tpu.memory_space<vmem>>, vector<32x288xbf16>
    %c0_1 = arith.constant 0 : index
    %c0_2 = arith.constant 0 : index
    %1 = vector.load %arg2[%c0_1, %c0_2] : memref<288x64xbf16, #tpu.memory_space<vmem>>, vector<288x64xbf16>
    %cst = arith.constant dense<0.000000e+00> : vector<32x64xf32>
    %2 = tpu.matmul %0, %1, %cst {dimension_numbers = #tpu.dot_dimension_numbers<[1], [0], [0], [1], [0, 0, 1, 1], [], []>} : vector<32x288xbf16>, vector<288x64xbf16>, vector<32x64xf32> -> vector<32x64xf32>
    %c0_3 = arith.constant 0 : index
    %c0_4 = arith.constant 0 : index
    %3 = vector.load %arg3[%c0_3, %c0_4] : memref<1x64xf32, #tpu.memory_space<vmem>>, vector<1x64xf32>
    %4 = vector.broadcast %3 : vector<1x64xf32> to vector<32x64xf32>
    %5 = arith.addf %2, %4 : vector<32x64xf32>
    %cst_5 = arith.constant 0.000000e+00 : f32
    %6 = vector.broadcast %cst_5 : f32 to vector<32x64xf32>
    %7 = arith.maximumf %5, %6 : vector<32x64xf32>
    %c0_6 = arith.constant 0 : index
    %c0_7 = arith.constant 0 : index
    %8 = vector.load %arg4[%c0_6, %c0_7] : memref<32x64xf32, #tpu.memory_space<vmem>>, vector<32x64xf32>
    tpu.vector_store %arg4[%c0_6, %c0_7], %7 {strides = array<i32>} : memref<32x64xf32, #tpu.memory_space<vmem>>, vector<32x64xf32>,
    return
  }
  func.func @transform_0(%arg0: i32) -> (i32, i32) {
    %c0_i32 = arith.constant 0 : i32
    %c0_i32_0 = arith.constant 0 : i32
    return %arg0, %c0_i32 : i32, i32
  }
  func.func @transform_1(%arg0: i32) -> (i32, i32) {
    %c0_i32 = arith.constant 0 : i32
    %c0_i32_0 = arith.constant 0 : i32
    %c0_i32_1 = arith.constant 0 : i32
    return %c0_i32, %c0_i32_0 : i32, i32
  }
  func.func @transform_2(%arg0: i32) -> (i32, i32) {
    %c0_i32 = arith.constant 0 : i32
    %c0_i32_0 = arith.constant 0 : i32
    %c0_i32_1 = arith.constant 0 : i32
    return %c0_i32, %c0_i32_0 : i32, i32
  }
  func.func @transform_3(%arg0: i32) -> (i32, i32) {
    %c0_i32 = arith.constant 0 : i32
    %c0_i32_0 = arith.constant 0 : i32
    return %arg0, %c0_i32 : i32, i32
  }
}

module attributes {stable_mosaic.version = 11 : i64} {
  func.func @kernel(%arg0: i32, %arg1: memref<32x576xbf16, #tpu.memory_space<vmem>>, %arg2: memref<576x64xbf16, #tpu.memory_space<vmem>>, %arg3: memref<1x64xf32, #tpu.memory_space<vmem>>, %arg4: memref<32x64xf32, #tpu.memory_space<vmem>>, %arg5: memref<32x64xf32, #tpu.memory_space<vmem>>) attributes {dimension_semantics = [#tpu.dimension_semantics<parallel>], iteration_bounds = array<i64: 1>, scalar_prefetch = 0 : i64, scratch_operands = 0 : i64, tpu.core_type = #tpu.core_type<tc>, window_params = [{transform_indices = @transform_0, window_bounds = array<i64: 32, 576>}, {pipeline_mode = #tpu.pipeline_mode<synchronous>, transform_indices = @transform_1, window_bounds = array<i64: 576, 64>}, {pipeline_mode = #tpu.pipeline_mode<synchronous>, transform_indices = @transform_2, window_bounds = array<i64: 1, 64>}, {transform_indices = @transform_3, window_bounds = array<i64: 32, 64>}, {transform_indices = @transform_4, window_bounds = array<i64: 32, 64>}]} {
    %c0 = arith.constant 0 : index
    %c0_0 = arith.constant 0 : index
    %0 = vector.load %arg1[%c0, %c0_0] : memref<32x576xbf16, #tpu.memory_space<vmem>>, vector<32x576xbf16>
    %c0_1 = arith.constant 0 : index
    %c0_2 = arith.constant 0 : index
    %1 = vector.load %arg2[%c0_1, %c0_2] : memref<576x64xbf16, #tpu.memory_space<vmem>>, vector<576x64xbf16>
    %cst = arith.constant dense<0.000000e+00> : vector<32x64xf32>
    %2 = tpu.matmul %0, %1, %cst {dimension_numbers = #tpu.dot_dimension_numbers<[1], [0], [0], [1], [0, 0, 1, 1], [], []>} : vector<32x576xbf16>, vector<576x64xbf16>, vector<32x64xf32> -> vector<32x64xf32>
    %c0_3 = arith.constant 0 : index
    %c0_4 = arith.constant 0 : index
    %3 = vector.load %arg3[%c0_3, %c0_4] : memref<1x64xf32, #tpu.memory_space<vmem>>, vector<1x64xf32>
    %4 = vector.broadcast %3 : vector<1x64xf32> to vector<32x64xf32>
    %5 = arith.addf %2, %4 : vector<32x64xf32>
    %c0_5 = arith.constant 0 : index
    %c0_6 = arith.constant 0 : index
    %6 = vector.load %arg4[%c0_5, %c0_6] : memref<32x64xf32, #tpu.memory_space<vmem>>, vector<32x64xf32>
    %7 = arith.addf %5, %6 : vector<32x64xf32>
    %cst_7 = arith.constant 0.000000e+00 : f32
    %8 = vector.broadcast %cst_7 : f32 to vector<32x64xf32>
    %9 = arith.maximumf %7, %8 : vector<32x64xf32>
    %c0_8 = arith.constant 0 : index
    %c0_9 = arith.constant 0 : index
    %10 = vector.load %arg5[%c0_8, %c0_9] : memref<32x64xf32, #tpu.memory_space<vmem>>, vector<32x64xf32>
    tpu.vector_store %arg5[%c0_8, %c0_9], %9 {strides = array<i32>} : memref<32x64xf32, #tpu.memory_space<vmem>>, vector<32x64xf32>,
    return
  }
  func.func @transform_0(%arg0: i32) -> (i32, i32) {
    %c0_i32 = arith.constant 0 : i32
    %c0_i32_0 = arith.constant 0 : i32
    return %arg0, %c0_i32 : i32, i32
  }
  func.func @transform_1(%arg0: i32) -> (i32, i32) {
    %c0_i32 = arith.constant 0 : i32
    %c0_i32_0 = arith.constant 0 : i32
    %c0_i32_1 = arith.constant 0 : i32
    return %c0_i32, %c0_i32_0 : i32, i32
  }
  func.func @transform_2(%arg0: i32) -> (i32, i32) {
    %c0_i32 = arith.constant 0 : i32
    %c0_i32_0 = arith.constant 0 : i32
    %c0_i32_1 = arith.constant 0 : i32
    return %c0_i32, %c0_i32_0 : i32, i32
  }
  func.func @transform_3(%arg0: i32) -> (i32, i32) {
    %c0_i32 = arith.constant 0 : i32
    %c0_i32_0 = arith.constant 0 : i32
    return %arg0, %c0_i32 : i32, i32
  }
  func.func @transform_4(%arg0: i32) -> (i32, i32) {
    %c0_i32 = arith.constant 0 : i32
    %c0_i32_0 = arith.constant 0 : i32
    return %arg0, %c0_i32 : i32, i32
  }
}

module attributes {stable_mosaic.version = 11 : i64} {
  func.func @kernel(%arg0: i32, %arg1: memref<32x576xbf16, #tpu.memory_space<vmem>>, %arg2: memref<576x128xbf16, #tpu.memory_space<vmem>>, %arg3: memref<1x128xf32, #tpu.memory_space<vmem>>, %arg4: memref<32x128xf32, #tpu.memory_space<vmem>>) attributes {dimension_semantics = [#tpu.dimension_semantics<parallel>], iteration_bounds = array<i64: 1>, scalar_prefetch = 0 : i64, scratch_operands = 0 : i64, tpu.core_type = #tpu.core_type<tc>, window_params = [{transform_indices = @transform_0, window_bounds = array<i64: 32, 576>}, {pipeline_mode = #tpu.pipeline_mode<synchronous>, transform_indices = @transform_1, window_bounds = array<i64: 576, 128>}, {pipeline_mode = #tpu.pipeline_mode<synchronous>, transform_indices = @transform_2, window_bounds = array<i64: 1, 128>}, {transform_indices = @transform_3, window_bounds = array<i64: 32, 128>}]} {
    %c0 = arith.constant 0 : index
    %c0_0 = arith.constant 0 : index
    %0 = vector.load %arg1[%c0, %c0_0] : memref<32x576xbf16, #tpu.memory_space<vmem>>, vector<32x576xbf16>
    %c0_1 = arith.constant 0 : index
    %c0_2 = arith.constant 0 : index
    %1 = vector.load %arg2[%c0_1, %c0_2] : memref<576x128xbf16, #tpu.memory_space<vmem>>, vector<576x128xbf16>
    %cst = arith.constant dense<0.000000e+00> : vector<32x128xf32>
    %2 = tpu.matmul %0, %1, %cst {dimension_numbers = #tpu.dot_dimension_numbers<[1], [0], [0], [1], [0, 0, 1, 1], [], []>} : vector<32x576xbf16>, vector<576x128xbf16>, vector<32x128xf32> -> vector<32x128xf32>
    %c0_3 = arith.constant 0 : index
    %c0_4 = arith.constant 0 : index
    %3 = vector.load %arg3[%c0_3, %c0_4] : memref<1x128xf32, #tpu.memory_space<vmem>>, vector<1x128xf32>
    %4 = vector.broadcast %3 : vector<1x128xf32> to vector<32x128xf32>
    %5 = arith.addf %2, %4 : vector<32x128xf32>
    %cst_5 = arith.constant 0.000000e+00 : f32
    %6 = vector.broadcast %cst_5 : f32 to vector<32x128xf32>
    %7 = arith.maximumf %5, %6 : vector<32x128xf32>
    %c0_6 = arith.constant 0 : index
    %c0_7 = arith.constant 0 : index
    %8 = vector.load %arg4[%c0_6, %c0_7] : memref<32x128xf32, #tpu.memory_space<vmem>>, vector<32x128xf32>
    tpu.vector_store %arg4[%c0_6, %c0_7], %7 {strides = array<i32>} : memref<32x128xf32, #tpu.memory_space<vmem>>, vector<32x128xf32>,
    return
  }
  func.func @transform_0(%arg0: i32) -> (i32, i32) {
    %c0_i32 = arith.constant 0 : i32
    %c0_i32_0 = arith.constant 0 : i32
    return %arg0, %c0_i32 : i32, i32
  }
  func.func @transform_1(%arg0: i32) -> (i32, i32) {
    %c0_i32 = arith.constant 0 : i32
    %c0_i32_0 = arith.constant 0 : i32
    %c0_i32_1 = arith.constant 0 : i32
    return %c0_i32, %c0_i32_0 : i32, i32
  }
  func.func @transform_2(%arg0: i32) -> (i32, i32) {
    %c0_i32 = arith.constant 0 : i32
    %c0_i32_0 = arith.constant 0 : i32
    %c0_i32_1 = arith.constant 0 : i32
    return %c0_i32, %c0_i32_0 : i32, i32
  }
  func.func @transform_3(%arg0: i32) -> (i32, i32) {
    %c0_i32 = arith.constant 0 : i32
    %c0_i32_0 = arith.constant 0 : i32
    return %arg0, %c0_i32 : i32, i32
  }
}

module attributes {stable_mosaic.version = 11 : i64} {
  func.func @_tail_kernel(%arg0: i32, %arg1: memref<16x1152xbf16, #tpu.memory_space<vmem>>, %arg2: memref<1152x128xbf16, #tpu.memory_space<vmem>>, %arg3: memref<1x128xf32, #tpu.memory_space<vmem>>, %arg4: memref<16x128xf32, #tpu.memory_space<vmem>>, %arg5: memref<128x10xf32, #tpu.memory_space<vmem>>, %arg6: memref<1x10xf32, #tpu.memory_space<vmem>>, %arg7: memref<2x10xf32, #tpu.memory_space<vmem>>, %arg8: memref<2x128xf32, #tpu.memory_space<vmem>>) attributes {dimension_semantics = [#tpu.dimension_semantics<arbitrary>], iteration_bounds = array<i64: 2>, scalar_prefetch = 0 : i64, scratch_operands = 1 : i64, tpu.core_type = #tpu.core_type<tc>, window_params = [{transform_indices = @transform_0, window_bounds = array<i64: 16, 1152>}, {pipeline_mode = #tpu.pipeline_mode<synchronous>, transform_indices = @transform_1, window_bounds = array<i64: 1152, 128>}, {pipeline_mode = #tpu.pipeline_mode<synchronous>, transform_indices = @transform_2, window_bounds = array<i64: 1, 128>}, {transform_indices = @transform_3, window_bounds = array<i64: 16, 128>}, {pipeline_mode = #tpu.pipeline_mode<synchronous>, transform_indices = @transform_4, window_bounds = array<i64: 128, 10>}, {pipeline_mode = #tpu.pipeline_mode<synchronous>, transform_indices = @transform_5, window_bounds = array<i64: 1, 10>}, {pipeline_mode = #tpu.pipeline_mode<synchronous>, transform_indices = @transform_6, window_bounds = array<i64: 2, 10>}]} {
    %c0 = arith.constant 0 : index
    %c0_0 = arith.constant 0 : index
    %0 = vector.load %arg1[%c0, %c0_0] : memref<16x1152xbf16, #tpu.memory_space<vmem>>, vector<16x1152xbf16>
    %c0_1 = arith.constant 0 : index
    %c0_2 = arith.constant 0 : index
    %1 = vector.load %arg2[%c0_1, %c0_2] : memref<1152x128xbf16, #tpu.memory_space<vmem>>, vector<1152x128xbf16>
    %cst = arith.constant dense<0.000000e+00> : vector<16x128xf32>
    %2 = tpu.matmul %0, %1, %cst {dimension_numbers = #tpu.dot_dimension_numbers<[1], [0], [0], [1], [0, 0, 1, 1], [], []>} : vector<16x1152xbf16>, vector<1152x128xbf16>, vector<16x128xf32> -> vector<16x128xf32>
    %c0_3 = arith.constant 0 : index
    %c0_4 = arith.constant 0 : index
    %3 = vector.load %arg3[%c0_3, %c0_4] : memref<1x128xf32, #tpu.memory_space<vmem>>, vector<1x128xf32>
    %4 = vector.broadcast %3 : vector<1x128xf32> to vector<16x128xf32>
    %5 = arith.addf %2, %4 : vector<16x128xf32>
    %c0_5 = arith.constant 0 : index
    %c0_6 = arith.constant 0 : index
    %6 = vector.load %arg4[%c0_5, %c0_6] : memref<16x128xf32, #tpu.memory_space<vmem>>, vector<16x128xf32>
    %7 = arith.addf %5, %6 : vector<16x128xf32>
    %cst_7 = arith.constant 0.000000e+00 : f32
    %8 = vector.broadcast %cst_7 : f32 to vector<16x128xf32>
    %9 = arith.maximumf %7, %8 : vector<16x128xf32>
    %cst_8 = arith.constant dense<0.000000e+00> : vector<128xf32>
    %10 = vector.multi_reduction <add>, %9, %cst_8 [0] : vector<16x128xf32> to vector<128xf32>
    %11 = vector.shape_cast %10 : vector<128xf32> to vector<1x128xf32>
    %cst_9 = arith.constant 1.600000e+01 : f32
    %12 = vector.broadcast %cst_9 : f32 to vector<1x128xf32>
    %13 = arith.divf %11, %12 : vector<1x128xf32>
    %14 = arith.index_cast %arg0 : i32 to index
    %c0_10 = arith.constant 0 : index
    %15 = vector.load %arg8[%14, %c0_10] : memref<2x128xf32, #tpu.memory_space<vmem>>, vector<1x128xf32>
    tpu.vector_store %arg8[%14, %c0_10], %13 {strides = array<i32>} : memref<2x128xf32, #tpu.memory_space<vmem>>, vector<1x128xf32>,
    %c1_i32 = arith.constant 1 : i32
    %16 = arith.cmpi eq, %arg0, %c1_i32 : i32
    %17 = arith.extui %16 : i1 to i32
    %c0_i32 = arith.constant 0 : i32
    %18 = arith.cmpi ne, %17, %c0_i32 : i32
    scf.if %18 {
      %c0_11 = arith.constant 0 : index
      %c0_12 = arith.constant 0 : index
      %19 = vector.load %arg8[%c0_11, %c0_12] : memref<2x128xf32, #tpu.memory_space<vmem>>, vector<2x128xf32>
      %c0_13 = arith.constant 0 : index
      %c0_14 = arith.constant 0 : index
      %20 = vector.load %arg5[%c0_13, %c0_14] : memref<128x10xf32, #tpu.memory_space<vmem>>, vector<128x10xf32>
      %cst_15 = arith.constant dense<0.000000e+00> : vector<2x10xf32>
      %21 = tpu.matmul %19, %20, %cst_15 {dimension_numbers = #tpu.dot_dimension_numbers<[1], [0], [0], [1], [0, 0, 1, 1], [], []>} : vector<2x128xf32>, vector<128x10xf32>, vector<2x10xf32> -> vector<2x10xf32>
      %c0_16 = arith.constant 0 : index
      %c0_17 = arith.constant 0 : index
      %22 = vector.load %arg6[%c0_16, %c0_17] : memref<1x10xf32, #tpu.memory_space<vmem>>, vector<1x10xf32>
      %23 = vector.broadcast %22 : vector<1x10xf32> to vector<2x10xf32>
      %24 = arith.addf %21, %23 : vector<2x10xf32>
      %c0_18 = arith.constant 0 : index
      %c0_19 = arith.constant 0 : index
      %25 = vector.load %arg7[%c0_18, %c0_19] : memref<2x10xf32, #tpu.memory_space<vmem>>, vector<2x10xf32>
      tpu.vector_store %arg7[%c0_18, %c0_19], %24 {strides = array<i32>} : memref<2x10xf32, #tpu.memory_space<vmem>>, vector<2x10xf32>,
    } else {
    }
    return
  }
  func.func @transform_0(%arg0: i32) -> (i32, i32) {
    %c0_i32 = arith.constant 0 : i32
    %c0_i32_0 = arith.constant 0 : i32
    return %arg0, %c0_i32 : i32, i32
  }
  func.func @transform_1(%arg0: i32) -> (i32, i32) {
    %c0_i32 = arith.constant 0 : i32
    %c0_i32_0 = arith.constant 0 : i32
    %c0_i32_1 = arith.constant 0 : i32
    return %c0_i32, %c0_i32_0 : i32, i32
  }
  func.func @transform_2(%arg0: i32) -> (i32, i32) {
    %c0_i32 = arith.constant 0 : i32
    %c0_i32_0 = arith.constant 0 : i32
    %c0_i32_1 = arith.constant 0 : i32
    return %c0_i32, %c0_i32_0 : i32, i32
  }
  func.func @transform_3(%arg0: i32) -> (i32, i32) {
    %c0_i32 = arith.constant 0 : i32
    %c0_i32_0 = arith.constant 0 : i32
    return %arg0, %c0_i32 : i32, i32
  }
  func.func @transform_4(%arg0: i32) -> (i32, i32) {
    %c0_i32 = arith.constant 0 : i32
    %c0_i32_0 = arith.constant 0 : i32
    %c0_i32_1 = arith.constant 0 : i32
    return %c0_i32, %c0_i32_0 : i32, i32
  }
  func.func @transform_5(%arg0: i32) -> (i32, i32) {
    %c0_i32 = arith.constant 0 : i32
    %c0_i32_0 = arith.constant 0 : i32
    %c0_i32_1 = arith.constant 0 : i32
    return %c0_i32, %c0_i32_0 : i32, i32
  }
  func.func @transform_6(%arg0: i32) -> (i32, i32) {
    %c0_i32 = arith.constant 0 : i32
    %c0_i32_0 = arith.constant 0 : i32
    %c0_i32_1 = arith.constant 0 : i32
    return %c0_i32, %c0_i32_0 : i32, i32
  }
}

</mosaic_0001>

<bundles_post_ra>
// kernel: bbn_resnet_forward.9
= control target key start
LH: loop header
LB: loop body
LE: loop exit
PB: predicated region body
PF: predicated region fallthrough
CT: control target
= control target key end

     0   :  { %vm355_vm0 = vcmask 1044480   ;;  %vm356_vm1 = vcmask 1045504   ;;  %v874_v2 = vmov 65535   ;;  %vm258_vm2 = vcmask 220160   ;;  %s1357_s1 = inlined_call_operand.vmem [shape: bf16[27,16], index: 1, kind: input, shape index: {}]   ;;  %s1358_s2 = inlined_call_operand.vmem [shape: f32[1,16], index: 2, kind: input, shape index: {}]   ;;  %s1359_s0 = inlined_call_operand.vmem [shape: bf16[512,27], index: 0, kind: input, shape index: {}]   ;;  %s1360_s3 = inlined_call_operand.vmem [shape: f32[512,16], index: 3, kind: output, shape index: {}]  }
   0x1   :  { %v798_v0 = vld [vmem:[%s1357_s1 + $0x8] sm:$0xf]  ;;  %v865_v1 = vld [vmem:[%s1357_s1 + $0x8] sm:$0x30]  ;;  %v357_v3 = vsel %vm355_vm0, 4294967295, %v874_v2  ;;  %v864_v7 = vld [vmem:[%s1357_s1] sm:$0xff] }
   0x2   :  { %v799_v4 = vor.u32 %v865_v1, %v798_v0  ;;  %v358_v5 = vsel %vm356_vm1, %v357_v3, 0  ;;  %v832_v8 = vld [vmem:[%s1359_s0] sm:$0xff]  ;;  %v833_v12 = vld [vmem:[%s1359_s0 + $0x8] sm:$0xff]  ;;  %v834_v16 = vld [vmem:[%s1359_s0 + $0x10] sm:$0xff]  ;;  %vm595_vm3 = vcmask 130048  }
   0x3   :  { %v840_v9 = vld [vmem:[%s1359_s0 + $0x40] sm:$0xff]  ;;  %v841_v13 = vld [vmem:[%s1359_s0 + $0x48] sm:$0xff]  ;;  %v842_v17 = vld [vmem:[%s1359_s0 + $0x50] sm:$0xff] }
   0x4   :  { %v360_v6 = vand.u32 %v799_v4, %v358_v5  ;;  %v848_v10 = vld [vmem:[%s1359_s0 + $0x80] sm:$0xff]  ;;  %v849_v14 = vld [vmem:[%s1359_s0 + $0x88] sm:$0xff]  ;;  %v850_v18 = vld [vmem:[%s1359_s0 + $0x90] sm:$0xff] }
   0x5   :  { %v856_v11 = vld [vmem:[%s1359_s0 + $0xc0] sm:$0xff]  ;;  %v857_v15 = vld [vmem:[%s1359_s0 + $0xc8] sm:$0xff]  ;;  %v858_v19 = vld [vmem:[%s1359_s0 + $0xd0] sm:$0xff] }
   0x6   :  { %368 = vmatpush.bf16.msra.mxu0 %v360_v6  ;;  %866 = vmatpush.bf16.msra.mxu1 %v360_v6  ;;  %v835_v20 = vld [vmem:[%s1359_s0 + $0x18] sm:$0xff]  ;;  %v836_v24 = vld [vmem:[%s1359_s0 + $0x20] sm:$0xff]  ;;  %v837_v28 = vld [vmem:[%s1359_s0 + $0x28] sm:$0xff] }
   0x7   :  { %867 = vmatpush.bf16.msra.mxu2 %v360_v6  ;;  %868 = vmatpush.bf16.msra.mxu3 %v360_v6  ;;  %v843_v21 = vld [vmem:[%s1359_s0 + $0x58] sm:$0xff]  ;;  %v844_v25 = vld [vmem:[%s1359_s0 + $0x60] sm:$0xff]  ;;  %v845_v29 = vld [vmem:[%s1359_s0 + $0x68] sm:$0xff] }
   0x8   :  { %v851_v22 = vld [vmem:[%s1359_s0 + $0x98] sm:$0xff]  ;;  %v852_v26 = vld [vmem:[%s1359_s0 + $0xa0] sm:$0xff]  ;;  %v853_v30 = vld [vmem:[%s1359_s0 + $0xa8] sm:$0xff] }
   0x9   :  { %v859_v23 = vld [vmem:[%s1359_s0 + $0xd8] sm:$0xff]  ;;  %v860_v27 = vld [vmem:[%s1359_s0 + $0xe0] sm:$0xff]  ;;  %v861_v31 = vld [vmem:[%s1359_s0 + $0xe8] sm:$0xff] }
   0xa   :  { %369 = vmatpush.bf16.msra.mxu0 %v864_v7  ;;  %869 = vmatpush.bf16.msra.mxu1 %v864_v7  ;;  %v838_v32 = vld [vmem:[%s1359_s0 + $0x30] sm:$0xff]  ;;  %v839_v36 = vld [vmem:[%s1359_s0 + $0x38] sm:$0xff]  ;;  %v1035_v40 = vld [vmem:[%s1358_s2] ss:$0 sm:$0xff] }
   0xb   :  { %870 = vmatpush.bf16.msra.mxu2 %v864_v7  ;;  %871 = vmatpush.bf16.msra.mxu3 %v864_v7  ;;  %v846_v33 = vld [vmem:[%s1359_s0 + $0x70] sm:$0xff]  ;;  %v847_v37 = vld [vmem:[%s1359_s0 + $0x78] sm:$0xff] }
   0xc   :  { %v854_v34 = vld [vmem:[%s1359_s0 + $0xb0] sm:$0xff]  ;;  %v855_v38 = vld [vmem:[%s1359_s0 + $0xb8] sm:$0xff] }
   0xd   :  { %800 = vmatmul.msk.bf16.vlgmr.msra.gmra.mxu0 %vm258_vm2, %v832_v8  ;;  %808 = vmatmul.msk.bf16.vlgmr.msra.gmra.mxu1 %vm258_vm2, %v840_v9  ;;  %v862_v35 = vld [vmem:[%s1359_s0 + $0xf0] sm:$0xff]  ;;  %v863_v39 = vld [vmem:[%s1359_s0 + $0xf8] sm:$0xff] }
   0xe   :  { %816 = vmatmul.msk.bf16.vlgmr.msra.gmra.mxu2 %vm258_vm2, %v848_v10  ;;  %824 = vmatmul.msk.bf16.vlgmr.msra.gmra.mxu3 %vm258_vm2, %v856_v11 }
  0x1d   :  { %801 = vmatmul.msk.bf16.gmra.mxu0 %vm258_vm2, %v833_v12  ;;  %809 = vmatmul.msk.bf16.gmra.mxu1 %vm258_vm2, %v841_v13 }
  0x1e   :  { %817 = vmatmul.msk.bf16.gmra.mxu2 %vm258_vm2, %v849_v14  ;;  %825 = vmatmul.msk.bf16.gmra.mxu3 %vm258_vm2, %v857_v15 }
  0x2d   :  { %802 = vmatmul.msk.bf16.gmra.mxu0 %vm258_vm2, %v834_v16  ;;  %810 = vmatmul.msk.bf16.gmra.mxu1 %vm258_vm2, %v842_v17 }
  0x2e   :  { %818 = vmatmul.msk.bf16.gmra.mxu2 %vm258_vm2, %v850_v18  ;;  %826 = vmatmul.msk.bf16.gmra.mxu3 %vm258_vm2, %v858_v19 }
  0x3d   :  { %803 = vmatmul.msk.bf16.gmra.mxu0 %vm258_vm2, %v835_v20  ;;  %811 = vmatmul.msk.bf16.gmra.mxu1 %vm258_vm2, %v843_v21 }
  0x3e   :  { %819 = vmatmul.msk.bf16.gmra.mxu2 %vm258_vm2, %v851_v22  ;;  %827 = vmatmul.msk.bf16.gmra.mxu3 %vm258_vm2, %v859_v23 }
  0x4d   :  { %804 = vmatmul.msk.bf16.gmra.mxu0 %vm258_vm2, %v836_v24  ;;  %812 = vmatmul.msk.bf16.gmra.mxu1 %vm258_vm2, %v844_v25 }
  0x4e   :  { %820 = vmatmul.msk.bf16.gmra.mxu2 %vm258_vm2, %v852_v26  ;;  %828 = vmatmul.msk.bf16.gmra.mxu3 %vm258_vm2, %v860_v27 }
  0x5d   :  { %805 = vmatmul.msk.bf16.gmra.mxu0 %vm258_vm2, %v837_v28  ;;  %813 = vmatmul.msk.bf16.gmra.mxu1 %vm258_vm2, %v845_v29 }
  0x5e   :  { %821 = vmatmul.msk.bf16.gmra.mxu2 %vm258_vm2, %v853_v30  ;;  %829 = vmatmul.msk.bf16.gmra.mxu3 %vm258_vm2, %v861_v31 }
  0x6d   :  { %806 = vmatmul.msk.bf16.gmra.mxu0 %vm258_vm2, %v838_v32  ;;  %814 = vmatmul.msk.bf16.gmra.mxu1 %vm258_vm2, %v846_v33 }
  0x6e   :  { %822 = vmatmul.msk.bf16.gmra.mxu2 %vm258_vm2, %v854_v34  ;;  %830 = vmatmul.msk.bf16.gmra.mxu3 %vm258_vm2, %v862_v35 }
  0x7d   :  { %807 = vmatmul.msk.bf16.gmra.mxu0 %vm258_vm2, %v839_v36  ;;  %815 = vmatmul.msk.bf16.gmra.mxu1 %vm258_vm2, %v847_v37 }
  0x7e   :  { %823 = vmatmul.msk.bf16.gmra.mxu2 %vm258_vm2, %v855_v38  ;;  %831 = vmatmul.msk.bf16.gmra.mxu3 %vm258_vm2, %v863_v39 }
  0x8a   :  { %v371_v41 = vpop.f32.mrf.mxu0  ;;  %v411_v42 = vpop.f32.mrf.mxu1 }
  0x8b   :  { %v372_v43 = vadd.f32 %v1035_v40, %v371_v41  ;;  %v412_v44 = vadd.f32 %v1035_v40, %v411_v42 }
  0x8d   :  { %v531_v45 = vmax.f32 %v372_v43, 0.0  ;;  %v547_v46 = vmax.f32 %v412_v44, 0.0 }
  0x8f   :  { %596 = vst.msk [vmem:[%s1360_s3] sm:$0xff] %vm595_vm3, %v531_v45 }
  0x90   :  { %612 = vst.msk [vmem:[%s1360_s3 + $0x80] sm:$0xff] %vm595_vm3, %v547_v46 }
  0x91   :  { %v451_v47 = vpop.f32.mrf.mxu2  ;;  %v491_v48 = vpop.f32.mrf.mxu3 }
  0x92   :  { %v452_v49 = vadd.f32 %v1035_v40, %v451_v47  ;;  %v492_v50 = vadd.f32 %v1035_v40, %v491_v48  ;;  %v373_v51 = vpop.f32.mrf.mxu0  ;;  %v413_v52 = vpop.f32.mrf.mxu1 }
  0x93   :  { %v374_v53 = vadd.f32 %v1035_v40, %v373_v51  ;;  %v414_v54 = vadd.f32 %v1035_v40, %v413_v52 }
  0x94   :  { %v563_v55 = vmax.f32 %v452_v49, 0.0  ;;  %v579_v56 = vmax.f32 %v492_v50, 0.0 }
  0x95   :  { %v532_v57 = vmax.f32 %v374_v53, 0.0  ;;  %v548_v58 = vmax.f32 %v414_v54, 0.0 }
  0x96   :  { %628 = vst.msk [vmem:[%s1360_s3 + $0x100] sm:$0xff] %vm595_vm3, %v563_v55 }
  0x97   :  { %644 = vst.msk [vmem:[%s1360_s3 + $0x180] sm:$0xff] %vm595_vm3, %v579_v56 }
  0x98   :  { %597 = vst.msk [vmem:[%s1360_s3 + $0x8] sm:$0xff] %vm595_vm3, %v532_v57 }
  0x99   :  { %613 = vst.msk [vmem:[%s1360_s3 + $0x88] sm:$0xff] %vm595_vm3, %v548_v58  ;;  %v453_v59 = vpop.f32.mrf.mxu2  ;;  %v493_v60 = vpop.f32.mrf.mxu3 }
  0x9a   :  { %v454_v61 = vadd.f32 %v1035_v40, %v453_v59  ;;  %v494_v62 = vadd.f32 %v1035_v40, %v493_v60  ;;  %v376_v63 = vpop.f32.mrf.mxu0  ;;  %v416_v0 = vpop.f32.mrf.mxu1 }
  0x9b   :  { %v377_v1 = vadd.f32 %v1035_v40, %v376_v63  ;;  %v417_v2 = vadd.f32 %v1035_v40, %v416_v0 }
  0x9c   :  { %v564_v3 = vmax.f32 %v454_v61, 0.0  ;;  %v580_v4 = vmax.f32 %v494_v62, 0.0 }
  0x9d   :  { %v533_v5 = vmax.f32 %v377_v1, 0.0  ;;  %v549_v6 = vmax.f32 %v417_v2, 0.0 }
  0x9e   :  { %629 = vst.msk [vmem:[%s1360_s3 + $0x108] sm:$0xff] %vm595_vm3, %v564_v3 }
  0x9f   :  { %645 = vst.msk [vmem:[%s1360_s3 + $0x188] sm:$0xff] %vm595_vm3, %v580_v4 }
  0xa0   :  { %598 = vst.msk [vmem:[%s1360_s3 + $0x10] sm:$0xff] %vm595_vm3, %v533_v5 }
  0xa1   :  { %614 = vst.msk [vmem:[%s1360_s3 + $0x90] sm:$0xff] %vm595_vm3, %v549_v6  ;;  %v456_v7 = vpop.f32.mrf.mxu2  ;;  %v496_v8 = vpop.f32.mrf.mxu3 }
  0xa2   :  { %v457_v9 = vadd.f32 %v1035_v40, %v456_v7  ;;  %v497_v10 = vadd.f32 %v1035_v40, %v496_v8  ;;  %v378_v11 = vpop.f32.mrf.mxu0  ;;  %v418_v12 = vpop.f32.mrf.mxu1 }
  0xa3   :  { %v379_v13 = vadd.f32 %v1035_v40, %v378_v11  ;;  %v419_v14 = vadd.f32 %v1035_v40, %v418_v12 }
  0xa4   :  { %v565_v15 = vmax.f32 %v457_v9, 0.0  ;;  %v581_v16 = vmax.f32 %v497_v10, 0.0 }
  0xa5   :  { %v534_v17 = vmax.f32 %v379_v13, 0.0  ;;  %v550_v18 = vmax.f32 %v419_v14, 0.0 }
  0xa6   :  { %630 = vst.msk [vmem:[%s1360_s3 + $0x110] sm:$0xff] %vm595_vm3, %v565_v15 }
  0xa7   :  { %646 = vst.msk [vmem:[%s1360_s3 + $0x190] sm:$0xff] %vm595_vm3, %v581_v16 }
  0xa8   :  { %599 = vst.msk [vmem:[%s1360_s3 + $0x18] sm:$0xff] %vm595_vm3, %v534_v17 }
  0xa9   :  { %615 = vst.msk [vmem:[%s1360_s3 + $0x98] sm:$0xff] %vm595_vm3, %v550_v18  ;;  %v458_v19 = vpop.f32.mrf.mxu2  ;;  %v498_v20 = vpop.f32.mrf.mxu3 }
  0xaa   :  { %v459_v21 = vadd.f32 %v1035_v40, %v458_v19  ;;  %v499_v22 = vadd.f32 %v1035_v40, %v498_v20  ;;  %v381_v23 = vpop.f32.mrf.mxu0  ;;  %v421_v24 = vpop.f32.mrf.mxu1 }
  0xab   :  { %v382_v25 = vadd.f32 %v1035_v40, %v381_v23  ;;  %v422_v26 = vadd.f32 %v1035_v40, %v421_v24 }
  0xac   :  { %v566_v27 = vmax.f32 %v459_v21, 0.0  ;;  %v582_v28 = vmax.f32 %v499_v22, 0.0 }
  0xad   :  { %v535_v29 = vmax.f32 %v382_v25, 0.0  ;;  %v551_v30 = vmax.f32 %v422_v26, 0.0 }
  0xae   :  { %631 = vst.msk [vmem:[%s1360_s3 + $0x118] sm:$0xff] %vm595_vm3, %v566_v27 }
  0xaf   :  { %647 = vst.msk [vmem:[%s1360_s3 + $0x198] sm:$0xff] %vm595_vm3, %v582_v28 }
  0xb0   :  { %600 = vst.msk [vmem:[%s1360_s3 + $0x20] sm:$0xff] %vm595_vm3, %v535_v29 }
  0xb1   :  { %616 = vst.msk [vmem:[%s1360_s3 + $0xa0] sm:$0xff] %vm595_vm3, %v551_v30  ;;  %v461_v31 = vpop.f32.mrf.mxu2  ;;  %v501_v32 = vpop.f32.mrf.mxu3 }
  0xb2   :  { %v462_v33 = vadd.f32 %v1035_v40, %v461_v31  ;;  %v502_v34 = vadd.f32 %v1035_v40, %v501_v32  ;;  %v383_v35 = vpop.f32.mrf.mxu0  ;;  %v423_v36 = vpop.f32.mrf.mxu1 }
  0xb3   :  { %v384_v37 = vadd.f32 %v1035_v40, %v383_v35  ;;  %v424_v38 = vadd.f32 %v1035_v40, %v423_v36 }
  0xb4   :  { %v567_v39 = vmax.f32 %v462_v33, 0.0  ;;  %v583_v41 = vmax.f32 %v502_v34, 0.0 }
  0xb5   :  { %v536_v42 = vmax.f32 %v384_v37, 0.0  ;;  %v552_v43 = vmax.f32 %v424_v38, 0.0 }
  0xb6   :  { %632 = vst.msk [vmem:[%s1360_s3 + $0x120] sm:$0xff] %vm595_vm3, %v567_v39 }
  0xb7   :  { %648 = vst.msk [vmem:[%s1360_s3 + $0x1a0] sm:$0xff] %vm595_vm3, %v583_v41 }
  0xb8   :  { %601 = vst.msk [vmem:[%s1360_s3 + $0x28] sm:$0xff] %vm595_vm3, %v536_v42 }
  0xb9   :  { %617 = vst.msk [vmem:[%s1360_s3 + $0xa8] sm:$0xff] %vm595_vm3, %v552_v43  ;;  %v463_v44 = vpop.f32.mrf.mxu2  ;;  %v503_v45 = vpop.f32.mrf.mxu3 }
  0xba   :  { %v464_v46 = vadd.f32 %v1035_v40, %v463_v44  ;;  %v504_v47 = vadd.f32 %v1035_v40, %v503_v45  ;;  %v386_v48 = vpop.f32.mrf.mxu0  ;;  %v426_v49 = vpop.f32.mrf.mxu1 }
  0xbb   :  { %v387_v50 = vadd.f32 %v1035_v40, %v386_v48  ;;  %v427_v51 = vadd.f32 %v1035_v40, %v426_v49 }
  0xbc   :  { %v568_v52 = vmax.f32 %v464_v46, 0.0  ;;  %v584_v53 = vmax.f32 %v504_v47, 0.0 }
  0xbd   :  { %v537_v54 = vmax.f32 %v387_v50, 0.0  ;;  %v553_v55 = vmax.f32 %v427_v51, 0.0 }
  0xbe   :  { %633 = vst.msk [vmem:[%s1360_s3 + $0x128] sm:$0xff] %vm595_vm3, %v568_v52 }
  0xbf   :  { %649 = vst.msk [vmem:[%s1360_s3 + $0x1a8] sm:$0xff] %vm595_vm3, %v584_v53 }
  0xc0   :  { %602 = vst.msk [vmem:[%s1360_s3 + $0x30] sm:$0xff] %vm595_vm3, %v537_v54 }
  0xc1   :  { %618 = vst.msk [vmem:[%s1360_s3 + $0xb0] sm:$0xff] %vm595_vm3, %v553_v55  ;;  %v466_v56 = vpop.f32.mrf.mxu2  ;;  %v506_v57 = vpop.f32.mrf.mxu3 }
  0xc2   :  { %v467_v58 = vadd.f32 %v1035_v40, %v466_v56  ;;  %v507_v59 = vadd.f32 %v1035_v40, %v506_v57  ;;  %v388_v60 = vpop.f32.mrf.mxu0  ;;  %v428_v61 = vpop.f32.mrf.mxu1 }
  0xc3   :  { %v389_v62 = vadd.f32 %v1035_v40, %v388_v60  ;;  %v429_v63 = vadd.f32 %v1035_v40, %v428_v61 }
  0xc4   :  { %v569_v0 = vmax.f32 %v467_v58, 0.0  ;;  %v585_v1 = vmax.f32 %v507_v59, 0.0 }
  0xc5   :  { %v538_v2 = vmax.f32 %v389_v62, 0.0  ;;  %v554_v3 = vmax.f32 %v429_v63, 0.0 }
  0xc6   :  { %634 = vst.msk [vmem:[%s1360_s3 + $0x130] sm:$0xff] %vm595_vm3, %v569_v0 }
  0xc7   :  { %650 = vst.msk [vmem:[%s1360_s3 + $0x1b0] sm:$0xff] %vm595_vm3, %v585_v1 }
  0xc8   :  { %603 = vst.msk [vmem:[%s1360_s3 + $0x38] sm:$0xff] %vm595_vm3, %v538_v2 }
  0xc9   :  { %619 = vst.msk [vmem:[%s1360_s3 + $0xb8] sm:$0xff] %vm595_vm3, %v554_v3  ;;  %v468_v4 = vpop.f32.mrf.mxu2  ;;  %v508_v5 = vpop.f32.mrf.mxu3 }
  0xca   :  { %v469_v6 = vadd.f32 %v1035_v40, %v468_v4  ;;  %v509_v7 = vadd.f32 %v1035_v40, %v508_v5  ;;  %v391_v8 = vpop.f32.mrf.mxu0  ;;  %v431_v9 = vpop.f32.mrf.mxu1 }
  0xcb   :  { %v392_v10 = vadd.f32 %v1035_v40, %v391_v8  ;;  %v432_v11 = vadd.f32 %v1035_v40, %v431_v9 }
  0xcc   :  { %v570_v12 = vmax.f32 %v469_v6, 0.0  ;;  %v586_v13 = vmax.f32 %v509_v7, 0.0 }
  0xcd   :  { %v539_v14 = vmax.f32 %v392_v10, 0.0  ;;  %v555_v15 = vmax.f32 %v432_v11, 0.0 }
  0xce   :  { %635 = vst.msk [vmem:[%s1360_s3 + $0x138] sm:$0xff] %vm595_vm3, %v570_v12 }
  0xcf   :  { %651 = vst.msk [vmem:[%s1360_s3 + $0x1b8] sm:$0xff] %vm595_vm3, %v586_v13 }
  0xd0   :  { %604 = vst.msk [vmem:[%s1360_s3 + $0x40] sm:$0xff] %vm595_vm3, %v539_v14 }
  0xd1   :  { %620 = vst.msk [vmem:[%s1360_s3 + $0xc0] sm:$0xff] %vm595_vm3, %v555_v15  ;;  %v471_v16 = vpop.f32.mrf.mxu2  ;;  %v511_v17 = vpop.f32.mrf.mxu3 }
  0xd2   :  { %v472_v18 = vadd.f32 %v1035_v40, %v471_v16  ;;  %v512_v19 = vadd.f32 %v1035_v40, %v511_v17  ;;  %v393_v20 = vpop.f32.mrf.mxu0  ;;  %v433_v21 = vpop.f32.mrf.mxu1 }
  0xd3   :  { %v394_v22 = vadd.f32 %v1035_v40, %v393_v20  ;;  %v434_v23 = vadd.f32 %v1035_v40, %v433_v21 }
  0xd4   :  { %v571_v24 = vmax.f32 %v472_v18, 0.0  ;;  %v587_v25 = vmax.f32 %v512_v19, 0.0 }
  0xd5   :  { %v540_v26 = vmax.f32 %v394_v22, 0.0  ;;  %v556_v27 = vmax.f32 %v434_v23, 0.0 }
  0xd6   :  { %636 = vst.msk [vmem:[%s1360_s3 + $0x140] sm:$0xff] %vm595_vm3, %v571_v24 }
  0xd7   :  { %652 = vst.msk [vmem:[%s1360_s3 + $0x1c0] sm:$0xff] %vm595_vm3, %v587_v25 }
  0xd8   :  { %605 = vst.msk [vmem:[%s1360_s3 + $0x48] sm:$0xff] %vm595_vm3, %v540_v26 }
  0xd9   :  { %621 = vst.msk [vmem:[%s1360_s3 + $0xc8] sm:$0xff] %vm595_vm3, %v556_v27  ;;  %v473_v28 = vpop.f32.mrf.mxu2  ;;  %v513_v29 = vpop.f32.mrf.mxu3 }
  0xda   :  { %v474_v30 = vadd.f32 %v1035_v40, %v473_v28  ;;  %v514_v31 = vadd.f32 %v1035_v40, %v513_v29  ;;  %v396_v32 = vpop.f32.mrf.mxu0  ;;  %v436_v33 = vpop.f32.mrf.mxu1 }
  0xdb   :  { %v397_v34 = vadd.f32 %v1035_v40, %v396_v32  ;;  %v437_v35 = vadd.f32 %v1035_v40, %v436_v33 }
  0xdc   :  { %v572_v36 = vmax.f32 %v474_v30, 0.0  ;;  %v588_v37 = vmax.f32 %v514_v31, 0.0 }
  0xdd   :  { %v541_v38 = vmax.f32 %v397_v34, 0.0  ;;  %v557_v39 = vmax.f32 %v437_v35, 0.0 }
  0xde   :  { %637 = vst.msk [vmem:[%s1360_s3 + $0x148] sm:$0xff] %vm595_vm3, %v572_v36 }
  0xdf   :  { %653 = vst.msk [vmem:[%s1360_s3 + $0x1c8] sm:$0xff] %vm595_vm3, %v588_v37 }
  0xe0   :  { %606 = vst.msk [vmem:[%s1360_s3 + $0x50] sm:$0xff] %vm595_vm3, %v541_v38 }
  0xe1   :  { %622 = vst.msk [vmem:[%s1360_s3 + $0xd0] sm:$0xff] %vm595_vm3, %v557_v39  ;;  %v476_v41 = vpop.f32.mrf.mxu2  ;;  %v516_v42 = vpop.f32.mrf.mxu3 }
  0xe2   :  { %v477_v43 = vadd.f32 %v1035_v40, %v476_v41  ;;  %v517_v44 = vadd.f32 %v1035_v40, %v516_v42  ;;  %v398_v45 = vpop.f32.mrf.mxu0  ;;  %v438_v46 = vpop.f32.mrf.mxu1 }
  0xe3   :  { %v399_v47 = vadd.f32 %v1035_v40, %v398_v45  ;;  %v439_v48 = vadd.f32 %v1035_v40, %v438_v46 }
  0xe4   :  { %v573_v49 = vmax.f32 %v477_v43, 0.0  ;;  %v589_v50 = vmax.f32 %v517_v44, 0.0 }
  0xe5   :  { %v542_v51 = vmax.f32 %v399_v47, 0.0  ;;  %v558_v52 = vmax.f32 %v439_v48, 0.0 }
  0xe6   :  { %638 = vst.msk [vmem:[%s1360_s3 + $0x150] sm:$0xff] %vm595_vm3, %v573_v49 }
  0xe7   :  { %654 = vst.msk [vmem:[%s1360_s3 + $0x1d0] sm:$0xff] %vm595_vm3, %v589_v50 }
  0xe8   :  { %607 = vst.msk [vmem:[%s1360_s3 + $0x58] sm:$0xff] %vm595_vm3, %v542_v51 }
  0xe9   :  { %623 = vst.msk [vmem:[%s1360_s3 + $0xd8] sm:$0xff] %vm595_vm3, %v558_v52  ;;  %v478_v53 = vpop.f32.mrf.mxu2  ;;  %v518_v54 = vpop.f32.mrf.mxu3 }
  0xea   :  { %v479_v55 = vadd.f32 %v1035_v40, %v478_v53  ;;  %v519_v56 = vadd.f32 %v1035_v40, %v518_v54  ;;  %v401_v57 = vpop.f32.mrf.mxu0  ;;  %v441_v58 = vpop.f32.mrf.mxu1 }
  0xeb   :  { %v402_v59 = vadd.f32 %v1035_v40, %v401_v57  ;;  %v442_v60 = vadd.f32 %v1035_v40, %v441_v58 }
  0xec   :  { %v574_v61 = vmax.f32 %v479_v55, 0.0  ;;  %v590_v62 = vmax.f32 %v519_v56, 0.0 }
  0xed   :  { %v543_v63 = vmax.f32 %v402_v59, 0.0  ;;  %v559_v0 = vmax.f32 %v442_v60, 0.0 }
  0xee   :  { %639 = vst.msk [vmem:[%s1360_s3 + $0x158] sm:$0xff] %vm595_vm3, %v574_v61 }
  0xef   :  { %655 = vst.msk [vmem:[%s1360_s3 + $0x1d8] sm:$0xff] %vm595_vm3, %v590_v62 }
  0xf0   :  { %608 = vst.msk [vmem:[%s1360_s3 + $0x60] sm:$0xff] %vm595_vm3, %v543_v63 }
  0xf1   :  { %624 = vst.msk [vmem:[%s1360_s3 + $0xe0] sm:$0xff] %vm595_vm3, %v559_v0  ;;  %v481_v1 = vpop.f32.mrf.mxu2  ;;  %v521_v2 = vpop.f32.mrf.mxu3 }
  0xf2   :  { %v482_v3 = vadd.f32 %v1035_v40, %v481_v1  ;;  %v522_v4 = vadd.f32 %v1035_v40, %v521_v2  ;;  %v403_v5 = vpop.f32.mrf.mxu0  ;;  %v443_v6 = vpop.f32.mrf.mxu1 }
  0xf3   :  { %v404_v7 = vadd.f32 %v1035_v40, %v403_v5  ;;  %v444_v8 = vadd.f32 %v1035_v40, %v443_v6 }
  0xf4   :  { %v575_v9 = vmax.f32 %v482_v3, 0.0  ;;  %v591_v10 = vmax.f32 %v522_v4, 0.0 }
  0xf5   :  { %v544_v11 = vmax.f32 %v404_v7, 0.0  ;;  %v560_v12 = vmax.f32 %v444_v8, 0.0 }
  0xf6   :  { %640 = vst.msk [vmem:[%s1360_s3 + $0x160] sm:$0xff] %vm595_vm3, %v575_v9 }
  0xf7   :  { %656 = vst.msk [vmem:[%s1360_s3 + $0x1e0] sm:$0xff] %vm595_vm3, %v591_v10 }
  0xf8   :  { %609 = vst.msk [vmem:[%s1360_s3 + $0x68] sm:$0xff] %vm595_vm3, %v544_v11 }
  0xf9   :  { %625 = vst.msk [vmem:[%s1360_s3 + $0xe8] sm:$0xff] %vm595_vm3, %v560_v12  ;;  %v483_v13 = vpop.f32.mrf.mxu2  ;;  %v523_v14 = vpop.f32.mrf.mxu3 }
  0xfa   :  { %v484_v15 = vadd.f32 %v1035_v40, %v483_v13  ;;  %v524_v16 = vadd.f32 %v1035_v40, %v523_v14  ;;  %v406_v17 = vpop.f32.mrf.mxu0  ;;  %v446_v18 = vpop.f32.mrf.mxu1 }
  0xfb   :  { %v407_v19 = vadd.f32 %v1035_v40, %v406_v17  ;;  %v447_v20 = vadd.f32 %v1035_v40, %v446_v18 }
  0xfc   :  { %v576_v21 = vmax.f32 %v484_v15, 0.0  ;;  %v592_v22 = vmax.f32 %v524_v16, 0.0 }
  0xfd   :  { %v545_v23 = vmax.f32 %v407_v19, 0.0  ;;  %v561_v24 = vmax.f32 %v447_v20, 0.0 }
  0xfe   :  { %641 = vst.msk [vmem:[%s1360_s3 + $0x168] sm:$0xff] %vm595_vm3, %v576_v21 }
  0xff   :  { %657 = vst.msk [vmem:[%s1360_s3 + $0x1e8] sm:$0xff] %vm595_vm3, %v592_v22 }
 0x100   :  { %610 = vst.msk [vmem:[%s1360_s3 + $0x70] sm:$0xff] %vm595_vm3, %v545_v23 }
 0x101   :  { %626 = vst.msk [vmem:[%s1360_s3 + $0xf0] sm:$0xff] %vm595_vm3, %v561_v24  ;;  %v486_v25 = vpop.f32.mrf.mxu2  ;;  %v526_v26 = vpop.f32.mrf.mxu3 }
 0x102   :  { %v487_v27 = vadd.f32 %v1035_v40, %v486_v25  ;;  %v527_v28 = vadd.f32 %v1035_v40, %v526_v26  ;;  %v408_v29 = vpop.f32.mrf.mxu0  ;;  %v448_v30 = vpop.f32.mrf.mxu1 }
 0x103   :  { %v409_v31 = vadd.f32 %v1035_v40, %v408_v29  ;;  %v449_v32 = vadd.f32 %v1035_v40, %v448_v30 }
 0x104   :  { %v577_v33 = vmax.f32 %v487_v27, 0.0  ;;  %v593_v34 = vmax.f32 %v527_v28, 0.0 }
 0x105   :  { %v546_v35 = vmax.f32 %v409_v31, 0.0  ;;  %v562_v36 = vmax.f32 %v449_v32, 0.0 }
 0x106   :  { %642 = vst.msk [vmem:[%s1360_s3 + $0x170] sm:$0xff] %vm595_vm3, %v577_v33 }
 0x107   :  { %658 = vst.msk [vmem:[%s1360_s3 + $0x1f0] sm:$0xff] %vm595_vm3, %v593_v34 }
 0x108   :  { %611 = vst.msk [vmem:[%s1360_s3 + $0x78] sm:$0xff] %vm595_vm3, %v546_v35 }
 0x109   :  { %627 = vst.msk [vmem:[%s1360_s3 + $0xf8] sm:$0xff] %vm595_vm3, %v562_v36  ;;  %v488_v37 = vpop.f32.mrf.mxu2  ;;  %v528_v38 = vpop.f32.mrf.mxu3 }
 0x10a   :  { %v489_v39 = vadd.f32 %v1035_v40, %v488_v37  ;;  %v529_v41 = vadd.f32 %v1035_v40, %v528_v38 }
 0x10c   :  { %v578_v42 = vmax.f32 %v489_v39, 0.0  ;;  %v594_v43 = vmax.f32 %v529_v41, 0.0 }
 0x10e   :  { %643 = vst.msk [vmem:[%s1360_s3 + $0x178] sm:$0xff] %vm595_vm3, %v578_v42 }
 0x10f   :  { %659 = vst.msk [vmem:[%s1360_s3 + $0x1f8] sm:$0xff] %vm595_vm3, %v594_v43 }

// kernel: bbn_resnet_forward.10
= control target key start
LH: loop header
LB: loop body
LE: loop exit
PB: predicated region body
PF: predicated region fallthrough
CT: control target
= control target key end

     0   :  { %vm443_vm0 = vcmask 130048   ;;  %s2283_s1 = inlined_call_operand.vmem [shape: bf16[144,16], index: 1, kind: input, shape index: {}]   ;;  %s2284_s0 = inlined_call_operand.vmem [shape: bf16[512,144], index: 0, kind: input, shape index: {}]   ;;  %s2285_s2 = inlined_call_operand.vmem [shape: f32[1,16], index: 2, kind: input, shape index: {}]   ;;  %s2286_s3 = inlined_call_operand.vmem [shape: f32[512,16], index: 3, kind: output, shape index: {}]  }
   0x1   :  { %v1405_v0 = vld [vmem:[%s2283_s1 + $0x38] sm:$0xff]  ;;  %v1406_v1 = vld [vmem:[%s2283_s1 + $0x40] sm:$0xff]  ;;  %v1014_v3 = vld [vmem:[%s2284_s0 + $0x8] sm:$0xf0] }
   0x2   :  { %v1334_v2 = vld [vmem:[%s2284_s0 + $0x4] sm:$0xf]  ;;  %540 = vmatpush.bf16.msra.mxu0 %v1405_v0  ;;  %1407 = vmatpush.bf16.msra.mxu2 %v1405_v0  ;;  %v1404_v5 = vld [vmem:[%s2283_s1 + $0x30] sm:$0xff]  ;;  %v1403_v6 = vld [vmem:[%s2283_s1 + $0x28] sm:$0xff] }
   0x3   :  { %v1017_v4 = vor.u32 %v1334_v2, %v1014_v3  ;;  %716 = vmatpush.bf16.msra.mxu1 %v1406_v1  ;;  %1415 = vmatpush.bf16.msra.mxu3 %v1406_v1  ;;  %v1368_v7 = vld [vmem:[%s2284_s0 + $0x114] sm:$0xf]  ;;  %v1150_v8 = vld [vmem:[%s2284_s0 + $0x118] sm:$0xf0]  ;;  %v1402_v10 = vld [vmem:[%s2283_s1 + $0x20] sm:$0xff] }
   0x4   :  { %v1153_v9 = vor.u32 %v1368_v7, %v1150_v8  ;;  %v1401_v11 = vld [vmem:[%s2283_s1 + $0x18] sm:$0xff]  ;;  %v1336_v12 = vld [vmem:[%s2284_s0 + $0x14] sm:$0xf]  ;;  %v1399_v16 = vld [vmem:[%s2283_s1 + $0x8] sm:$0xff] }
   0x5   :  { %v1022_v13 = vld [vmem:[%s2284_s0 + $0x18] sm:$0xf0]  ;;  %v1400_v15 = vld [vmem:[%s2283_s1 + $0x10] sm:$0xff]  ;;  %v1370_v17 = vld [vmem:[%s2284_s0 + $0x124] sm:$0xf] }
   0x6   :  { %1302 = vmatmul.msk.bf16.vlgmr.msra.gmra.mxu1 %vm443_vm0, %v1017_v4  ;;  %541 = vmatpush.bf16.msra.mxu0 %v1404_v5  ;;  %v1025_v14 = vor.u32 %v1336_v12, %v1022_v13  ;;  %v1158_v18 = vld [vmem:[%s2284_s0 + $0x128] sm:$0xf0]  ;;  %v1398_v20 = vld [vmem:[%s2283_s1] sm:$0xff]  ;;  %v1335_v22 = vld [vmem:[%s2284_s0 + $0x4] sm:$0xf0] }
   0x7   :  { %1408 = vmatpush.bf16.msra.mxu2 %v1404_v5  ;;  %1319 = vmatmul.msk.bf16.vlgmr.msra.gmra.mxu3 %vm443_vm0, %v1153_v9  ;;  %v1161_v19 = vor.u32 %v1370_v17, %v1158_v18  ;;  %v1012_v21 = vld [vmem:[%s2284_s0] sm:$0xf]  ;;  %v1367_v24 = vld [vmem:[%s2284_s0 + $0x104] sm:$0xf0]  ;;  %v1338_v27 = vld [vmem:[%s2284_s0 + $0x24] sm:$0xf] }
   0x8   :  { %v1140_v23 = vld [vmem:[%s2284_s0 + $0x100] sm:$0xf]  ;;  %v1013_v25 = vor.u32 %v1335_v22, %v1012_v21  ;;  %v1030_v28 = vld [vmem:[%s2284_s0 + $0x28] sm:$0xf0]  ;;  %v1372_v30 = vld [vmem:[%s2284_s0 + $0x134] sm:$0xf] }
   0x9   :  { %v1141_v26 = vor.u32 %v1367_v24, %v1140_v23  ;;  %v1033_v29 = vor.u32 %v1338_v27, %v1030_v28  ;;  %v1166_v31 = vld [vmem:[%s2284_s0 + $0x138] sm:$0xf0]  ;;  %v1020_v33 = vld [vmem:[%s2284_s0 + $0x10] sm:$0xf]  ;;  %v1337_v34 = vld [vmem:[%s2284_s0 + $0x14] sm:$0xf0] }
   0xa   :  { %542 = vmatpush.bf16.msra.mxu0 %v1403_v6  ;;  %v1169_v32 = vor.u32 %v1372_v30, %v1166_v31  ;;  %v1148_v35 = vld [vmem:[%s2284_s0 + $0x110] sm:$0xf]  ;;  %v1369_v36 = vld [vmem:[%s2284_s0 + $0x114] sm:$0xf0]  ;;  %v1021_v37 = vor.u32 %v1337_v34, %v1020_v33  ;;  %v1340_v39 = vld [vmem:[%s2284_s0 + $0x34] sm:$0xf] }
   0xb   :  { %1409 = vmatpush.bf16.msra.mxu2 %v1403_v6  ;;  %v1149_v38 = vor.u32 %v1369_v36, %v1148_v35  ;;  %v1038_v40 = vld [vmem:[%s2284_s0 + $0x38] sm:$0xf0]  ;;  %v1374_v42 = vld [vmem:[%s2284_s0 + $0x144] sm:$0xf]  ;;  %v1174_v43 = vld [vmem:[%s2284_s0 + $0x148] sm:$0xf0] }
   0xc   :  { %v1041_v41 = vor.u32 %v1340_v39, %v1038_v40  ;;  %v1177_v44 = vor.u32 %v1374_v42, %v1174_v43  ;;  %v1028_v45 = vld [vmem:[%s2284_s0 + $0x20] sm:$0xf]  ;;  %v1339_v46 = vld [vmem:[%s2284_s0 + $0x24] sm:$0xf0]  ;;  %v1342_v51 = vld [vmem:[%s2284_s0 + $0x44] sm:$0xf] }
   0xd   :  { %v1156_v47 = vld [vmem:[%s2284_s0 + $0x120] sm:$0xf]  ;;  %v1371_v48 = vld [vmem:[%s2284_s0 + $0x124] sm:$0xf0]  ;;  %v1029_v49 = vor.u32 %v1339_v46, %v1028_v45  ;;  %v1046_v52 = vld [vmem:[%s2284_s0 + $0x48] sm:$0xf0] }
   0xe   :  { %543 = vmatpush.bf16.msra.mxu0 %v1402_v10  ;;  %v1157_v50 = vor.u32 %v1371_v48, %v1156_v47  ;;  %v1049_v53 = vor.u32 %v1342_v51, %v1046_v52  ;;  %v1376_v54 = vld [vmem:[%s2284_s0 + $0x154] sm:$0xf]  ;;  %v1182_v55 = vld [vmem:[%s2284_s0 + $0x158] sm:$0xf0]  ;;  %v1036_v57 = vld [vmem:[%s2284_s0 + $0x30] sm:$0xf] }
   0xf   :  { %1410 = vmatpush.bf16.msra.mxu2 %v1402_v10  ;;  %v1185_v56 = vor.u32 %v1376_v54, %v1182_v55  ;;  %v1341_v58 = vld [vmem:[%s2284_s0 + $0x34] sm:$0xf0]  ;;  %v1164_v59 = vld [vmem:[%s2284_s0 + $0x130] sm:$0xf]  ;;  %v1344_v63 = vld [vmem:[%s2284_s0 + $0x54] sm:$0xf] }
  0x10   :  { %v1373_v60 = vld [vmem:[%s2284_s0 + $0x134] sm:$0xf0]  ;;  %v1037_v61 = vor.u32 %v1341_v58, %v1036_v57  ;;  %v1054_v0 = vld [vmem:[%s2284_s0 + $0x58] sm:$0xf0]  ;;  %v1378_v2 = vld [vmem:[%s2284_s0 + $0x164] sm:$0xf] }
  0x11   :  { %v1165_v62 = vor.u32 %v1373_v60, %v1164_v59  ;;  %v1057_v1 = vor.u32 %v1344_v63, %v1054_v0  ;;  %v1190_v3 = vld [vmem:[%s2284_s0 + $0x168] sm:$0xf0]  ;;  %v1044_v5 = vld [vmem:[%s2284_s0 + $0x40] sm:$0xf]  ;;  %v1343_v6 = vld [vmem:[%s2284_s0 + $0x44] sm:$0xf0] }
  0x12   :  { %544 = vmatpush.bf16.msra.mxu0 %v1401_v11  ;;  %v1193_v4 = vor.u32 %v1378_v2, %v1190_v3  ;;  %v1172_v7 = vld [vmem:[%s2284_s0 + $0x140] sm:$0xf]  ;;  %v1375_v8 = vld [vmem:[%s2284_s0 + $0x144] sm:$0xf0]  ;;  %v1045_v9 = vor.u32 %v1343_v6, %v1044_v5  ;;  %v1062_v12 = vld [vmem:[%s2284_s0 + $0x68] sm:$0xf0] }
  0x13   :  { %1411 = vmatpush.bf16.msra.mxu2 %v1401_v11  ;;  %v1173_v10 = vor.u32 %v1375_v8, %v1172_v7  ;;  %v1346_v11 = vld [vmem:[%s2284_s0 + $0x64] sm:$0xf]  ;;  %v1345_v17 = vld [vmem:[%s2284_s0 + $0x54] sm:$0xf0]  ;;  %v1348_v23 = vld [vmem:[%s2284_s0 + $0x74] sm:$0xf] }
  0x14   :  { %v1065_v13 = vor.u32 %v1346_v11, %v1062_v12  ;;  %v1070_v24 = vld [vmem:[%s2284_s0 + $0x78] sm:$0xf0]  ;;  %v1206_v27 = vld [vmem:[%s2284_s0 + $0x188] sm:$0xf0]  ;;  %v1060_v28 = vld [vmem:[%s2284_s0 + $0x60] sm:$0xf] }
  0x15   :  { %v1188_v31 = vld [vmem:[%s2284_s0 + $0x160] sm:$0xf]  ;;  %v1350_v35 = vld [vmem:[%s2284_s0 + $0x84] sm:$0xf]  ;;  %v1078_v36 = vld [vmem:[%s2284_s0 + $0x88] sm:$0xf0] }
  0x16   :  { %1303 = vmatmul.msk.bf16.gmra.mxu1 %vm443_vm0, %v1025_v14  ;;  %545 = vmatpush.bf16.msra.mxu0 %v1400_v15  ;;  %v1380_v14 = vld [vmem:[%s2284_s0 + $0x174] sm:$0xf]  ;;  %v1214_v40 = vld [vmem:[%s2284_s0 + $0x198] sm:$0xf0]  ;;  %v1349_v42 = vld [vmem:[%s2284_s0 + $0x74] sm:$0xf0] }
  0x17   :  { %1412 = vmatpush.bf16.msra.mxu2 %v1400_v15  ;;  %1320 = vmatmul.msk.bf16.gmra.mxu3 %vm443_vm0, %v1161_v19  ;;  %v1198_v15 = vld [vmem:[%s2284_s0 + $0x178] sm:$0xf0]  ;;  %v1180_v19 = vld [vmem:[%s2284_s0 + $0x150] sm:$0xf]  ;;  %v1384_v39 = vld [vmem:[%s2284_s0 + $0x194] sm:$0xf] }
  0x18   :  { %v1201_v18 = vor.u32 %v1380_v14, %v1198_v15  ;;  %v1217_v43 = vor.u32 %v1384_v39, %v1214_v40  ;;  %v1196_v45 = vld [vmem:[%s2284_s0 + $0x170] sm:$0xf]  ;;  %v1381_v46 = vld [vmem:[%s2284_s0 + $0x174] sm:$0xf0]  ;;  %v1386_v55 = vld [vmem:[%s2284_s0 + $0x1a4] sm:$0xf] }
  0x19   :  { %v1197_v48 = vor.u32 %v1381_v46, %v1196_v45  ;;  %v1076_v57 = vld [vmem:[%s2284_s0 + $0x80] sm:$0xf]  ;;  %v1351_v58 = vld [vmem:[%s2284_s0 + $0x84] sm:$0xf0]  ;;  %v1094_v5 = vld [vmem:[%s2284_s0 + $0xa8] sm:$0xf0] }
  0x1a   :  { %546 = vmatpush.bf16.msra.mxu0 %v1399_v16  ;;  %v1383_v63 = vld [vmem:[%s2284_s0 + $0x184] sm:$0xf0]  ;;  %v1077_v0 = vor.u32 %v1351_v58, %v1076_v57  ;;  %v1238_v45 = vld [vmem:[%s2284_s0 + $0x1c8] sm:$0xf0] }
  0x1b   :  { %1413 = vmatpush.bf16.msra.mxu2 %v1399_v16  ;;  %v1052_v16 = vld [vmem:[%s2284_s0 + $0x50] sm:$0xf] }
  0x1c   :  { %v1053_v21 = vor.u32 %v1345_v17, %v1052_v16  ;;  %v1388_v16 = vld [vmem:[%s2284_s0 + $0x1b4] sm:$0xf]  ;;  %v1230_v17 = vld [vmem:[%s2284_s0 + $0x1b8] sm:$0xf0] }
  0x1e   :  { %547 = vmatpush.bf16.msra.mxu0 %v1398_v20 }
  0x1f   :  { %1414 = vmatpush.bf16.msra.mxu2 %v1398_v20  ;;  %v1377_v20 = vld [vmem:[%s2284_s0 + $0x154] sm:$0xf0] }
  0x20   :  { %v1181_v22 = vor.u32 %v1377_v20, %v1180_v19  ;;  %v1353_v19 = vld [vmem:[%s2284_s0 + $0x94] sm:$0xf0]  ;;  %v1233_v20 = vor.u32 %v1388_v16, %v1230_v17  ;;  %v1392_v16 = vld [vmem:[%s2284_s0 + $0x1d4] sm:$0xf]  ;;  %v1246_v17 = vld [vmem:[%s2284_s0 + $0x1d8] sm:$0xf0] }
  0x21   :  { %548 = vmatmul.bf16.vlgmr.msra.gmra.mxu0 %v1013_v25  ;;  %v1073_v25 = vor.u32 %v1348_v23, %v1070_v24  ;;  %v1212_v23 = vld [vmem:[%s2284_s0 + $0x190] sm:$0xf]  ;;  %v1385_v24 = vld [vmem:[%s2284_s0 + $0x194] sm:$0xf0] }
  0x22   :  { %628 = vmatmul.bf16.vlgmr.msra.gmra.mxu2 %v1141_v26  ;;  %v1382_v26 = vld [vmem:[%s2284_s0 + $0x184] sm:$0xf] }
  0x23   :  { %v1209_v30 = vor.u32 %v1382_v26, %v1206_v27 }
  0x26   :  { %1304 = vmatmul.msk.bf16.gmra.mxu1 %vm443_vm0, %v1033_v29  ;;  %v1347_v29 = vld [vmem:[%s2284_s0 + $0x64] sm:$0xf0] }
  0x27   :  { %1321 = vmatmul.msk.bf16.gmra.mxu3 %vm443_vm0, %v1169_v32  ;;  %v1379_v32 = vld [vmem:[%s2284_s0 + $0x164] sm:$0xf0]  ;;  %v1061_v33 = vor.u32 %v1347_v29, %v1060_v28  ;;  %v1213_v28 = vor.u32 %v1385_v24, %v1212_v23  ;;  %v1228_v23 = vld [vmem:[%s2284_s0 + $0x1b0] sm:$0xf]  ;;  %v1389_v24 = vld [vmem:[%s2284_s0 + $0x1b4] sm:$0xf0] }
  0x28   :  { %v1189_v34 = vor.u32 %v1379_v32, %v1188_v31  ;;  %v1102_v31 = vld [vmem:[%s2284_s0 + $0xb8] sm:$0xf0] }
  0x31   :  { %553 = vmatmul.bf16.gmra.mxu0 %v1021_v37  ;;  %v1081_v37 = vor.u32 %v1350_v35, %v1078_v36 }
  0x32   :  { %633 = vmatmul.bf16.gmra.mxu2 %v1149_v38 }
  0x36   :  { %1305 = vmatmul.msk.bf16.gmra.mxu1 %vm443_vm0, %v1041_v41  ;;  %v1068_v41 = vld [vmem:[%s2284_s0 + $0x70] sm:$0xf] }
  0x37   :  { %1322 = vmatmul.msk.bf16.gmra.mxu3 %vm443_vm0, %v1177_v44  ;;  %v1069_v47 = vor.u32 %v1349_v42, %v1068_v41 }
  0x41   :  { %558 = vmatmul.bf16.gmra.mxu0 %v1029_v49  ;;  %v1352_v49 = vld [vmem:[%s2284_s0 + $0x94] sm:$0xf] }
  0x42   :  { %638 = vmatmul.bf16.gmra.mxu2 %v1157_v50  ;;  %v1086_v50 = vld [vmem:[%s2284_s0 + $0x98] sm:$0xf0] }
  0x43   :  { %v1089_v52 = vor.u32 %v1352_v49, %v1086_v50 }
  0x46   :  { %1306 = vmatmul.msk.bf16.gmra.mxu1 %vm443_vm0, %v1049_v53 }
  0x47   :  { %1323 = vmatmul.msk.bf16.gmra.mxu3 %vm443_vm0, %v1185_v56  ;;  %v1222_v56 = vld [vmem:[%s2284_s0 + $0x1a8] sm:$0xf0] }
  0x48   :  { %v1225_v59 = vor.u32 %v1386_v55, %v1222_v56 }
  0x51   :  { %563 = vmatmul.bf16.gmra.mxu0 %v1037_v61  ;;  %v1712_v61 = vld [vmem:[%s2285_s2] ss:$0 sm:$0xff] }
  0x52   :  { %643 = vmatmul.bf16.gmra.mxu2 %v1165_v62  ;;  %v1204_v62 = vld [vmem:[%s2284_s0 + $0x180] sm:$0xf] }
  0x53   :  { %v1205_v2 = vor.u32 %v1383_v63, %v1204_v62  ;;  %v1358_v62 = vld [vmem:[%s2284_s0 + $0xc4] sm:$0xf]  ;;  %v1110_v63 = vld [vmem:[%s2284_s0 + $0xc8] sm:$0xf0] }
  0x56   :  { %1307 = vmatmul.msk.bf16.gmra.mxu1 %vm443_vm0, %v1057_v1 }
  0x57   :  { %1324 = vmatmul.msk.bf16.gmra.mxu3 %vm443_vm0, %v1193_v4  ;;  %v1354_v4 = vld [vmem:[%s2284_s0 + $0xa4] sm:$0xf] }
  0x58   :  { %v1097_v8 = vor.u32 %v1354_v4, %v1094_v5  ;;  %v1113_v4 = vor.u32 %v1358_v62, %v1110_v63 }
  0x61   :  { %568 = vmatmul.bf16.gmra.mxu0 %v1045_v9 }
  0x62   :  { %648 = vmatmul.bf16.gmra.mxu2 %v1173_v10 }
  0x66   :  { %1308 = vmatmul.msk.bf16.gmra.mxu1 %vm443_vm0, %v1065_v13 }
  0x67   :  { %1325 = vmatmul.msk.bf16.gmra.mxu3 %vm443_vm0, %v1201_v18  ;;  %v1084_v18 = vld [vmem:[%s2284_s0 + $0x90] sm:$0xf] }
  0x68   :  { %v1085_v26 = vor.u32 %v1353_v19, %v1084_v18  ;;  %v1100_v19 = vld [vmem:[%s2284_s0 + $0xb0] sm:$0xf] }
  0x71   :  { %573 = vmatmul.bf16.gmra.mxu0 %v1053_v21 }
  0x72   :  { %653 = vmatmul.bf16.gmra.mxu2 %v1181_v22 }
  0x76   :  { %1309 = vmatmul.msk.bf16.gmra.mxu1 %vm443_vm0, %v1073_v25 }
  0x77   :  { %1326 = vmatmul.msk.bf16.gmra.mxu3 %vm443_vm0, %v1209_v30  ;;  %v1356_v30 = vld [vmem:[%s2284_s0 + $0xb4] sm:$0xf] }
  0x81   :  { %578 = vmatmul.bf16.gmra.mxu0 %v1061_v33 }
  0x82   :  { %658 = vmatmul.bf16.gmra.mxu2 %v1189_v34  ;;  %v1105_v34 = vor.u32 %v1356_v30, %v1102_v31  ;;  %v1229_v30 = vor.u32 %v1389_v24, %v1228_v23  ;;  %v1116_v23 = vld [vmem:[%s2284_s0 + $0xd0] sm:$0xf]  ;;  %v1361_v24 = vld [vmem:[%s2284_s0 + $0xd4] sm:$0xf0] }
  0x83   :  { %v718_v38 = vpop.f32.mrf.mxu1 }
  0x86   :  { %1310 = vmatmul.msk.bf16.gmra.mxu1 %vm443_vm0, %v1081_v37 }
  0x87   :  { %1327 = vmatmul.msk.bf16.gmra.mxu3 %vm443_vm0, %v1217_v43 }
  0x8a   :  { %v1692_v51 = vpop.f32.mrf.mxu3 }
  0x8b   :  { %v720_v44 = vpop.f32.mrf.mxu1 }
  0x91   :  { %583 = vmatmul.bf16.gmra.mxu0 %v1069_v47  ;;  %v1092_v47 = vld [vmem:[%s2284_s0 + $0xa0] sm:$0xf] }
  0x92   :  { %663 = vmatmul.bf16.gmra.mxu2 %v1197_v48  ;;  %v1695_v54 = vpop.f32.mrf.mxu3  ;;  %v1355_v48 = vld [vmem:[%s2284_s0 + $0xa4] sm:$0xf0] }
  0x93   :  { %v723_v53 = vpop.f32.mrf.mxu1  ;;  %v1093_v56 = vor.u32 %v1355_v48, %v1092_v47 }
  0x96   :  { %1311 = vmatmul.msk.bf16.gmra.mxu1 %vm443_vm0, %v1089_v52  ;;  %v1220_v52 = vld [vmem:[%s2284_s0 + $0x1a0] sm:$0xf] }
  0x97   :  { %1328 = vmatmul.msk.bf16.gmra.mxu3 %vm443_vm0, %v1225_v59 }
  0x9a   :  { %v1728_v6 = vpop.f32.mrf.mxu3 }
  0x9b   :  { %v725_v60 = vpop.f32.mrf.mxu1 }
  0x9e   :  { %v549_v1 = vpop.f32.mrf.mxu0 }
  0x9f   :  { %v550_v3 = vadd.f32 %v1712_v61, %v549_v1 }
  0xa1   :  { %v719_v7 = vadd.f32 %v718_v38, %v550_v3  ;;  %588 = vmatmul.bf16.gmra.mxu0 %v1077_v0 }
  0xa2   :  { %668 = vmatmul.bf16.gmra.mxu2 %v1205_v2  ;;  %v1740_v14 = vpop.f32.mrf.mxu3 }
  0xa3   :  { %v878_v9 = vmax.f32 %v719_v7, 0.0  ;;  %v1730_v10 = vpop.f32.mrf.mxu1 }
  0xa5   :  { %942 = vst.msk [vmem:[%s2286_s3] sm:$0xff] %vm443_vm0, %v878_v9  ;;  %v1736_v11 = vpop.f32.mrf.mxu2 }
  0xa6   :  { %1312 = vmatmul.msk.bf16.gmra.mxu1 %vm443_vm0, %v1097_v8  ;;  %v551_v12 = vpop.f32.mrf.mxu0 }
  0xa7   :  { %v552_v13 = vadd.f32 %v1712_v61, %v551_v12  ;;  %1329 = vmatmul.msk.bf16.gmra.mxu3 %vm443_vm0, %v1233_v20  ;;  %v1357_v20 = vld [vmem:[%s2284_s0 + $0xb4] sm:$0xf0] }
  0xa9   :  { %v721_v15 = vadd.f32 %v720_v44, %v552_v13  ;;  %v1390_v44 = vld [vmem:[%s2284_s0 + $0x1c4] sm:$0xf] }
  0xaa   :  { %v1776_v32 = vpop.f32.mrf.mxu3  ;;  %v1241_v49 = vor.u32 %v1390_v44, %v1238_v45 }
  0xab   :  { %v879_v21 = vmax.f32 %v721_v15, 0.0  ;;  %v1754_v22 = vpop.f32.mrf.mxu1 }
  0xad   :  { %943 = vst.msk [vmem:[%s2286_s3 + $0x8] sm:$0xff] %vm443_vm0, %v879_v21  ;;  %v1767_v25 = vpop.f32.mrf.mxu2 }
  0xae   :  { %v554_v27 = vpop.f32.mrf.mxu0 }
  0xaf   :  { %v555_v29 = vadd.f32 %v1712_v61, %v554_v27  ;;  %v1101_v27 = vor.u32 %v1357_v20, %v1100_v19  ;;  %v1396_v20 = vld [vmem:[%s2284_s0 + $0x1f4] sm:$0xf] }
  0xb1   :  { %v724_v33 = vadd.f32 %v723_v53, %v555_v29  ;;  %593 = vmatmul.bf16.gmra.mxu0 %v1085_v26  ;;  %v1387_v53 = vld [vmem:[%s2284_s0 + $0x1a4] sm:$0xf0] }
  0xb2   :  { %673 = vmatmul.bf16.gmra.mxu2 %v1213_v28  ;;  %v1787_v41 = vpop.f32.mrf.mxu3  ;;  %v1221_v59 = vor.u32 %v1387_v53, %v1220_v52  ;;  %v1108_v53 = vld [vmem:[%s2284_s0 + $0xc0] sm:$0xf] }
  0xb3   :  { %v880_v35 = vmax.f32 %v724_v33, 0.0  ;;  %v1778_v36 = vpop.f32.mrf.mxu1  ;;  %v1360_v33 = vld [vmem:[%s2284_s0 + $0xd4] sm:$0xf] }
  0xb5   :  { %944 = vst.msk [vmem:[%s2286_s3 + $0x10] sm:$0xff] %vm443_vm0, %v880_v35  ;;  %v634_v37 = vpop.f32.mrf.mxu2 }
  0xb6   :  { %v635_v38 = vadd.f32 %v1712_v61, %v634_v37  ;;  %1313 = vmatmul.msk.bf16.gmra.mxu1 %vm443_vm0, %v1105_v34  ;;  %v556_v39 = vpop.f32.mrf.mxu0  ;;  %v1118_v34 = vld [vmem:[%s2284_s0 + $0xd8] sm:$0xf0] }
  0xb7   :  { %v557_v40 = vadd.f32 %v1712_v61, %v556_v39  ;;  %1330 = vmatmul.msk.bf16.gmra.mxu3 %vm443_vm0, %v1241_v49  ;;  %v1394_v49 = vld [vmem:[%s2284_s0 + $0x1e4] sm:$0xf] }
  0xb8   :  { %v804_v42 = vadd.f32 %v1692_v51, %v635_v38 }
  0xb9   :  { %v726_v43 = vadd.f32 %v725_v60, %v557_v40  ;;  %v1121_v40 = vor.u32 %v1360_v33, %v1118_v34 }
  0xba   :  { %v912_v46 = vmax.f32 %v804_v42, 0.0  ;;  %v1827_v0 = vpop.f32.mrf.mxu3 }
  0xbb   :  { %v881_v50 = vmax.f32 %v726_v43, 0.0  ;;  %v1802_v51 = vpop.f32.mrf.mxu1 }
  0xbc   :  { %976 = vst.msk [vmem:[%s2286_s3 + $0x110] sm:$0xff] %vm443_vm0, %v912_v46 }
  0xbd   :  { %945 = vst.msk [vmem:[%s2286_s3 + $0x18] sm:$0xff] %vm443_vm0, %v881_v50  ;;  %v636_v55 = vpop.f32.mrf.mxu2  ;;  %v1254_v50 = vld [vmem:[%s2284_s0 + $0x1e8] sm:$0xf0] }
  0xbe   :  { %v637_v57 = vadd.f32 %v1712_v61, %v636_v55  ;;  %v559_v58 = vpop.f32.mrf.mxu0  ;;  %v1359_v55 = vld [vmem:[%s2284_s0 + $0xc4] sm:$0xf0] }
  0xbf   :  { %v560_v60 = vadd.f32 %v1712_v61, %v559_v58  ;;  %v1391_v58 = vld [vmem:[%s2284_s0 + $0x1c4] sm:$0xf0] }
  0xc0   :  { %v806_v1 = vadd.f32 %v1695_v54, %v637_v57  ;;  %v1236_v57 = vld [vmem:[%s2284_s0 + $0x1c0] sm:$0xf] }
  0xc1   :  { %v729_v2 = vadd.f32 %v1730_v10, %v560_v60  ;;  %598 = vmatmul.bf16.gmra.mxu0 %v1093_v56  ;;  %v1109_v60 = vor.u32 %v1359_v55, %v1108_v53 }
  0xc2   :  { %v913_v3 = vmax.f32 %v806_v1, 0.0  ;;  %678 = vmatmul.bf16.gmra.mxu2 %v1221_v59  ;;  %v1844_v12 = vpop.f32.mrf.mxu3  ;;  %v1237_v1 = vor.u32 %v1391_v58, %v1236_v57 }
  0xc3   :  { %v882_v5 = vmax.f32 %v729_v2, 0.0  ;;  %v1831_v7 = vpop.f32.mrf.mxu1 }
  0xc4   :  { %977 = vst.msk [vmem:[%s2286_s3 + $0x118] sm:$0xff] %vm443_vm0, %v913_v3  ;;  %v1362_v3 = vld [vmem:[%s2284_s0 + $0xe4] sm:$0xf] }
  0xc5   :  { %946 = vst.msk [vmem:[%s2286_s3 + $0x20] sm:$0xff] %vm443_vm0, %v882_v5  ;;  %v639_v54 = vpop.f32.mrf.mxu2 }
  0xc6   :  { %v640_v8 = vadd.f32 %v1712_v61, %v639_v54  ;;  %1314 = vmatmul.msk.bf16.gmra.mxu1 %vm443_vm0, %v1113_v4  ;;  %v561_v9 = vpop.f32.mrf.mxu0  ;;  %v1126_v4 = vld [vmem:[%s2284_s0 + $0xe8] sm:$0xf0] }
  0xc7   :  { %v562_v10 = vadd.f32 %v1712_v61, %v561_v9 }
  0xc8   :  { %v809_v13 = vadd.f32 %v1728_v6, %v640_v8  ;;  %v1249_v6 = vor.u32 %v1392_v16, %v1246_v17 }
  0xc9   :  { %v731_v15 = vadd.f32 %v1754_v22, %v562_v10  ;;  %v1129_v10 = vor.u32 %v1362_v3, %v1126_v4  ;;  %v1366_v3 = vld [vmem:[%s2284_s0 + $0x104] sm:$0xf]  ;;  %v1142_v4 = vld [vmem:[%s2284_s0 + $0x108] sm:$0xf0] }
  0xca   :  { %v914_v18 = vmax.f32 %v809_v13, 0.0  ;;  %1331 = vmatmul.msk.bf16.gmra.mxu3 %vm443_vm0, %v1249_v6  ;;  %v1885_v35 = vpop.f32.mrf.mxu3  ;;  %v1262_v6 = vld [vmem:[%s2284_s0 + $0x1f8] sm:$0xf0] }
  0xcb   :  { %v883_v21 = vmax.f32 %v731_v15, 0.0  ;;  %v1860_v22 = vpop.f32.mrf.mxu1 }
  0xcc   :  { %978 = vst.msk [vmem:[%s2286_s3 + $0x120] sm:$0xff] %vm443_vm0, %v914_v18 }
  0xcd   :  { %947 = vst.msk [vmem:[%s2286_s3 + $0x28] sm:$0xff] %vm443_vm0, %v883_v21  ;;  %v641_v26 = vpop.f32.mrf.mxu2 }
  0xce   :  { %v642_v28 = vadd.f32 %v1712_v61, %v641_v26  ;;  %v564_v29 = vpop.f32.mrf.mxu0 }
  0xcf   :  { %v565_v31 = vadd.f32 %v1712_v61, %v564_v29 }
  0xd0   :  { %v811_v37 = vadd.f32 %v1740_v14, %v642_v28  ;;  %v1393_v28 = vld [vmem:[%s2284_s0 + $0x1d4] sm:$0xf0] }
  0xd1   :  { %v734_v38 = vadd.f32 %v1778_v36, %v565_v31  ;;  %603 = vmatmul.bf16.gmra.mxu0 %v1101_v27  ;;  %v1244_v27 = vld [vmem:[%s2284_s0 + $0x1d0] sm:$0xf]  ;;  %v1117_v31 = vor.u32 %v1361_v24, %v1116_v23  ;;  %v1365_v23 = vld [vmem:[%s2284_s0 + $0xf4] sm:$0xf0] }
  0xd2   :  { %v915_v39 = vmax.f32 %v811_v37, 0.0  ;;  %683 = vmatmul.bf16.gmra.mxu2 %v1229_v30  ;;  %v1902_v46 = vpop.f32.mrf.mxu3  ;;  %v1245_v37 = vor.u32 %v1393_v28, %v1244_v27 }
  0xd3   :  { %v884_v42 = vmax.f32 %v734_v38, 0.0  ;;  %v1889_v43 = vpop.f32.mrf.mxu1 }
  0xd4   :  { %979 = vst.msk [vmem:[%s2286_s3 + $0x128] sm:$0xff] %vm443_vm0, %v915_v39  ;;  %v1364_v39 = vld [vmem:[%s2284_s0 + $0xf4] sm:$0xf] }
  0xd5   :  { %948 = vst.msk [vmem:[%s2286_s3 + $0x30] sm:$0xff] %vm443_vm0, %v884_v42  ;;  %v644_v14 = vpop.f32.mrf.mxu2 }
  0xd6   :  { %v645_v36 = vadd.f32 %v1712_v61, %v644_v14  ;;  %1315 = vmatmul.msk.bf16.gmra.mxu1 %vm443_vm0, %v1121_v40  ;;  %v566_v44 = vpop.f32.mrf.mxu0  ;;  %v1134_v40 = vld [vmem:[%s2284_s0 + $0xf8] sm:$0xf0] }
  0xd7   :  { %v567_v45 = vadd.f32 %v1712_v61, %v566_v44  ;;  %v1137_v44 = vor.u32 %v1364_v39, %v1134_v40 }
  0xd8   :  { %v814_v47 = vadd.f32 %v1776_v32, %v645_v36  ;;  %v1257_v32 = vor.u32 %v1394_v49, %v1254_v50 }
  0xd9   :  { %v736_v48 = vadd.f32 %v1802_v51, %v567_v45 }
  0xda   :  { %v916_v52 = vmax.f32 %v814_v47, 0.0  ;;  %1332 = vmatmul.msk.bf16.gmra.mxu3 %vm443_vm0, %v1257_v32  ;;  %v1945_v8 = vpop.f32.mrf.mxu3  ;;  %v1124_v32 = vld [vmem:[%s2284_s0 + $0xe0] sm:$0xf] }
  0xdb   :  { %v885_v56 = vmax.f32 %v736_v48, 0.0  ;;  %v1918_v51 = vpop.f32.mrf.mxu1 }
  0xdc   :  { %980 = vst.msk [vmem:[%s2286_s3 + $0x130] sm:$0xff] %vm443_vm0, %v916_v52 }
  0xdd   :  { %949 = vst.msk [vmem:[%s2286_s3 + $0x38] sm:$0xff] %vm443_vm0, %v885_v56  ;;  %v646_v59 = vpop.f32.mrf.mxu2  ;;  %v1363_v56 = vld [vmem:[%s2284_s0 + $0xe4] sm:$0xf0] }
  0xde   :  { %v647_v62 = vadd.f32 %v1712_v61, %v646_v59  ;;  %v569_v63 = vpop.f32.mrf.mxu0  ;;  %v1252_v59 = vld [vmem:[%s2284_s0 + $0x1e0] sm:$0xf] }
  0xdf   :  { %v570_v2 = vadd.f32 %v1712_v61, %v569_v63 }
  0xe0   :  { %v816_v5 = vadd.f32 %v1787_v41, %v647_v62 }
  0xe1   :  { %v739_v54 = vadd.f32 %v1831_v7, %v570_v2  ;;  %608 = vmatmul.bf16.gmra.mxu0 %v1109_v60  ;;  %v1125_v60 = vor.u32 %v1363_v56, %v1124_v32 }
  0xe2   :  { %v917_v9 = vmax.f32 %v816_v5, 0.0  ;;  %688 = vmatmul.bf16.gmra.mxu2 %v1237_v1  ;;  %v1982_v29 = vpop.f32.mrf.mxu3 }
  0xe3   :  { %v886_v13 = vmax.f32 %v739_v54, 0.0  ;;  %v1947_v15 = vpop.f32.mrf.mxu1 }
  0xe4   :  { %981 = vst.msk [vmem:[%s2286_s3 + $0x138] sm:$0xff] %vm443_vm0, %v917_v9 }
  0xe5   :  { %950 = vst.msk [vmem:[%s2286_s3 + $0x40] sm:$0xff] %vm443_vm0, %v886_v13  ;;  %v649_v41 = vpop.f32.mrf.mxu2  ;;  %v1145_v13 = vor.u32 %v1366_v3, %v1142_v4 }
  0xe6   :  { %v650_v7 = vadd.f32 %v1712_v61, %v649_v41  ;;  %1316 = vmatmul.msk.bf16.gmra.mxu1 %vm443_vm0, %v1129_v10  ;;  %v571_v16 = vpop.f32.mrf.mxu0 }
  0xe7   :  { %v572_v17 = vadd.f32 %v1712_v61, %v571_v16 }
  0xe8   :  { %v819_v18 = vadd.f32 %v1827_v0, %v650_v7  ;;  %v1265_v0 = vor.u32 %v1396_v20, %v1262_v6 }
  0xe9   :  { %v741_v19 = vadd.f32 %v1860_v22, %v572_v17 }
  0xea   :  { %v918_v21 = vmax.f32 %v819_v18, 0.0  ;;  %1333 = vmatmul.msk.bf16.gmra.mxu3 %vm443_vm0, %v1265_v0  ;;  %v2013_v48 = vpop.f32.mrf.mxu3 }
  0xeb   :  { %v887_v26 = vmax.f32 %v741_v19, 0.0  ;;  %v1974_v22 = vpop.f32.mrf.mxu1 }
  0xec   :  { %982 = vst.msk [vmem:[%s2286_s3 + $0x140] sm:$0xff] %vm443_vm0, %v918_v21  ;;  %v1132_v21 = vld [vmem:[%s2284_s0 + $0xf0] sm:$0xf] }
  0xed   :  { %951 = vst.msk [vmem:[%s2286_s3 + $0x48] sm:$0xff] %vm443_vm0, %v887_v26  ;;  %v651_v30 = vpop.f32.mrf.mxu2  ;;  %v1260_v26 = vld [vmem:[%s2284_s0 + $0x1f0] sm:$0xf]  ;;  %v1133_v27 = vor.u32 %v1365_v23, %v1132_v21 }
  0xee   :  { %v652_v33 = vadd.f32 %v1712_v61, %v651_v30  ;;  %v574_v34 = vpop.f32.mrf.mxu0 }
  0xef   :  { %v575_v38 = vadd.f32 %v1712_v61, %v574_v34 }
  0xf0   :  { %v821_v42 = vadd.f32 %v1844_v12, %v652_v33 }
  0xf1   :  { %v744_v14 = vadd.f32 %v1889_v43, %v575_v38  ;;  %613 = vmatmul.bf16.gmra.mxu0 %v1117_v31 }
  0xf2   :  { %v919_v36 = vmax.f32 %v821_v42, 0.0  ;;  %693 = vmatmul.bf16.gmra.mxu2 %v1245_v37  ;;  %v835_v5 = vpop.f32.mrf.mxu3 }
  0xf3   :  { %v888_v45 = vmax.f32 %v744_v14, 0.0  ;;  %v2003_v47 = vpop.f32.mrf.mxu1 }
  0xf4   :  { %983 = vst.msk [vmem:[%s2286_s3 + $0x148] sm:$0xff] %vm443_vm0, %v919_v36 }
  0xf5   :  { %952 = vst.msk [vmem:[%s2286_s3 + $0x50] sm:$0xff] %vm443_vm0, %v888_v45  ;;  %v654_v12 = vpop.f32.mrf.mxu2 }
  0xf6   :  { %v655_v43 = vadd.f32 %v1712_v61, %v654_v12  ;;  %1317 = vmatmul.msk.bf16.gmra.mxu1 %vm443_vm0, %v1137_v44  ;;  %v576_v49 = vpop.f32.mrf.mxu0 }
  0xf7   :  { %v577_v50 = vadd.f32 %v1712_v61, %v576_v49 }
  0xf8   :  { %v824_v52 = vadd.f32 %v1885_v35, %v655_v43  ;;  %v1395_v35 = vld [vmem:[%s2284_s0 + $0x1e4] sm:$0xf0] }
  0xf9   :  { %v746_v53 = vadd.f32 %v1918_v51, %v577_v50  ;;  %v1253_v1 = vor.u32 %v1395_v35, %v1252_v59 }
  0xfa   :  { %v920_v55 = vmax.f32 %v824_v52, 0.0  ;;  %v838_v20 = vpop.f32.mrf.mxu3 }
  0xfb   :  { %v889_v57 = vmax.f32 %v746_v53, 0.0  ;;  %v755_v58 = vpop.f32.mrf.mxu1 }
  0xfc   :  { %984 = vst.msk [vmem:[%s2286_s3 + $0x150] sm:$0xff] %vm443_vm0, %v920_v55 }
  0xfd   :  { %953 = vst.msk [vmem:[%s2286_s3 + $0x58] sm:$0xff] %vm443_vm0, %v889_v57  ;;  %v656_v51 = vpop.f32.mrf.mxu2 }
  0xfe   :  { %v657_v62 = vadd.f32 %v1712_v61, %v656_v51  ;;  %v579_v63 = vpop.f32.mrf.mxu0 }
  0xff   :  { %v580_v2 = vadd.f32 %v1712_v61, %v579_v63 }
 0x100   :  { %v826_v54 = vadd.f32 %v1902_v46, %v657_v62 }
 0x101   :  { %v749_v9 = vadd.f32 %v1947_v15, %v580_v2  ;;  %618 = vmatmul.bf16.gmra.mxu0 %v1125_v60 }
 0x102   :  { %v921_v10 = vmax.f32 %v826_v54, 0.0  ;;  %698 = vmatmul.bf16.gmra.mxu2 %v1253_v1  ;;  %v840_v42 = vpop.f32.mrf.mxu3 }
 0x103   :  { %v890_v41 = vmax.f32 %v749_v9, 0.0  ;;  %v758_v7 = vpop.f32.mrf.mxu1 }
 0x104   :  { %985 = vst.msk [vmem:[%s2286_s3 + $0x158] sm:$0xff] %vm443_vm0, %v921_v10 }
 0x105   :  { %954 = vst.msk [vmem:[%s2286_s3 + $0x60] sm:$0xff] %vm443_vm0, %v890_v41  ;;  %v659_v16 = vpop.f32.mrf.mxu2 }
 0x106   :  { %v660_v46 = vadd.f32 %v1712_v61, %v659_v16  ;;  %1318 = vmatmul.msk.bf16.gmra.mxu1 %vm443_vm0, %v1145_v13  ;;  %v581_v15 = vpop.f32.mrf.mxu0 }
 0x107   :  { %v582_v17 = vadd.f32 %v1712_v61, %v581_v15 }
 0x108   :  { %v829_v18 = vadd.f32 %v1945_v8, %v660_v46  ;;  %v1397_v8 = vld [vmem:[%s2284_s0 + $0x1f4] sm:$0xf0] }
 0x109   :  { %v751_v19 = vadd.f32 %v1974_v22, %v582_v17  ;;  %v1261_v31 = vor.u32 %v1397_v8, %v1260_v26 }
 0x10a   :  { %v922_v6 = vmax.f32 %v829_v18, 0.0  ;;  %v843_v52 = vpop.f32.mrf.mxu3 }
 0x10b   :  { %v891_v24 = vmax.f32 %v751_v19, 0.0  ;;  %v760_v0 = vpop.f32.mrf.mxu1 }
 0x10c   :  { %986 = vst.msk [vmem:[%s2286_s3 + $0x160] sm:$0xff] %vm443_vm0, %v922_v6 }
 0x10d   :  { %955 = vst.msk [vmem:[%s2286_s3 + $0x68] sm:$0xff] %vm443_vm0, %v891_v24  ;;  %v661_v22 = vpop.f32.mrf.mxu2 }
 0x10e   :  { %v662_v28 = vadd.f32 %v1712_v61, %v661_v22  ;;  %v584_v30 = vpop.f32.mrf.mxu0 }
 0x10f   :  { %v585_v33 = vadd.f32 %v1712_v61, %v584_v30 }
 0x110   :  { %v831_v34 = vadd.f32 %v1982_v29, %v662_v28 }
 0x111   :  { %v754_v37 = vadd.f32 %v2003_v47, %v585_v33  ;;  %623 = vmatmul.bf16.gmra.mxu0 %v1133_v27 }
 0x112   :  { %v923_v38 = vmax.f32 %v831_v34, 0.0  ;;  %703 = vmatmul.bf16.gmra.mxu2 %v1261_v31  ;;  %v845_v63 = vpop.f32.mrf.mxu3 }
 0x113   :  { %v892_v39 = vmax.f32 %v754_v37, 0.0  ;;  %v763_v40 = vpop.f32.mrf.mxu1 }
 0x114   :  { %987 = vst.msk [vmem:[%s2286_s3 + $0x168] sm:$0xff] %vm443_vm0, %v923_v38 }
 0x115   :  { %956 = vst.msk [vmem:[%s2286_s3 + $0x70] sm:$0xff] %vm443_vm0, %v892_v39  ;;  %v664_v14 = vpop.f32.mrf.mxu2 }
 0x116   :  { %v665_v29 = vadd.f32 %v1712_v61, %v664_v14  ;;  %v586_v36 = vpop.f32.mrf.mxu0 }
 0x117   :  { %v587_v44 = vadd.f32 %v1712_v61, %v586_v36 }
 0x118   :  { %v834_v45 = vadd.f32 %v2013_v48, %v665_v29 }
 0x119   :  { %v756_v47 = vadd.f32 %v755_v58, %v587_v44 }
 0x11a   :  { %v924_v12 = vmax.f32 %v834_v45, 0.0  ;;  %v848_v16 = vpop.f32.mrf.mxu3 }
 0x11b   :  { %v893_v43 = vmax.f32 %v756_v47, 0.0  ;;  %v765_v49 = vpop.f32.mrf.mxu1 }
 0x11c   :  { %988 = vst.msk [vmem:[%s2286_s3 + $0x170] sm:$0xff] %vm443_vm0, %v924_v12 }
 0x11d   :  { %957 = vst.msk [vmem:[%s2286_s3 + $0x78] sm:$0xff] %vm443_vm0, %v893_v43  ;;  %v666_v50 = vpop.f32.mrf.mxu2 }
 0x11e   :  { %v667_v53 = vadd.f32 %v1712_v61, %v666_v50  ;;  %v589_v55 = vpop.f32.mrf.mxu0 }
 0x11f   :  { %v590_v48 = vadd.f32 %v1712_v61, %v589_v55 }
 0x120   :  { %v836_v32 = vadd.f32 %v835_v5, %v667_v53 }
 0x121   :  { %v759_v56 = vadd.f32 %v758_v7, %v590_v48 }
 0x122   :  { %v925_v57 = vmax.f32 %v836_v32, 0.0  ;;  %v850_v8 = vpop.f32.mrf.mxu3 }
 0x123   :  { %v894_v58 = vmax.f32 %v759_v56, 0.0  ;;  %v768_v59 = vpop.f32.mrf.mxu1 }
 0x124   :  { %989 = vst.msk [vmem:[%s2286_s3 + $0x178] sm:$0xff] %vm443_vm0, %v925_v57 }
 0x125   :  { %958 = vst.msk [vmem:[%s2286_s3 + $0x80] sm:$0xff] %vm443_vm0, %v894_v58  ;;  %v669_v35 = vpop.f32.mrf.mxu2 }
 0x126   :  { %v670_v51 = vadd.f32 %v1712_v61, %v669_v35  ;;  %v591_v60 = vpop.f32.mrf.mxu0 }
 0x127   :  { %v592_v62 = vadd.f32 %v1712_v61, %v591_v60 }
 0x128   :  { %v839_v1 = vadd.f32 %v838_v20, %v670_v51 }
 0x129   :  { %v761_v2 = vadd.f32 %v760_v0, %v592_v62 }
 0x12a   :  { %v926_v3 = vmax.f32 %v839_v1, 0.0 }
 0x12b   :  { %v895_v4 = vmax.f32 %v761_v2, 0.0  ;;  %v770_v5 = vpop.f32.mrf.mxu1 }
 0x12c   :  { %990 = vst.msk [vmem:[%s2286_s3 + $0x180] sm:$0xff] %vm443_vm0, %v926_v3 }
 0x12d   :  { %959 = vst.msk [vmem:[%s2286_s3 + $0x88] sm:$0xff] %vm443_vm0, %v895_v4  ;;  %v671_v54 = vpop.f32.mrf.mxu2 }
 0x12e   :  { %v672_v9 = vadd.f32 %v1712_v61, %v671_v54  ;;  %v594_v10 = vpop.f32.mrf.mxu0 }
 0x12f   :  { %v595_v13 = vadd.f32 %v1712_v61, %v594_v10 }
 0x130   :  { %v841_v41 = vadd.f32 %v840_v42, %v672_v9 }
 0x131   :  { %v764_v7 = vadd.f32 %v763_v40, %v595_v13  ;;  %v853_v40 = vpop.f32.mrf.mxu3 }
 0x132   :  { %v927_v46 = vmax.f32 %v841_v41, 0.0 }
 0x133   :  { %v896_v15 = vmax.f32 %v764_v7, 0.0  ;;  %v773_v17 = vpop.f32.mrf.mxu1 }
 0x134   :  { %991 = vst.msk [vmem:[%s2286_s3 + $0x188] sm:$0xff] %vm443_vm0, %v927_v46 }
 0x135   :  { %960 = vst.msk [vmem:[%s2286_s3 + $0x90] sm:$0xff] %vm443_vm0, %v896_v15  ;;  %v674_v18 = vpop.f32.mrf.mxu2 }
 0x136   :  { %v675_v19 = vadd.f32 %v1712_v61, %v674_v18  ;;  %v596_v20 = vpop.f32.mrf.mxu0 }
 0x137   :  { %v597_v6 = vadd.f32 %v1712_v61, %v596_v20 }
 0x138   :  { %v844_v21 = vadd.f32 %v843_v52, %v675_v19 }
 0x139   :  { %v766_v23 = vadd.f32 %v765_v49, %v597_v6  ;;  %v855_v53 = vpop.f32.mrf.mxu3 }
 0x13a   :  { %v928_v24 = vmax.f32 %v844_v21, 0.0 }
 0x13b   :  { %v897_v0 = vmax.f32 %v766_v23, 0.0  ;;  %v775_v26 = vpop.f32.mrf.mxu1 }
 0x13c   :  { %992 = vst.msk [vmem:[%s2286_s3 + $0x190] sm:$0xff] %vm443_vm0, %v928_v24 }
 0x13d   :  { %961 = vst.msk [vmem:[%s2286_s3 + $0x98] sm:$0xff] %vm443_vm0, %v897_v0  ;;  %v676_v22 = vpop.f32.mrf.mxu2 }
 0x13e   :  { %v677_v27 = vadd.f32 %v1712_v61, %v676_v22  ;;  %v599_v28 = vpop.f32.mrf.mxu0 }
 0x13f   :  { %v600_v30 = vadd.f32 %v1712_v61, %v599_v28 }
 0x140   :  { %v846_v31 = vadd.f32 %v845_v63, %v677_v27 }
 0x141   :  { %v769_v33 = vadd.f32 %v768_v59, %v600_v30  ;;  %v858_v63 = vpop.f32.mrf.mxu3 }
 0x142   :  { %v929_v34 = vmax.f32 %v846_v31, 0.0 }
 0x143   :  { %v898_v37 = vmax.f32 %v769_v33, 0.0  ;;  %v778_v38 = vpop.f32.mrf.mxu1 }
 0x144   :  { %993 = vst.msk [vmem:[%s2286_s3 + $0x198] sm:$0xff] %vm443_vm0, %v929_v34 }
 0x145   :  { %962 = vst.msk [vmem:[%s2286_s3 + $0xa0] sm:$0xff] %vm443_vm0, %v898_v37  ;;  %v679_v39 = vpop.f32.mrf.mxu2 }
 0x146   :  { %v680_v42 = vadd.f32 %v1712_v61, %v679_v39  ;;  %v601_v14 = vpop.f32.mrf.mxu0 }
 0x147   :  { %v602_v29 = vadd.f32 %v1712_v61, %v601_v14 }
 0x148   :  { %v849_v36 = vadd.f32 %v848_v16, %v680_v42 }
 0x149   :  { %v771_v44 = vadd.f32 %v770_v5, %v602_v29  ;;  %v860_v46 = vpop.f32.mrf.mxu3 }
 0x14a   :  { %v930_v45 = vmax.f32 %v849_v36, 0.0 }
 0x14b   :  { %v899_v47 = vmax.f32 %v771_v44, 0.0  ;;  %v780_v12 = vpop.f32.mrf.mxu1 }
 0x14c   :  { %994 = vst.msk [vmem:[%s2286_s3 + $0x1a0] sm:$0xff] %vm443_vm0, %v930_v45 }
 0x14d   :  { %963 = vst.msk [vmem:[%s2286_s3 + $0xa8] sm:$0xff] %vm443_vm0, %v899_v47  ;;  %v681_v43 = vpop.f32.mrf.mxu2 }
 0x14e   :  { %v682_v49 = vadd.f32 %v1712_v61, %v681_v43  ;;  %v604_v50 = vpop.f32.mrf.mxu0 }
 0x14f   :  { %v605_v52 = vadd.f32 %v1712_v61, %v604_v50 }
 0x150   :  { %v851_v55 = vadd.f32 %v850_v8, %v682_v49 }
 0x151   :  { %v774_v48 = vadd.f32 %v773_v17, %v605_v52 }
 0x152   :  { %v931_v32 = vmax.f32 %v851_v55, 0.0  ;;  %v630_v55 = vadd.f32 %v1712_v61, %v1736_v11 }
 0x153   :  { %v900_v56 = vmax.f32 %v774_v48, 0.0  ;;  %v783_v57 = vpop.f32.mrf.mxu1 }
 0x154   :  { %995 = vst.msk [vmem:[%s2286_s3 + $0x1a8] sm:$0xff] %vm443_vm0, %v931_v32 }
 0x155   :  { %964 = vst.msk [vmem:[%s2286_s3 + $0xb0] sm:$0xff] %vm443_vm0, %v900_v56  ;;  %v684_v58 = vpop.f32.mrf.mxu2 }
 0x156   :  { %v685_v59 = vadd.f32 %v1712_v61, %v684_v58  ;;  %v606_v35 = vpop.f32.mrf.mxu0 }
 0x157   :  { %v607_v51 = vadd.f32 %v1712_v61, %v606_v35 }
 0x158   :  { %v854_v60 = vadd.f32 %v853_v40, %v685_v59 }
 0x159   :  { %v776_v62 = vadd.f32 %v775_v26, %v607_v51  ;;  %v863_v26 = vpop.f32.mrf.mxu3 }
 0x15a   :  { %v932_v1 = vmax.f32 %v854_v60, 0.0 }
 0x15b   :  { %v901_v2 = vmax.f32 %v776_v62, 0.0  ;;  %v785_v3 = vpop.f32.mrf.mxu1 }
 0x15c   :  { %996 = vst.msk [vmem:[%s2286_s3 + $0x1b0] sm:$0xff] %vm443_vm0, %v932_v1 }
 0x15d   :  { %965 = vst.msk [vmem:[%s2286_s3 + $0xb8] sm:$0xff] %vm443_vm0, %v901_v2  ;;  %v686_v4 = vpop.f32.mrf.mxu2 }
 0x15e   :  { %v687_v5 = vadd.f32 %v1712_v61, %v686_v4  ;;  %v609_v54 = vpop.f32.mrf.mxu0 }
 0x15f   :  { %v610_v9 = vadd.f32 %v1712_v61, %v609_v54 }
 0x160   :  { %v856_v10 = vadd.f32 %v855_v53, %v687_v5 }
 0x161   :  { %v779_v13 = vadd.f32 %v778_v38, %v610_v9  ;;  %v865_v42 = vpop.f32.mrf.mxu3 }
 0x162   :  { %v933_v41 = vmax.f32 %v856_v10, 0.0 }
 0x163   :  { %v902_v7 = vmax.f32 %v779_v13, 0.0  ;;  %v788_v16 = vpop.f32.mrf.mxu1 }
 0x164   :  { %997 = vst.msk [vmem:[%s2286_s3 + $0x1b8] sm:$0xff] %vm443_vm0, %v933_v41 }
 0x165   :  { %966 = vst.msk [vmem:[%s2286_s3 + $0xc0] sm:$0xff] %vm443_vm0, %v902_v7  ;;  %v689_v15 = vpop.f32.mrf.mxu2 }
 0x166   :  { %v690_v17 = vadd.f32 %v1712_v61, %v689_v15  ;;  %v611_v18 = vpop.f32.mrf.mxu0 }
 0x167   :  { %v612_v19 = vadd.f32 %v1712_v61, %v611_v18 }
 0x168   :  { %v859_v20 = vadd.f32 %v858_v63, %v690_v17  ;;  %v632_v63 = vadd.f32 %v1712_v61, %v1767_v25 }
 0x169   :  { %v781_v6 = vadd.f32 %v780_v12, %v612_v19  ;;  %v868_v53 = vpop.f32.mrf.mxu3 }
 0x16a   :  { %v934_v21 = vmax.f32 %v859_v20, 0.0 }
 0x16b   :  { %v903_v23 = vmax.f32 %v781_v6, 0.0  ;;  %v790_v24 = vpop.f32.mrf.mxu1 }
 0x16c   :  { %998 = vst.msk [vmem:[%s2286_s3 + $0x1c0] sm:$0xff] %vm443_vm0, %v934_v21 }
 0x16d   :  { %967 = vst.msk [vmem:[%s2286_s3 + $0xc8] sm:$0xff] %vm443_vm0, %v903_v23  ;;  %v691_v0 = vpop.f32.mrf.mxu2 }
 0x16e   :  { %v692_v8 = vadd.f32 %v1712_v61, %v691_v0  ;;  %v614_v22 = vpop.f32.mrf.mxu0 }
 0x16f   :  { %v615_v27 = vadd.f32 %v1712_v61, %v614_v22 }
 0x170   :  { %v861_v28 = vadd.f32 %v860_v46, %v692_v8 }
 0x171   :  { %v784_v30 = vadd.f32 %v783_v57, %v615_v27 }
 0x172   :  { %v935_v31 = vmax.f32 %v861_v28, 0.0 }
 0x173   :  { %v904_v33 = vmax.f32 %v784_v30, 0.0  ;;  %v793_v34 = vpop.f32.mrf.mxu1 }
 0x174   :  { %999 = vst.msk [vmem:[%s2286_s3 + $0x1c8] sm:$0xff] %vm443_vm0, %v935_v31 }
 0x175   :  { %968 = vst.msk [vmem:[%s2286_s3 + $0xd0] sm:$0xff] %vm443_vm0, %v904_v33  ;;  %v694_v37 = vpop.f32.mrf.mxu2 }
 0x176   :  { %v695_v38 = vadd.f32 %v1712_v61, %v694_v37  ;;  %v616_v39 = vpop.f32.mrf.mxu0 }
 0x177   :  { %v617_v40 = vadd.f32 %v1712_v61, %v616_v39 }
 0x178   :  { %v864_v14 = vadd.f32 %v863_v26, %v695_v38 }
 0x179   :  { %v786_v29 = vadd.f32 %v785_v3, %v617_v40  ;;  %v870_v3 = vpop.f32.mrf.mxu3 }
 0x17a   :  { %v936_v36 = vmax.f32 %v864_v14, 0.0 }
 0x17b   :  { %v905_v44 = vmax.f32 %v786_v29, 0.0  ;;  %v795_v45 = vpop.f32.mrf.mxu1 }
 0x17c   :  { %1000 = vst.msk [vmem:[%s2286_s3 + $0x1d0] sm:$0xff] %vm443_vm0, %v936_v36 }
 0x17d   :  { %969 = vst.msk [vmem:[%s2286_s3 + $0xd8] sm:$0xff] %vm443_vm0, %v905_v44  ;;  %v696_v47 = vpop.f32.mrf.mxu2 }
 0x17e   :  { %v697_v12 = vadd.f32 %v1712_v61, %v696_v47  ;;  %v619_v43 = vpop.f32.mrf.mxu0 }
 0x17f   :  { %v620_v49 = vadd.f32 %v1712_v61, %v619_v43 }
 0x180   :  { %v866_v50 = vadd.f32 %v865_v42, %v697_v12 }
 0x181   :  { %v789_v52 = vadd.f32 %v788_v16, %v620_v49  ;;  %v873_v15 = vpop.f32.mrf.mxu3 }
 0x182   :  { %v937_v48 = vmax.f32 %v866_v50, 0.0 }
 0x183   :  { %v906_v32 = vmax.f32 %v789_v52, 0.0  ;;  %v798_v56 = vpop.f32.mrf.mxu1 }
 0x184   :  { %1001 = vst.msk [vmem:[%s2286_s3 + $0x1d8] sm:$0xff] %vm443_vm0, %v937_v48  ;;  %v799_v57 = vadd.f32 %v798_v56, %v630_v55 }
 0x185   :  { %970 = vst.msk [vmem:[%s2286_s3 + $0xe0] sm:$0xff] %vm443_vm0, %v906_v32  ;;  %v699_v58 = vpop.f32.mrf.mxu2 }
 0x186   :  { %v910_v59 = vmax.f32 %v799_v57, 0.0  ;;  %v700_v35 = vadd.f32 %v1712_v61, %v699_v58  ;;  %v621_v51 = vpop.f32.mrf.mxu0 }
 0x187   :  { %v622_v11 = vadd.f32 %v1712_v61, %v621_v51 }
 0x188   :  { %974 = vst.msk [vmem:[%s2286_s3 + $0x100] sm:$0xff] %vm443_vm0, %v910_v59  ;;  %v869_v60 = vadd.f32 %v868_v53, %v700_v35 }
 0x189   :  { %v791_v62 = vadd.f32 %v790_v24, %v622_v11  ;;  %v875_v8 = vpop.f32.mrf.mxu3 }
 0x18a   :  { %v938_v1 = vmax.f32 %v869_v60, 0.0 }
 0x18b   :  { %v907_v2 = vmax.f32 %v791_v62, 0.0  ;;  %v800_v4 = vpop.f32.mrf.mxu1 }
 0x18c   :  { %1002 = vst.msk [vmem:[%s2286_s3 + $0x1e0] sm:$0xff] %vm443_vm0, %v938_v1  ;;  %v801_v5 = vadd.f32 %v800_v4, %v632_v63 }
 0x18d   :  { %971 = vst.msk [vmem:[%s2286_s3 + $0xe8] sm:$0xff] %vm443_vm0, %v907_v2  ;;  %v701_v54 = vpop.f32.mrf.mxu2 }
 0x18e   :  { %v911_v9 = vmax.f32 %v801_v5, 0.0  ;;  %v702_v10 = vadd.f32 %v1712_v61, %v701_v54  ;;  %v624_v25 = vpop.f32.mrf.mxu0 }
 0x18f   :  { %v625_v13 = vadd.f32 %v1712_v61, %v624_v25 }
 0x190   :  { %975 = vst.msk [vmem:[%s2286_s3 + $0x108] sm:$0xff] %vm443_vm0, %v911_v9  ;;  %v871_v41 = vadd.f32 %v870_v3, %v702_v10 }
 0x191   :  { %v794_v7 = vadd.f32 %v793_v34, %v625_v13 }
 0x192   :  { %v939_v16 = vmax.f32 %v871_v41, 0.0 }
 0x193   :  { %v908_v46 = vmax.f32 %v794_v7, 0.0 }
 0x194   :  { %1003 = vst.msk [vmem:[%s2286_s3 + $0x1e8] sm:$0xff] %vm443_vm0, %v939_v16 }
 0x195   :  { %972 = vst.msk [vmem:[%s2286_s3 + $0xf0] sm:$0xff] %vm443_vm0, %v908_v46  ;;  %v704_v17 = vpop.f32.mrf.mxu2 }
 0x196   :  { %v705_v18 = vadd.f32 %v1712_v61, %v704_v17  ;;  %v626_v19 = vpop.f32.mrf.mxu0 }
 0x197   :  { %v627_v20 = vadd.f32 %v1712_v61, %v626_v19 }
 0x198   :  { %v874_v6 = vadd.f32 %v873_v15, %v705_v18 }
 0x199   :  { %v796_v21 = vadd.f32 %v795_v45, %v627_v20 }
 0x19a   :  { %v940_v23 = vmax.f32 %v874_v6, 0.0 }
 0x19b   :  { %v909_v24 = vmax.f32 %v796_v21, 0.0 }
 0x19c   :  { %1004 = vst.msk [vmem:[%s2286_s3 + $0x1f0] sm:$0xff] %vm443_vm0, %v940_v23 }
 0x19d   :  { %973 = vst.msk [vmem:[%s2286_s3 + $0xf8] sm:$0xff] %vm443_vm0, %v909_v24  ;;  %v706_v0 = vpop.f32.mrf.mxu2 }
 0x19e   :  { %v707_v26 = vadd.f32 %v1712_v61, %v706_v0 }
 0x1a0   :  { %v876_v22 = vadd.f32 %v875_v8, %v707_v26 }
 0x1a2   :  { %v941_v27 = vmax.f32 %v876_v22, 0.0 }
 0x1a4   :  { %1005 = vst.msk [vmem:[%s2286_s3 + $0x1f8] sm:$0xff] %vm443_vm0, %v941_v27 }

// kernel: bbn_resnet_forward.11
= control target key start
LH: loop header
LB: loop body
LE: loop exit
PB: predicated region body
PF: predicated region fallthrough
CT: control target
= control target key end

     0   :  { %vm446_vm0 = vcmask 130048   ;;  %s2644_s1 = inlined_call_operand.vmem [shape: bf16[144,16], index: 1, kind: input, shape index: {}]   ;;  %s2645_s0 = inlined_call_operand.vmem [shape: bf16[512,144], index: 0, kind: input, shape index: {}]   ;;  %s2646_s2 = inlined_call_operand.vmem [shape: f32[1,16], index: 2, kind: input, shape index: {}]   ;;  %s2647_s3 = inlined_call_operand.vmem [shape: f32[512,16], index: 3, kind: input, shape index: {}]   ;;  %s2648_s4 = inlined_call_operand.vmem [shape: f32[512,16], index: 4, kind: output, shape index: {}]  }
   0x1   :  { %v1536_v0 = vld [vmem:[%s2644_s1 + $0x38] sm:$0xff]  ;;  %v1537_v1 = vld [vmem:[%s2644_s1 + $0x40] sm:$0xff]  ;;  %v1145_v3 = vld [vmem:[%s2645_s0 + $0x8] sm:$0xf0] }
   0x2   :  { %v1465_v2 = vld [vmem:[%s2645_s0 + $0x4] sm:$0xf]  ;;  %543 = vmatpush.bf16.msra.mxu0 %v1536_v0  ;;  %1538 = vmatpush.bf16.msra.mxu2 %v1536_v0  ;;  %v1535_v5 = vld [vmem:[%s2644_s1 + $0x30] sm:$0xff]  ;;  %v1534_v6 = vld [vmem:[%s2644_s1 + $0x28] sm:$0xff] }
   0x3   :  { %v1148_v4 = vor.u32 %v1465_v2, %v1145_v3  ;;  %719 = vmatpush.bf16.msra.mxu1 %v1537_v1  ;;  %1546 = vmatpush.bf16.msra.mxu3 %v1537_v1  ;;  %v1499_v7 = vld [vmem:[%s2645_s0 + $0x114] sm:$0xf]  ;;  %v1281_v8 = vld [vmem:[%s2645_s0 + $0x118] sm:$0xf0]  ;;  %v1533_v10 = vld [vmem:[%s2644_s1 + $0x20] sm:$0xff] }
   0x4   :  { %v1284_v9 = vor.u32 %v1499_v7, %v1281_v8  ;;  %v1532_v11 = vld [vmem:[%s2644_s1 + $0x18] sm:$0xff]  ;;  %v1467_v12 = vld [vmem:[%s2645_s0 + $0x14] sm:$0xf]  ;;  %v1530_v16 = vld [vmem:[%s2644_s1 + $0x8] sm:$0xff] }
   0x5   :  { %v1153_v13 = vld [vmem:[%s2645_s0 + $0x18] sm:$0xf0]  ;;  %v1531_v15 = vld [vmem:[%s2644_s1 + $0x10] sm:$0xff]  ;;  %v1501_v17 = vld [vmem:[%s2645_s0 + $0x124] sm:$0xf] }
   0x6   :  { %1433 = vmatmul.msk.bf16.vlgmr.msra.gmra.mxu1 %vm446_vm0, %v1148_v4  ;;  %544 = vmatpush.bf16.msra.mxu0 %v1535_v5  ;;  %v1156_v14 = vor.u32 %v1467_v12, %v1153_v13  ;;  %v1289_v18 = vld [vmem:[%s2645_s0 + $0x128] sm:$0xf0]  ;;  %v1529_v20 = vld [vmem:[%s2644_s1] sm:$0xff]  ;;  %v1466_v22 = vld [vmem:[%s2645_s0 + $0x4] sm:$0xf0] }
   0x7   :  { %1539 = vmatpush.bf16.msra.mxu2 %v1535_v5  ;;  %1450 = vmatmul.msk.bf16.vlgmr.msra.gmra.mxu3 %vm446_vm0, %v1284_v9  ;;  %v1292_v19 = vor.u32 %v1501_v17, %v1289_v18  ;;  %v1143_v21 = vld [vmem:[%s2645_s0] sm:$0xf]  ;;  %v1498_v24 = vld [vmem:[%s2645_s0 + $0x104] sm:$0xf0]  ;;  %v1469_v27 = vld [vmem:[%s2645_s0 + $0x24] sm:$0xf] }
   0x8   :  { %v1271_v23 = vld [vmem:[%s2645_s0 + $0x100] sm:$0xf]  ;;  %v1144_v25 = vor.u32 %v1466_v22, %v1143_v21  ;;  %v1161_v28 = vld [vmem:[%s2645_s0 + $0x28] sm:$0xf0]  ;;  %v1503_v30 = vld [vmem:[%s2645_s0 + $0x134] sm:$0xf] }
   0x9   :  { %v1272_v26 = vor.u32 %v1498_v24, %v1271_v23  ;;  %v1164_v29 = vor.u32 %v1469_v27, %v1161_v28  ;;  %v1297_v31 = vld [vmem:[%s2645_s0 + $0x138] sm:$0xf0]  ;;  %v1151_v33 = vld [vmem:[%s2645_s0 + $0x10] sm:$0xf]  ;;  %v1468_v34 = vld [vmem:[%s2645_s0 + $0x14] sm:$0xf0] }
   0xa   :  { %545 = vmatpush.bf16.msra.mxu0 %v1534_v6  ;;  %v1300_v32 = vor.u32 %v1503_v30, %v1297_v31  ;;  %v1279_v35 = vld [vmem:[%s2645_s0 + $0x110] sm:$0xf]  ;;  %v1500_v36 = vld [vmem:[%s2645_s0 + $0x114] sm:$0xf0]  ;;  %v1152_v37 = vor.u32 %v1468_v34, %v1151_v33  ;;  %v1471_v39 = vld [vmem:[%s2645_s0 + $0x34] sm:$0xf] }
   0xb   :  { %1540 = vmatpush.bf16.msra.mxu2 %v1534_v6  ;;  %v1280_v38 = vor.u32 %v1500_v36, %v1279_v35  ;;  %v1169_v40 = vld [vmem:[%s2645_s0 + $0x38] sm:$0xf0]  ;;  %v1505_v42 = vld [vmem:[%s2645_s0 + $0x144] sm:$0xf]  ;;  %v1305_v43 = vld [vmem:[%s2645_s0 + $0x148] sm:$0xf0] }
   0xc   :  { %v1172_v41 = vor.u32 %v1471_v39, %v1169_v40  ;;  %v1308_v44 = vor.u32 %v1505_v42, %v1305_v43  ;;  %v1159_v45 = vld [vmem:[%s2645_s0 + $0x20] sm:$0xf]  ;;  %v1470_v46 = vld [vmem:[%s2645_s0 + $0x24] sm:$0xf0]  ;;  %v1473_v51 = vld [vmem:[%s2645_s0 + $0x44] sm:$0xf] }
   0xd   :  { %v1287_v47 = vld [vmem:[%s2645_s0 + $0x120] sm:$0xf]  ;;  %v1502_v48 = vld [vmem:[%s2645_s0 + $0x124] sm:$0xf0]  ;;  %v1160_v49 = vor.u32 %v1470_v46, %v1159_v45  ;;  %v1177_v52 = vld [vmem:[%s2645_s0 + $0x48] sm:$0xf0] }
   0xe   :  { %546 = vmatpush.bf16.msra.mxu0 %v1533_v10  ;;  %v1288_v50 = vor.u32 %v1502_v48, %v1287_v47  ;;  %v1180_v53 = vor.u32 %v1473_v51, %v1177_v52  ;;  %v1507_v54 = vld [vmem:[%s2645_s0 + $0x154] sm:$0xf]  ;;  %v1313_v55 = vld [vmem:[%s2645_s0 + $0x158] sm:$0xf0]  ;;  %v1167_v57 = vld [vmem:[%s2645_s0 + $0x30] sm:$0xf] }
   0xf   :  { %1541 = vmatpush.bf16.msra.mxu2 %v1533_v10  ;;  %v1316_v56 = vor.u32 %v1507_v54, %v1313_v55  ;;  %v1472_v58 = vld [vmem:[%s2645_s0 + $0x34] sm:$0xf0]  ;;  %v1295_v59 = vld [vmem:[%s2645_s0 + $0x130] sm:$0xf]  ;;  %v1475_v63 = vld [vmem:[%s2645_s0 + $0x54] sm:$0xf] }
  0x10   :  { %v1504_v60 = vld [vmem:[%s2645_s0 + $0x134] sm:$0xf0]  ;;  %v1168_v61 = vor.u32 %v1472_v58, %v1167_v57  ;;  %v1185_v0 = vld [vmem:[%s2645_s0 + $0x58] sm:$0xf0]  ;;  %v1509_v2 = vld [vmem:[%s2645_s0 + $0x164] sm:$0xf] }
  0x11   :  { %v1296_v62 = vor.u32 %v1504_v60, %v1295_v59  ;;  %v1188_v1 = vor.u32 %v1475_v63, %v1185_v0  ;;  %v1321_v3 = vld [vmem:[%s2645_s0 + $0x168] sm:$0xf0]  ;;  %v1175_v5 = vld [vmem:[%s2645_s0 + $0x40] sm:$0xf]  ;;  %v1474_v6 = vld [vmem:[%s2645_s0 + $0x44] sm:$0xf0] }
  0x12   :  { %547 = vmatpush.bf16.msra.mxu0 %v1532_v11  ;;  %v1324_v4 = vor.u32 %v1509_v2, %v1321_v3  ;;  %v1303_v7 = vld [vmem:[%s2645_s0 + $0x140] sm:$0xf]  ;;  %v1506_v8 = vld [vmem:[%s2645_s0 + $0x144] sm:$0xf0]  ;;  %v1176_v9 = vor.u32 %v1474_v6, %v1175_v5  ;;  %v1193_v12 = vld [vmem:[%s2645_s0 + $0x68] sm:$0xf0] }
  0x13   :  { %1542 = vmatpush.bf16.msra.mxu2 %v1532_v11  ;;  %v1304_v10 = vor.u32 %v1506_v8, %v1303_v7  ;;  %v1477_v11 = vld [vmem:[%s2645_s0 + $0x64] sm:$0xf]  ;;  %v1476_v17 = vld [vmem:[%s2645_s0 + $0x54] sm:$0xf0]  ;;  %v1479_v23 = vld [vmem:[%s2645_s0 + $0x74] sm:$0xf] }
  0x14   :  { %v1196_v13 = vor.u32 %v1477_v11, %v1193_v12  ;;  %v1201_v24 = vld [vmem:[%s2645_s0 + $0x78] sm:$0xf0]  ;;  %v1337_v27 = vld [vmem:[%s2645_s0 + $0x188] sm:$0xf0]  ;;  %v1191_v28 = vld [vmem:[%s2645_s0 + $0x60] sm:$0xf] }
  0x15   :  { %v1319_v31 = vld [vmem:[%s2645_s0 + $0x160] sm:$0xf]  ;;  %v1481_v35 = vld [vmem:[%s2645_s0 + $0x84] sm:$0xf]  ;;  %v1209_v36 = vld [vmem:[%s2645_s0 + $0x88] sm:$0xf0] }
  0x16   :  { %1434 = vmatmul.msk.bf16.gmra.mxu1 %vm446_vm0, %v1156_v14  ;;  %548 = vmatpush.bf16.msra.mxu0 %v1531_v15  ;;  %v1511_v14 = vld [vmem:[%s2645_s0 + $0x174] sm:$0xf]  ;;  %v1345_v40 = vld [vmem:[%s2645_s0 + $0x198] sm:$0xf0]  ;;  %v1480_v42 = vld [vmem:[%s2645_s0 + $0x74] sm:$0xf0] }
  0x17   :  { %1543 = vmatpush.bf16.msra.mxu2 %v1531_v15  ;;  %1451 = vmatmul.msk.bf16.gmra.mxu3 %vm446_vm0, %v1292_v19  ;;  %v1329_v15 = vld [vmem:[%s2645_s0 + $0x178] sm:$0xf0]  ;;  %v1311_v19 = vld [vmem:[%s2645_s0 + $0x150] sm:$0xf]  ;;  %v1515_v39 = vld [vmem:[%s2645_s0 + $0x194] sm:$0xf] }
  0x18   :  { %v1332_v18 = vor.u32 %v1511_v14, %v1329_v15  ;;  %v1348_v43 = vor.u32 %v1515_v39, %v1345_v40  ;;  %v1327_v45 = vld [vmem:[%s2645_s0 + $0x170] sm:$0xf]  ;;  %v1512_v46 = vld [vmem:[%s2645_s0 + $0x174] sm:$0xf0]  ;;  %v1517_v55 = vld [vmem:[%s2645_s0 + $0x1a4] sm:$0xf] }
  0x19   :  { %v1328_v48 = vor.u32 %v1512_v46, %v1327_v45  ;;  %v1207_v57 = vld [vmem:[%s2645_s0 + $0x80] sm:$0xf]  ;;  %v1482_v58 = vld [vmem:[%s2645_s0 + $0x84] sm:$0xf0]  ;;  %v1225_v5 = vld [vmem:[%s2645_s0 + $0xa8] sm:$0xf0] }
  0x1a   :  { %549 = vmatpush.bf16.msra.mxu0 %v1530_v16  ;;  %v1514_v63 = vld [vmem:[%s2645_s0 + $0x184] sm:$0xf0]  ;;  %v1208_v0 = vor.u32 %v1482_v58, %v1207_v57  ;;  %v881_v7 = vld [vmem:[%s2647_s3] sm:$0xff]  ;;  %v915_v46 = vld [vmem:[%s2647_s3 + $0x110] sm:$0xff] }
  0x1b   :  { %1544 = vmatpush.bf16.msra.mxu2 %v1530_v16  ;;  %v1183_v16 = vld [vmem:[%s2645_s0 + $0x50] sm:$0xf]  ;;  %v1223_v57 = vld [vmem:[%s2645_s0 + $0xa0] sm:$0xf] }
  0x1c   :  { %v1184_v21 = vor.u32 %v1476_v17, %v1183_v16  ;;  %v882_v17 = vld [vmem:[%s2647_s3 + $0x8] sm:$0xff] }
  0x1e   :  { %550 = vmatpush.bf16.msra.mxu0 %v1529_v20 }
  0x1f   :  { %1545 = vmatpush.bf16.msra.mxu2 %v1529_v20  ;;  %v1508_v20 = vld [vmem:[%s2645_s0 + $0x154] sm:$0xf0] }
  0x20   :  { %v1312_v22 = vor.u32 %v1508_v20, %v1311_v19  ;;  %v1519_v19 = vld [vmem:[%s2645_s0 + $0x1b4] sm:$0xf]  ;;  %v1361_v20 = vld [vmem:[%s2645_s0 + $0x1b8] sm:$0xf0] }
  0x21   :  { %551 = vmatmul.bf16.vlgmr.msra.gmra.mxu0 %v1144_v25  ;;  %v1204_v25 = vor.u32 %v1479_v23, %v1201_v24  ;;  %v1364_v23 = vor.u32 %v1519_v19, %v1361_v20 }
  0x22   :  { %631 = vmatmul.bf16.vlgmr.msra.gmra.mxu2 %v1272_v26  ;;  %v1513_v26 = vld [vmem:[%s2645_s0 + $0x184] sm:$0xf] }
  0x23   :  { %v1340_v30 = vor.u32 %v1513_v26, %v1337_v27  ;;  %v1343_v26 = vld [vmem:[%s2645_s0 + $0x190] sm:$0xf]  ;;  %v1516_v27 = vld [vmem:[%s2645_s0 + $0x194] sm:$0xf0] }
  0x26   :  { %1435 = vmatmul.msk.bf16.gmra.mxu1 %vm446_vm0, %v1164_v29  ;;  %v1478_v29 = vld [vmem:[%s2645_s0 + $0x64] sm:$0xf0] }
  0x27   :  { %1452 = vmatmul.msk.bf16.gmra.mxu3 %vm446_vm0, %v1300_v32  ;;  %v1510_v32 = vld [vmem:[%s2645_s0 + $0x164] sm:$0xf0]  ;;  %v1192_v33 = vor.u32 %v1478_v29, %v1191_v28 }
  0x28   :  { %v1320_v34 = vor.u32 %v1510_v32, %v1319_v31  ;;  %v1344_v32 = vor.u32 %v1516_v27, %v1343_v26  ;;  %v917_v27 = vld [vmem:[%s2647_s3 + $0x120] sm:$0xff] }
  0x31   :  { %556 = vmatmul.bf16.gmra.mxu0 %v1152_v37  ;;  %v1212_v37 = vor.u32 %v1481_v35, %v1209_v36  ;;  %v1233_v35 = vld [vmem:[%s2645_s0 + $0xb8] sm:$0xf0] }
  0x32   :  { %636 = vmatmul.bf16.gmra.mxu2 %v1280_v38 }
  0x36   :  { %1436 = vmatmul.msk.bf16.gmra.mxu1 %vm446_vm0, %v1172_v41  ;;  %v1199_v41 = vld [vmem:[%s2645_s0 + $0x70] sm:$0xf] }
  0x37   :  { %1453 = vmatmul.msk.bf16.gmra.mxu3 %vm446_vm0, %v1308_v44  ;;  %v1200_v47 = vor.u32 %v1480_v42, %v1199_v41 }
  0x41   :  { %561 = vmatmul.bf16.gmra.mxu0 %v1160_v49  ;;  %v1483_v49 = vld [vmem:[%s2645_s0 + $0x94] sm:$0xf] }
  0x42   :  { %641 = vmatmul.bf16.gmra.mxu2 %v1288_v50  ;;  %v1217_v50 = vld [vmem:[%s2645_s0 + $0x98] sm:$0xf0] }
  0x43   :  { %v1220_v52 = vor.u32 %v1483_v49, %v1217_v50  ;;  %v884_v50 = vld [vmem:[%s2647_s3 + $0x18] sm:$0xff] }
  0x46   :  { %1437 = vmatmul.msk.bf16.gmra.mxu1 %vm446_vm0, %v1180_v53 }
  0x47   :  { %1454 = vmatmul.msk.bf16.gmra.mxu3 %vm446_vm0, %v1316_v56  ;;  %v1353_v56 = vld [vmem:[%s2645_s0 + $0x1a8] sm:$0xf0] }
  0x48   :  { %v1356_v59 = vor.u32 %v1517_v55, %v1353_v56  ;;  %v1369_v55 = vld [vmem:[%s2645_s0 + $0x1c8] sm:$0xf0] }
  0x51   :  { %566 = vmatmul.bf16.gmra.mxu0 %v1168_v61  ;;  %v1851_v61 = vld [vmem:[%s2646_s2] ss:$0 sm:$0xff] }
  0x52   :  { %646 = vmatmul.bf16.gmra.mxu2 %v1296_v62  ;;  %v1335_v62 = vld [vmem:[%s2645_s0 + $0x180] sm:$0xf] }
  0x53   :  { %v1336_v2 = vor.u32 %v1514_v63, %v1335_v62  ;;  %v1351_v62 = vld [vmem:[%s2645_s0 + $0x1a0] sm:$0xf]  ;;  %v1518_v63 = vld [vmem:[%s2645_s0 + $0x1a4] sm:$0xf0] }
  0x56   :  { %1438 = vmatmul.msk.bf16.gmra.mxu1 %vm446_vm0, %v1188_v1 }
  0x57   :  { %1455 = vmatmul.msk.bf16.gmra.mxu3 %vm446_vm0, %v1324_v4  ;;  %v1485_v4 = vld [vmem:[%s2645_s0 + $0xa4] sm:$0xf] }
  0x61   :  { %571 = vmatmul.bf16.gmra.mxu0 %v1176_v9  ;;  %v1228_v9 = vor.u32 %v1485_v4, %v1225_v5 }
  0x62   :  { %651 = vmatmul.bf16.gmra.mxu2 %v1304_v10 }
  0x66   :  { %1439 = vmatmul.msk.bf16.gmra.mxu1 %vm446_vm0, %v1196_v13 }
  0x67   :  { %1456 = vmatmul.msk.bf16.gmra.mxu3 %vm446_vm0, %v1332_v18 }
  0x71   :  { %576 = vmatmul.bf16.gmra.mxu0 %v1184_v21  ;;  %v1215_v21 = vld [vmem:[%s2645_s0 + $0x90] sm:$0xf] }
  0x72   :  { %656 = vmatmul.bf16.gmra.mxu2 %v1312_v22  ;;  %v1484_v22 = vld [vmem:[%s2645_s0 + $0x94] sm:$0xf0] }
  0x76   :  { %1440 = vmatmul.msk.bf16.gmra.mxu1 %vm446_vm0, %v1204_v25 }
  0x77   :  { %1457 = vmatmul.msk.bf16.gmra.mxu3 %vm446_vm0, %v1340_v30  ;;  %v1216_v30 = vor.u32 %v1484_v22, %v1215_v21 }
  0x81   :  { %581 = vmatmul.bf16.gmra.mxu0 %v1192_v33 }
  0x82   :  { %661 = vmatmul.bf16.gmra.mxu2 %v1320_v34  ;;  %v1487_v34 = vld [vmem:[%s2645_s0 + $0xb4] sm:$0xf] }
  0x83   :  { %v721_v38 = vpop.f32.mrf.mxu1  ;;  %v1236_v39 = vor.u32 %v1487_v34, %v1233_v35  ;;  %v1523_v34 = vld [vmem:[%s2645_s0 + $0x1d4] sm:$0xf]  ;;  %v1377_v35 = vld [vmem:[%s2645_s0 + $0x1d8] sm:$0xf0] }
  0x86   :  { %1441 = vmatmul.msk.bf16.gmra.mxu1 %vm446_vm0, %v1212_v37  ;;  %v883_v37 = vld [vmem:[%s2647_s3 + $0x10] sm:$0xff] }
  0x87   :  { %1458 = vmatmul.msk.bf16.gmra.mxu3 %vm446_vm0, %v1348_v43 }
  0x8a   :  { %v1829_v51 = vpop.f32.mrf.mxu3 }
  0x8b   :  { %v723_v44 = vpop.f32.mrf.mxu1 }
  0x91   :  { %586 = vmatmul.bf16.gmra.mxu0 %v1200_v47 }
  0x92   :  { %666 = vmatmul.bf16.gmra.mxu2 %v1328_v48  ;;  %v1832_v54 = vpop.f32.mrf.mxu3 }
  0x93   :  { %v726_v53 = vpop.f32.mrf.mxu1 }
  0x96   :  { %1442 = vmatmul.msk.bf16.gmra.mxu1 %vm446_vm0, %v1220_v52 }
  0x97   :  { %1459 = vmatmul.msk.bf16.gmra.mxu3 %vm446_vm0, %v1356_v59 }
  0x9a   :  { %v1867_v6 = vpop.f32.mrf.mxu3 }
  0x9b   :  { %v1846_v60 = vpop.f32.mrf.mxu1 }
  0x9e   :  { %v552_v1 = vpop.f32.mrf.mxu0 }
  0x9f   :  { %v553_v3 = vadd.f32 %v1851_v61, %v552_v1 }
  0xa1   :  { %v722_v8 = vadd.f32 %v721_v38, %v553_v3  ;;  %591 = vmatmul.bf16.gmra.mxu0 %v1208_v0 }
  0xa2   :  { %671 = vmatmul.bf16.gmra.mxu2 %v1336_v2  ;;  %v1882_v16 = vpop.f32.mrf.mxu3 }
  0xa3   :  { %v945_v10 = vadd.f32 %v881_v7, %v722_v8  ;;  %v1872_v11 = vpop.f32.mrf.mxu1  ;;  %v1352_v7 = vor.u32 %v1518_v63, %v1351_v62  ;;  %v916_v8 = vld [vmem:[%s2647_s3 + $0x118] sm:$0xff] }
  0xa5   :  { %v1009_v12 = vmax.f32 %v945_v10, 0.0  ;;  %v1874_v13 = vpop.f32.mrf.mxu2  ;;  %v1489_v10 = vld [vmem:[%s2645_s0 + $0xc4] sm:$0xf] }
  0xa6   :  { %1443 = vmatmul.msk.bf16.gmra.mxu1 %vm446_vm0, %v1228_v9  ;;  %v554_v14 = vpop.f32.mrf.mxu0 }
  0xa7   :  { %1073 = vst.msk [vmem:[%s2648_s4] sm:$0xff] %vm446_vm0, %v1009_v12  ;;  %v555_v15 = vadd.f32 %v1851_v61, %v554_v14  ;;  %1460 = vmatmul.msk.bf16.gmra.mxu3 %vm446_vm0, %v1364_v23  ;;  %v1241_v12 = vld [vmem:[%s2645_s0 + $0xc8] sm:$0xf0] }
  0xa8   :  { %v1244_v20 = vor.u32 %v1489_v10, %v1241_v12  ;;  %v888_v12 = vld [vmem:[%s2647_s3 + $0x38] sm:$0xff] }
  0xa9   :  { %v724_v18 = vadd.f32 %v723_v44, %v555_v15 }
  0xaa   :  { %v1921_v36 = vpop.f32.mrf.mxu3 }
  0xab   :  { %v946_v24 = vadd.f32 %v882_v17, %v724_v18  ;;  %v1899_v25 = vpop.f32.mrf.mxu1  ;;  %v885_v17 = vld [vmem:[%s2647_s3 + $0x20] sm:$0xff] }
  0xad   :  { %v1010_v28 = vmax.f32 %v946_v24, 0.0  ;;  %v1908_v29 = vpop.f32.mrf.mxu2 }
  0xae   :  { %v557_v31 = vpop.f32.mrf.mxu0 }
  0xaf   :  { %1074 = vst.msk [vmem:[%s2648_s4 + $0x8] sm:$0xff] %vm446_vm0, %v1010_v28  ;;  %v558_v33 = vadd.f32 %v1851_v61, %v557_v31 }
  0xb1   :  { %v727_v38 = vadd.f32 %v726_v53, %v558_v33  ;;  %596 = vmatmul.bf16.gmra.mxu0 %v1216_v30  ;;  %v1521_v53 = vld [vmem:[%s2645_s0 + $0x1c4] sm:$0xf] }
  0xb2   :  { %676 = vmatmul.bf16.gmra.mxu2 %v1344_v32  ;;  %v1938_v48 = vpop.f32.mrf.mxu3  ;;  %v1372_v58 = vor.u32 %v1521_v53, %v1369_v55  ;;  %v886_v32 = vld [vmem:[%s2647_s3 + $0x28] sm:$0xff] }
  0xb3   :  { %v947_v40 = vadd.f32 %v883_v37, %v727_v38  ;;  %v1926_v41 = vpop.f32.mrf.mxu1  ;;  %v1231_v38 = vld [vmem:[%s2645_s0 + $0xb0] sm:$0xf]  ;;  %v918_v53 = vld [vmem:[%s2647_s3 + $0x128] sm:$0xff] }
  0xb5   :  { %v1011_v42 = vmax.f32 %v947_v40, 0.0  ;;  %v637_v43 = vpop.f32.mrf.mxu2 }
  0xb6   :  { %v638_v44 = vadd.f32 %v1851_v61, %v637_v43  ;;  %1444 = vmatmul.msk.bf16.gmra.mxu1 %vm446_vm0, %v1236_v39  ;;  %v559_v45 = vpop.f32.mrf.mxu0  ;;  %v1380_v39 = vor.u32 %v1523_v34, %v1377_v35  ;;  %v1520_v43 = vld [vmem:[%s2645_s0 + $0x1b4] sm:$0xf0] }
  0xb7   :  { %1075 = vst.msk [vmem:[%s2648_s4 + $0x10] sm:$0xff] %vm446_vm0, %v1011_v42  ;;  %v560_v47 = vadd.f32 %v1851_v61, %v559_v45  ;;  %1461 = vmatmul.msk.bf16.gmra.mxu3 %vm446_vm0, %v1372_v58  ;;  %v1359_v42 = vld [vmem:[%s2645_s0 + $0x1b0] sm:$0xf]  ;;  %v920_v34 = vld [vmem:[%s2647_s3 + $0x138] sm:$0xff] }
  0xb8   :  { %v807_v49 = vadd.f32 %v1829_v51, %v638_v44  ;;  %v1486_v51 = vld [vmem:[%s2645_s0 + $0xa4] sm:$0xf0] }
  0xb9   :  { %v729_v52 = vadd.f32 %v1846_v60, %v560_v47  ;;  %v1224_v3 = vor.u32 %v1486_v51, %v1223_v57  ;;  %v1249_v57 = vld [vmem:[%s2645_s0 + $0xd8] sm:$0xf0] }
  0xba   :  { %v979_v56 = vadd.f32 %v915_v46, %v807_v49  ;;  %v1985_v14 = vpop.f32.mrf.mxu3 }
  0xbb   :  { %v948_v59 = vadd.f32 %v884_v50, %v729_v52  ;;  %v1957_v60 = vpop.f32.mrf.mxu1  ;;  %v1360_v52 = vor.u32 %v1520_v43, %v1359_v42 }
  0xbc   :  { %v1043_v0 = vmax.f32 %v979_v56, 0.0  ;;  %v1491_v56 = vld [vmem:[%s2645_s0 + $0xd4] sm:$0xf] }
  0xbd   :  { %v1012_v1 = vmax.f32 %v948_v59, 0.0  ;;  %v639_v2 = vpop.f32.mrf.mxu2  ;;  %v887_v59 = vld [vmem:[%s2647_s3 + $0x30] sm:$0xff] }
  0xbe   :  { %1107 = vst.msk [vmem:[%s2648_s4 + $0x110] sm:$0xff] %vm446_vm0, %v1043_v0  ;;  %v640_v4 = vadd.f32 %v1851_v61, %v639_v2  ;;  %v562_v5 = vpop.f32.mrf.mxu0  ;;  %v1252_v0 = vor.u32 %v1491_v56, %v1249_v57  ;;  %v890_v56 = vld [vmem:[%s2647_s3 + $0x48] sm:$0xff] }
  0xbf   :  { %1076 = vst.msk [vmem:[%s2648_s4 + $0x18] sm:$0xff] %vm446_vm0, %v1012_v1  ;;  %v563_v9 = vadd.f32 %v1851_v61, %v562_v5 }
  0xc0   :  { %v809_v15 = vadd.f32 %v1832_v54, %v640_v4 }
  0xc1   :  { %v732_v18 = vadd.f32 %v1872_v11, %v563_v9  ;;  %601 = vmatmul.bf16.gmra.mxu0 %v1224_v3 }
  0xc2   :  { %v980_v19 = vadd.f32 %v916_v8, %v809_v15  ;;  %681 = vmatmul.bf16.gmra.mxu2 %v1352_v7  ;;  %v2008_v30 = vpop.f32.mrf.mxu3  ;;  %v919_v7 = vld [vmem:[%s2647_s3 + $0x130] sm:$0xff] }
  0xc3   :  { %v949_v21 = vadd.f32 %v885_v17, %v732_v18  ;;  %v1992_v22 = vpop.f32.mrf.mxu1  ;;  %v1525_v17 = vld [vmem:[%s2645_s0 + $0x1e4] sm:$0xf]  ;;  %v1385_v18 = vld [vmem:[%s2645_s0 + $0x1e8] sm:$0xf0] }
  0xc4   :  { %v1044_v23 = vmax.f32 %v980_v19, 0.0 }
  0xc5   :  { %v1013_v24 = vmax.f32 %v949_v21, 0.0  ;;  %v642_v26 = vpop.f32.mrf.mxu2  ;;  %v1388_v21 = vor.u32 %v1525_v17, %v1385_v18  ;;  %v922_v17 = vld [vmem:[%s2647_s3 + $0x148] sm:$0xff] }
  0xc6   :  { %1108 = vst.msk [vmem:[%s2648_s4 + $0x118] sm:$0xff] %vm446_vm0, %v1044_v23  ;;  %v643_v54 = vadd.f32 %v1851_v61, %v642_v26  ;;  %1445 = vmatmul.msk.bf16.gmra.mxu1 %vm446_vm0, %v1244_v20  ;;  %v564_v11 = vpop.f32.mrf.mxu0  ;;  %v1239_v20 = vld [vmem:[%s2645_s0 + $0xc0] sm:$0xf]  ;;  %v1522_v26 = vld [vmem:[%s2645_s0 + $0x1c4] sm:$0xf0] }
  0xc7   :  { %1077 = vst.msk [vmem:[%s2648_s4 + $0x20] sm:$0xff] %vm446_vm0, %v1013_v24  ;;  %v565_v28 = vadd.f32 %v1851_v61, %v564_v11  ;;  %1462 = vmatmul.msk.bf16.gmra.mxu3 %vm446_vm0, %v1380_v39  ;;  %v1367_v24 = vld [vmem:[%s2645_s0 + $0x1c0] sm:$0xf] }
  0xc8   :  { %v812_v31 = vadd.f32 %v1867_v6, %v643_v54  ;;  %v1488_v6 = vld [vmem:[%s2645_s0 + $0xb4] sm:$0xf0]  ;;  %v889_v39 = vld [vmem:[%s2647_s3 + $0x40] sm:$0xff] }
  0xc9   :  { %v734_v33 = vadd.f32 %v1899_v25, %v565_v28  ;;  %v1232_v47 = vor.u32 %v1488_v6, %v1231_v38  ;;  %v1257_v38 = vld [vmem:[%s2645_s0 + $0xe8] sm:$0xf0] }
  0xca   :  { %v981_v37 = vadd.f32 %v917_v27, %v812_v31  ;;  %v2055_v51 = vpop.f32.mrf.mxu3 }
  0xcb   :  { %v950_v40 = vadd.f32 %v886_v32, %v734_v33  ;;  %v2027_v25 = vpop.f32.mrf.mxu1  ;;  %v1368_v33 = vor.u32 %v1522_v26, %v1367_v24 }
  0xcc   :  { %v1045_v44 = vmax.f32 %v981_v37, 0.0  ;;  %v1493_v37 = vld [vmem:[%s2645_s0 + $0xe4] sm:$0xf] }
  0xcd   :  { %v1014_v45 = vmax.f32 %v950_v40, 0.0  ;;  %v644_v46 = vpop.f32.mrf.mxu2 }
  0xce   :  { %1109 = vst.msk [vmem:[%s2648_s4 + $0x120] sm:$0xff] %vm446_vm0, %v1045_v44  ;;  %v645_v49 = vadd.f32 %v1851_v61, %v644_v46  ;;  %v567_v50 = vpop.f32.mrf.mxu0  ;;  %v1260_v44 = vor.u32 %v1493_v37, %v1257_v38  ;;  %v892_v37 = vld [vmem:[%s2647_s3 + $0x58] sm:$0xff] }
  0xcf   :  { %1078 = vst.msk [vmem:[%s2648_s4 + $0x28] sm:$0xff] %vm446_vm0, %v1014_v45  ;;  %v568_v55 = vadd.f32 %v1851_v61, %v567_v50 }
  0xd0   :  { %v814_v58 = vadd.f32 %v1882_v16, %v645_v49 }
  0xd1   :  { %v737_v62 = vadd.f32 %v1926_v41, %v568_v55  ;;  %606 = vmatmul.bf16.gmra.mxu0 %v1232_v47 }
  0xd2   :  { %v982_v63 = vadd.f32 %v918_v53, %v814_v58  ;;  %686 = vmatmul.bf16.gmra.mxu2 %v1360_v52  ;;  %v2078_v9 = vpop.f32.mrf.mxu3  ;;  %v921_v52 = vld [vmem:[%s2647_s3 + $0x140] sm:$0xff]  ;;  %v1527_v58 = vld [vmem:[%s2645_s0 + $0x1f4] sm:$0xf] }
  0xd3   :  { %v951_v1 = vadd.f32 %v887_v59, %v737_v62  ;;  %v2062_v2 = vpop.f32.mrf.mxu1  ;;  %v1393_v59 = vld [vmem:[%s2645_s0 + $0x1f8] sm:$0xf0] }
  0xd4   :  { %v1046_v3 = vmax.f32 %v982_v63, 0.0  ;;  %v1247_v63 = vld [vmem:[%s2645_s0 + $0xd0] sm:$0xf] }
  0xd5   :  { %v1015_v4 = vmax.f32 %v951_v1, 0.0  ;;  %v647_v5 = vpop.f32.mrf.mxu2 }
  0xd6   :  { %1110 = vst.msk [vmem:[%s2648_s4 + $0x128] sm:$0xff] %vm446_vm0, %v1046_v3  ;;  %v648_v16 = vadd.f32 %v1851_v61, %v647_v5  ;;  %1446 = vmatmul.msk.bf16.gmra.mxu1 %vm446_vm0, %v1252_v0  ;;  %v569_v41 = vpop.f32.mrf.mxu0  ;;  %v1396_v0 = vor.u32 %v1527_v58, %v1393_v59  ;;  %v1375_v3 = vld [vmem:[%s2645_s0 + $0x1d0] sm:$0xf] }
  0xd7   :  { %1079 = vst.msk [vmem:[%s2648_s4 + $0x30] sm:$0xff] %vm446_vm0, %v1015_v4  ;;  %v570_v8 = vadd.f32 %v1851_v61, %v569_v41  ;;  %1463 = vmatmul.msk.bf16.gmra.mxu3 %vm446_vm0, %v1388_v21  ;;  %v1524_v4 = vld [vmem:[%s2645_s0 + $0x1d4] sm:$0xf0]  ;;  %v891_v21 = vld [vmem:[%s2647_s3 + $0x50] sm:$0xff] }
  0xd8   :  { %v817_v10 = vadd.f32 %v1921_v36, %v648_v16  ;;  %v1490_v36 = vld [vmem:[%s2645_s0 + $0xc4] sm:$0xf0] }
  0xd9   :  { %v739_v15 = vadd.f32 %v1957_v60, %v570_v8  ;;  %v1240_v28 = vor.u32 %v1490_v36, %v1239_v20  ;;  %v1265_v20 = vld [vmem:[%s2645_s0 + $0xf8] sm:$0xf0] }
  0xda   :  { %v983_v19 = vadd.f32 %v919_v7, %v817_v10  ;;  %v2130_v42 = vpop.f32.mrf.mxu3 }
  0xdb   :  { %v952_v23 = vadd.f32 %v888_v12, %v739_v15  ;;  %v2097_v60 = vpop.f32.mrf.mxu1  ;;  %v1376_v15 = vor.u32 %v1524_v4, %v1375_v3 }
  0xdc   :  { %v1047_v54 = vmax.f32 %v983_v19, 0.0  ;;  %v1495_v19 = vld [vmem:[%s2645_s0 + $0xf4] sm:$0xf] }
  0xdd   :  { %v1016_v11 = vmax.f32 %v952_v23, 0.0  ;;  %v649_v27 = vpop.f32.mrf.mxu2  ;;  %v1268_v26 = vor.u32 %v1495_v19, %v1265_v20  ;;  %v1263_v19 = vld [vmem:[%s2645_s0 + $0xf0] sm:$0xf]  ;;  %v1496_v20 = vld [vmem:[%s2645_s0 + $0xf4] sm:$0xf0] }
  0xde   :  { %1111 = vst.msk [vmem:[%s2648_s4 + $0x130] sm:$0xff] %vm446_vm0, %v1047_v54  ;;  %v650_v31 = vadd.f32 %v1851_v61, %v649_v27  ;;  %v572_v32 = vpop.f32.mrf.mxu0 }
  0xdf   :  { %1080 = vst.msk [vmem:[%s2648_s4 + $0x38] sm:$0xff] %vm446_vm0, %v1016_v11  ;;  %v573_v35 = vadd.f32 %v1851_v61, %v572_v32 }
  0xe0   :  { %v819_v6 = vadd.f32 %v1938_v48, %v650_v31 }
  0xe1   :  { %v742_v40 = vadd.f32 %v1992_v22, %v573_v35  ;;  %611 = vmatmul.bf16.gmra.mxu0 %v1240_v28 }
  0xe2   :  { %v984_v43 = vadd.f32 %v920_v34, %v819_v6  ;;  %691 = vmatmul.bf16.gmra.mxu2 %v1368_v33  ;;  %v2173_v5 = vpop.f32.mrf.mxu3  ;;  %v923_v33 = vld [vmem:[%s2647_s3 + $0x150] sm:$0xff] }
  0xe3   :  { %v953_v45 = vadd.f32 %v889_v39, %v742_v40  ;;  %v2132_v46 = vpop.f32.mrf.mxu1  ;;  %v1255_v39 = vld [vmem:[%s2645_s0 + $0xe0] sm:$0xf]  ;;  %v1494_v40 = vld [vmem:[%s2645_s0 + $0xe4] sm:$0xf0] }
  0xe4   :  { %v1048_v47 = vmax.f32 %v984_v43, 0.0 }
  0xe5   :  { %v1017_v49 = vmax.f32 %v953_v45, 0.0  ;;  %v652_v50 = vpop.f32.mrf.mxu2 }
  0xe6   :  { %1112 = vst.msk [vmem:[%s2648_s4 + $0x138] sm:$0xff] %vm446_vm0, %v1048_v47  ;;  %v653_v48 = vadd.f32 %v1851_v61, %v652_v50  ;;  %1447 = vmatmul.msk.bf16.gmra.mxu1 %vm446_vm0, %v1260_v44  ;;  %v574_v22 = vpop.f32.mrf.mxu0  ;;  %v1256_v50 = vor.u32 %v1494_v40, %v1255_v39 }
  0xe7   :  { %1081 = vst.msk [vmem:[%s2648_s4 + $0x40] sm:$0xff] %vm446_vm0, %v1017_v49  ;;  %v575_v53 = vadd.f32 %v1851_v61, %v574_v22  ;;  %1464 = vmatmul.msk.bf16.gmra.mxu3 %vm446_vm0, %v1396_v0 }
  0xe8   :  { %v822_v55 = vadd.f32 %v1985_v14, %v653_v48  ;;  %v1492_v14 = vld [vmem:[%s2645_s0 + $0xd4] sm:$0xf0] }
  0xe9   :  { %v744_v57 = vadd.f32 %v2027_v25, %v575_v53  ;;  %v1248_v8 = vor.u32 %v1492_v14, %v1247_v63  ;;  %v924_v53 = vld [vmem:[%s2647_s3 + $0x158] sm:$0xff] }
  0xea   :  { %v985_v62 = vadd.f32 %v921_v52, %v822_v55  ;;  %v2202_v32 = vpop.f32.mrf.mxu3 }
  0xeb   :  { %v954_v1 = vadd.f32 %v890_v56, %v744_v57  ;;  %v2165_v25 = vpop.f32.mrf.mxu1  ;;  %v1497_v56 = vld [vmem:[%s2645_s0 + $0x104] sm:$0xf]  ;;  %v1273_v57 = vld [vmem:[%s2645_s0 + $0x108] sm:$0xf0] }
  0xec   :  { %v1049_v16 = vmax.f32 %v985_v62, 0.0  ;;  %v893_v62 = vld [vmem:[%s2647_s3 + $0x60] sm:$0xff]  ;;  %v1276_v0 = vor.u32 %v1497_v56, %v1273_v57 }
  0xed   :  { %v1018_v41 = vmax.f32 %v954_v1, 0.0  ;;  %v654_v7 = vpop.f32.mrf.mxu2 }
  0xee   :  { %1113 = vst.msk [vmem:[%s2648_s4 + $0x140] sm:$0xff] %vm446_vm0, %v1049_v16  ;;  %v655_v10 = vadd.f32 %v1851_v61, %v654_v7  ;;  %v577_v12 = vpop.f32.mrf.mxu0  ;;  %v925_v7 = vld [vmem:[%s2647_s3 + $0x160] sm:$0xff] }
  0xef   :  { %1082 = vst.msk [vmem:[%s2648_s4 + $0x48] sm:$0xff] %vm446_vm0, %v1018_v41  ;;  %v578_v18 = vadd.f32 %v1851_v61, %v577_v12  ;;  %v894_v12 = vld [vmem:[%s2647_s3 + $0x68] sm:$0xff] }
  0xf0   :  { %v824_v36 = vadd.f32 %v2008_v30, %v655_v10 }
  0xf1   :  { %v747_v23 = vadd.f32 %v2062_v2, %v578_v18  ;;  %616 = vmatmul.bf16.gmra.mxu0 %v1248_v8 }
  0xf2   :  { %v986_v24 = vadd.f32 %v922_v17, %v824_v36  ;;  %696 = vmatmul.bf16.gmra.mxu2 %v1376_v15  ;;  %v2256_v58 = vpop.f32.mrf.mxu3 }
  0xf3   :  { %v955_v54 = vadd.f32 %v891_v21, %v747_v23  ;;  %v2200_v11 = vpop.f32.mrf.mxu1 }
  0xf4   :  { %v1050_v27 = vmax.f32 %v986_v24, 0.0 }
  0xf5   :  { %v1019_v28 = vmax.f32 %v955_v54, 0.0  ;;  %v657_v31 = vpop.f32.mrf.mxu2  ;;  %v1264_v54 = vor.u32 %v1496_v20, %v1263_v19 }
  0xf6   :  { %1114 = vst.msk [vmem:[%s2648_s4 + $0x148] sm:$0xff] %vm446_vm0, %v1050_v27  ;;  %v658_v30 = vadd.f32 %v1851_v61, %v657_v31  ;;  %1448 = vmatmul.msk.bf16.gmra.mxu1 %vm446_vm0, %v1268_v26  ;;  %v579_v2 = vpop.f32.mrf.mxu0 }
  0xf7   :  { %1083 = vst.msk [vmem:[%s2648_s4 + $0x50] sm:$0xff] %vm446_vm0, %v1019_v28  ;;  %v580_v34 = vadd.f32 %v1851_v61, %v579_v2 }
  0xf8   :  { %v827_v35 = vadd.f32 %v2055_v51, %v658_v30  ;;  %v1383_v51 = vld [vmem:[%s2645_s0 + $0x1e0] sm:$0xf]  ;;  %v926_v30 = vld [vmem:[%s2647_s3 + $0x168] sm:$0xff] }
  0xf9   :  { %v749_v38 = vadd.f32 %v2097_v60, %v580_v34  ;;  %v1526_v60 = vld [vmem:[%s2645_s0 + $0x1e4] sm:$0xf0]  ;;  %v895_v34 = vld [vmem:[%s2647_s3 + $0x70] sm:$0xff] }
  0xfa   :  { %v987_v6 = vadd.f32 %v923_v33, %v827_v35  ;;  %v1384_v52 = vor.u32 %v1526_v60, %v1383_v51  ;;  %v2284_v17 = vpop.f32.mrf.mxu3 }
  0xfb   :  { %v956_v43 = vadd.f32 %v892_v37, %v749_v38  ;;  %v2229_v44 = vpop.f32.mrf.mxu1 }
  0xfc   :  { %v1051_v45 = vmax.f32 %v987_v6, 0.0 }
  0xfd   :  { %v1020_v47 = vmax.f32 %v956_v43, 0.0  ;;  %v659_v49 = vpop.f32.mrf.mxu2 }
  0xfe   :  { %1115 = vst.msk [vmem:[%s2648_s4 + $0x150] sm:$0xff] %vm446_vm0, %v1051_v45  ;;  %v660_v48 = vadd.f32 %v1851_v61, %v659_v49  ;;  %v582_v22 = vpop.f32.mrf.mxu0  ;;  %v896_v49 = vld [vmem:[%s2647_s3 + $0x78] sm:$0xff] }
  0xff   :  { %1084 = vst.msk [vmem:[%s2648_s4 + $0x58] sm:$0xff] %vm446_vm0, %v1020_v47  ;;  %v583_v55 = vadd.f32 %v1851_v61, %v582_v22 }
 0x100   :  { %v829_v59 = vadd.f32 %v2078_v9, %v660_v48 }
 0x101   :  { %v752_v63 = vadd.f32 %v2132_v46, %v583_v55  ;;  %621 = vmatmul.bf16.gmra.mxu0 %v1256_v50 }
 0x102   :  { %v988_v14 = vadd.f32 %v924_v53, %v829_v59  ;;  %701 = vmatmul.bf16.gmra.mxu2 %v1384_v52  ;;  %v843_v39 = vpop.f32.mrf.mxu3 }
 0x103   :  { %v957_v1 = vadd.f32 %v893_v62, %v752_v63  ;;  %v2263_v3 = vpop.f32.mrf.mxu1 }
 0x104   :  { %v1052_v4 = vmax.f32 %v988_v14, 0.0  ;;  %v897_v14 = vld [vmem:[%s2647_s3 + $0x80] sm:$0xff] }
 0x105   :  { %v1021_v16 = vmax.f32 %v957_v1, 0.0  ;;  %v662_v41 = vpop.f32.mrf.mxu2 }
 0x106   :  { %1116 = vst.msk [vmem:[%s2648_s4 + $0x158] sm:$0xff] %vm446_vm0, %v1052_v4  ;;  %v663_v9 = vadd.f32 %v1851_v61, %v662_v41  ;;  %1449 = vmatmul.msk.bf16.gmra.mxu1 %vm446_vm0, %v1276_v0  ;;  %v584_v46 = vpop.f32.mrf.mxu0 }
 0x107   :  { %1085 = vst.msk [vmem:[%s2648_s4 + $0x60] sm:$0xff] %vm446_vm0, %v1021_v16  ;;  %v585_v8 = vadd.f32 %v1851_v61, %v584_v46 }
 0x108   :  { %v832_v10 = vadd.f32 %v2130_v42, %v663_v9  ;;  %v1391_v42 = vld [vmem:[%s2645_s0 + $0x1f0] sm:$0xf] }
 0x109   :  { %v754_v15 = vadd.f32 %v2165_v25, %v585_v8  ;;  %v1528_v25 = vld [vmem:[%s2645_s0 + $0x1f4] sm:$0xf0] }
 0x10a   :  { %v989_v18 = vadd.f32 %v925_v7, %v832_v10  ;;  %v1392_v31 = vor.u32 %v1528_v25, %v1391_v42  ;;  %v846_v57 = vpop.f32.mrf.mxu3 }
 0x10b   :  { %v958_v36 = vadd.f32 %v894_v12, %v754_v15  ;;  %v2292_v21 = vpop.f32.mrf.mxu1  ;;  %v898_v15 = vld [vmem:[%s2647_s3 + $0x88] sm:$0xff] }
 0x10c   :  { %v1053_v23 = vmax.f32 %v989_v18, 0.0 }
 0x10d   :  { %v1022_v24 = vmax.f32 %v958_v36, 0.0  ;;  %v664_v26 = vpop.f32.mrf.mxu2 }
 0x10e   :  { %1117 = vst.msk [vmem:[%s2648_s4 + $0x160] sm:$0xff] %vm446_vm0, %v1053_v23  ;;  %v665_v27 = vadd.f32 %v1851_v61, %v664_v26  ;;  %v587_v28 = vpop.f32.mrf.mxu0 }
 0x10f   :  { %1086 = vst.msk [vmem:[%s2648_s4 + $0x68] sm:$0xff] %vm446_vm0, %v1022_v24  ;;  %v588_v2 = vadd.f32 %v1851_v61, %v587_v28 }
 0x110   :  { %v834_v33 = vadd.f32 %v2173_v5, %v665_v27  ;;  %v899_v27 = vld [vmem:[%s2647_s3 + $0x90] sm:$0xff] }
 0x111   :  { %v757_v35 = vadd.f32 %v2200_v11, %v588_v2  ;;  %626 = vmatmul.bf16.gmra.mxu0 %v1264_v54  ;;  %v927_v11 = vld [vmem:[%s2647_s3 + $0x170] sm:$0xff] }
 0x112   :  { %v990_v37 = vadd.f32 %v926_v30, %v834_v33  ;;  %706 = vmatmul.bf16.gmra.mxu2 %v1392_v31  ;;  %v848_v10 = vpop.f32.mrf.mxu3 }
 0x113   :  { %v959_v38 = vadd.f32 %v895_v34, %v757_v35  ;;  %v766_v6 = vpop.f32.mrf.mxu1 }
 0x114   :  { %v1054_v40 = vmax.f32 %v990_v37, 0.0 }
 0x115   :  { %v1023_v43 = vmax.f32 %v959_v38, 0.0  ;;  %v667_v51 = vpop.f32.mrf.mxu2 }
 0x116   :  { %1118 = vst.msk [vmem:[%s2648_s4 + $0x168] sm:$0xff] %vm446_vm0, %v1054_v40  ;;  %v668_v5 = vadd.f32 %v1851_v61, %v667_v51  ;;  %v589_v60 = vpop.f32.mrf.mxu0  ;;  %v900_v51 = vld [vmem:[%s2647_s3 + $0x98] sm:$0xff] }
 0x117   :  { %1087 = vst.msk [vmem:[%s2648_s4 + $0x70] sm:$0xff] %vm446_vm0, %v1023_v43  ;;  %v590_v45 = vadd.f32 %v1851_v61, %v589_v60 }
 0x118   :  { %v837_v47 = vadd.f32 %v2202_v32, %v668_v5 }
 0x119   :  { %v759_v50 = vadd.f32 %v2229_v44, %v590_v45  ;;  %v928_v44 = vld [vmem:[%s2647_s3 + $0x178] sm:$0xff] }
 0x11a   :  { %v991_v48 = vadd.f32 %v927_v11, %v837_v47  ;;  %v851_v31 = vpop.f32.mrf.mxu3 }
 0x11b   :  { %v960_v22 = vadd.f32 %v896_v49, %v759_v50  ;;  %v768_v52 = vpop.f32.mrf.mxu1 }
 0x11c   :  { %v1055_v53 = vmax.f32 %v991_v48, 0.0 }
 0x11d   :  { %v1024_v55 = vmax.f32 %v960_v22, 0.0  ;;  %v669_v56 = vpop.f32.mrf.mxu2 }
 0x11e   :  { %1119 = vst.msk [vmem:[%s2648_s4 + $0x170] sm:$0xff] %vm446_vm0, %v1055_v53  ;;  %v670_v32 = vadd.f32 %v1851_v61, %v669_v56  ;;  %v592_v59 = vpop.f32.mrf.mxu0 }
 0x11f   :  { %1088 = vst.msk [vmem:[%s2648_s4 + $0x78] sm:$0xff] %vm446_vm0, %v1024_v55  ;;  %v593_v62 = vadd.f32 %v1851_v61, %v592_v59 }
 0x120   :  { %v839_v63 = vadd.f32 %v2256_v58, %v670_v32 }
 0x121   :  { %v762_v0 = vadd.f32 %v2263_v3, %v593_v62  ;;  %v929_v3 = vld [vmem:[%s2647_s3 + $0x180] sm:$0xff] }
 0x122   :  { %v992_v1 = vadd.f32 %v928_v44, %v839_v63  ;;  %v853_v47 = vpop.f32.mrf.mxu3 }
 0x123   :  { %v961_v4 = vadd.f32 %v897_v14, %v762_v0  ;;  %v771_v16 = vpop.f32.mrf.mxu1 }
 0x124   :  { %v1056_v41 = vmax.f32 %v992_v1, 0.0 }
 0x125   :  { %v1025_v9 = vmax.f32 %v961_v4, 0.0  ;;  %v672_v46 = vpop.f32.mrf.mxu2 }
 0x126   :  { %1120 = vst.msk [vmem:[%s2648_s4 + $0x178] sm:$0xff] %vm446_vm0, %v1056_v41  ;;  %v673_v7 = vadd.f32 %v1851_v61, %v672_v46  ;;  %v594_v58 = vpop.f32.mrf.mxu0 }
 0x127   :  { %1089 = vst.msk [vmem:[%s2648_s4 + $0x80] sm:$0xff] %vm446_vm0, %v1025_v9  ;;  %v595_v8 = vadd.f32 %v1851_v61, %v594_v58 }
 0x128   :  { %v842_v12 = vadd.f32 %v2284_v17, %v673_v7  ;;  %v902_v7 = vld [vmem:[%s2647_s3 + $0xa8] sm:$0xff] }
 0x129   :  { %v764_v18 = vadd.f32 %v2292_v21, %v595_v8  ;;  %v930_v21 = vld [vmem:[%s2647_s3 + $0x188] sm:$0xff] }
 0x12a   :  { %v993_v19 = vadd.f32 %v929_v3, %v842_v12  ;;  %v856_v1 = vpop.f32.mrf.mxu3 }
 0x12b   :  { %v962_v20 = vadd.f32 %v898_v15, %v764_v18  ;;  %v773_v36 = vpop.f32.mrf.mxu1 }
 0x12c   :  { %v1057_v42 = vmax.f32 %v993_v19, 0.0 }
 0x12d   :  { %v1026_v25 = vmax.f32 %v962_v20, 0.0  ;;  %v674_v23 = vpop.f32.mrf.mxu2 }
 0x12e   :  { %1121 = vst.msk [vmem:[%s2648_s4 + $0x180] sm:$0xff] %vm446_vm0, %v1057_v42  ;;  %v675_v24 = vadd.f32 %v1851_v61, %v674_v23  ;;  %v597_v17 = vpop.f32.mrf.mxu0 }
 0x12f   :  { %1090 = vst.msk [vmem:[%s2648_s4 + $0x88] sm:$0xff] %vm446_vm0, %v1026_v25  ;;  %v598_v26 = vadd.f32 %v1851_v61, %v597_v17 }
 0x130   :  { %v844_v54 = vadd.f32 %v843_v39, %v675_v24  ;;  %v903_v24 = vld [vmem:[%s2647_s3 + $0xb0] sm:$0xff] }
 0x131   :  { %v767_v28 = vadd.f32 %v766_v6, %v598_v26  ;;  %v931_v6 = vld [vmem:[%s2647_s3 + $0x190] sm:$0xff] }
 0x132   :  { %v994_v30 = vadd.f32 %v930_v21, %v844_v54  ;;  %v858_v25 = vpop.f32.mrf.mxu3 }
 0x133   :  { %v963_v2 = vadd.f32 %v899_v27, %v767_v28  ;;  %v776_v33 = vpop.f32.mrf.mxu1 }
 0x134   :  { %v1058_v34 = vmax.f32 %v994_v30, 0.0 }
 0x135   :  { %v1027_v35 = vmax.f32 %v963_v2, 0.0  ;;  %v677_v37 = vpop.f32.mrf.mxu2 }
 0x136   :  { %1122 = vst.msk [vmem:[%s2648_s4 + $0x188] sm:$0xff] %vm446_vm0, %v1058_v34  ;;  %v678_v38 = vadd.f32 %v1851_v61, %v677_v37  ;;  %v599_v39 = vpop.f32.mrf.mxu0  ;;  %v904_v37 = vld [vmem:[%s2647_s3 + $0xb8] sm:$0xff] }
 0x137   :  { %1091 = vst.msk [vmem:[%s2648_s4 + $0x90] sm:$0xff] %vm446_vm0, %v1027_v35  ;;  %v600_v40 = vadd.f32 %v1851_v61, %v599_v39 }
 0x138   :  { %v847_v43 = vadd.f32 %v846_v57, %v678_v38  ;;  %v901_v57 = vld [vmem:[%s2647_s3 + $0xa0] sm:$0xff] }
 0x139   :  { %v769_v5 = vadd.f32 %v768_v52, %v600_v40  ;;  %v932_v52 = vld [vmem:[%s2647_s3 + $0x198] sm:$0xff] }
 0x13a   :  { %v995_v60 = vadd.f32 %v931_v6, %v847_v43  ;;  %v861_v39 = vpop.f32.mrf.mxu3 }
 0x13b   :  { %v964_v11 = vadd.f32 %v900_v51, %v769_v5  ;;  %v778_v45 = vpop.f32.mrf.mxu1 }
 0x13c   :  { %v1059_v49 = vmax.f32 %v995_v60, 0.0 }
 0x13d   :  { %v1028_v50 = vmax.f32 %v964_v11, 0.0  ;;  %v679_v48 = vpop.f32.mrf.mxu2 }
 0x13e   :  { %1123 = vst.msk [vmem:[%s2648_s4 + $0x190] sm:$0xff] %vm446_vm0, %v1059_v49  ;;  %v680_v22 = vadd.f32 %v1851_v61, %v679_v48  ;;  %v602_v53 = vpop.f32.mrf.mxu0  ;;  %v905_v48 = vld [vmem:[%s2647_s3 + $0xc0] sm:$0xff] }
 0x13f   :  { %1092 = vst.msk [vmem:[%s2648_s4 + $0x98] sm:$0xff] %vm446_vm0, %v1028_v50  ;;  %v603_v55 = vadd.f32 %v1851_v61, %v602_v53 }
 0x140   :  { %v849_v56 = vadd.f32 %v848_v10, %v680_v22 }
 0x141   :  { %v772_v32 = vadd.f32 %v771_v16, %v603_v55  ;;  %v933_v16 = vld [vmem:[%s2647_s3 + $0x1a0] sm:$0xff] }
 0x142   :  { %v996_v59 = vadd.f32 %v932_v52, %v849_v56  ;;  %v863_v56 = vpop.f32.mrf.mxu3 }
 0x143   :  { %v965_v44 = vadd.f32 %v901_v57, %v772_v32  ;;  %v781_v62 = vpop.f32.mrf.mxu1 }
 0x144   :  { %v1060_v63 = vmax.f32 %v996_v59, 0.0 }
 0x145   :  { %v1029_v14 = vmax.f32 %v965_v44, 0.0  ;;  %v682_v0 = vpop.f32.mrf.mxu2 }
 0x146   :  { %1124 = vst.msk [vmem:[%s2648_s4 + $0x198] sm:$0xff] %vm446_vm0, %v1060_v63  ;;  %v683_v4 = vadd.f32 %v1851_v61, %v682_v0  ;;  %v604_v41 = vpop.f32.mrf.mxu0 }
 0x147   :  { %1093 = vst.msk [vmem:[%s2648_s4 + $0xa0] sm:$0xff] %vm446_vm0, %v1029_v14  ;;  %v605_v9 = vadd.f32 %v1851_v61, %v604_v41 }
 0x148   :  { %v852_v46 = vadd.f32 %v851_v31, %v683_v4 }
 0x149   :  { %v774_v58 = vadd.f32 %v773_v36, %v605_v9  ;;  %v934_v36 = vld [vmem:[%s2647_s3 + $0x1a8] sm:$0xff] }
 0x14a   :  { %v997_v3 = vadd.f32 %v933_v16, %v852_v46 }
 0x14b   :  { %v966_v8 = vadd.f32 %v902_v7, %v774_v58  ;;  %v783_v10 = vpop.f32.mrf.mxu1 }
 0x14c   :  { %v1061_v12 = vmax.f32 %v997_v3, 0.0  ;;  %v866_v3 = vpop.f32.mrf.mxu3 }
 0x14d   :  { %v1030_v15 = vmax.f32 %v966_v8, 0.0  ;;  %v684_v18 = vpop.f32.mrf.mxu2 }
 0x14e   :  { %1125 = vst.msk [vmem:[%s2648_s4 + $0x1a0] sm:$0xff] %vm446_vm0, %v1061_v12  ;;  %v685_v19 = vadd.f32 %v1851_v61, %v684_v18  ;;  %v607_v20 = vpop.f32.mrf.mxu0 }
 0x14f   :  { %1094 = vst.msk [vmem:[%s2648_s4 + $0xa8] sm:$0xff] %vm446_vm0, %v1030_v15  ;;  %v608_v42 = vadd.f32 %v1851_v61, %v607_v20  ;;  %v2517_v15 = vld [vmem:[%s2646_s2] ss:$0 sm:$0xff] }
 0x150   :  { %v854_v23 = vadd.f32 %v853_v47, %v685_v19 }
 0x151   :  { %v777_v17 = vadd.f32 %v776_v33, %v608_v42  ;;  %v935_v33 = vld [vmem:[%s2647_s3 + $0x1b0] sm:$0xff] }
 0x152   :  { %v998_v21 = vadd.f32 %v934_v36, %v854_v23 }
 0x153   :  { %v967_v26 = vadd.f32 %v903_v24, %v777_v17  ;;  %v786_v54 = vpop.f32.mrf.mxu1 }
 0x154   :  { %v1062_v27 = vmax.f32 %v998_v21, 0.0 }
 0x155   :  { %v1031_v28 = vmax.f32 %v967_v26, 0.0  ;;  %v687_v31 = vpop.f32.mrf.mxu2 }
 0x156   :  { %1126 = vst.msk [vmem:[%s2648_s4 + $0x1a8] sm:$0xff] %vm446_vm0, %v1062_v27  ;;  %v688_v30 = vadd.f32 %v1851_v61, %v687_v31  ;;  %v609_v2 = vpop.f32.mrf.mxu0 }
 0x157   :  { %1095 = vst.msk [vmem:[%s2648_s4 + $0xb0] sm:$0xff] %vm446_vm0, %v1031_v28  ;;  %v610_v34 = vadd.f32 %v1851_v61, %v609_v2  ;;  %v868_v28 = vpop.f32.mrf.mxu3 }
 0x158   :  { %v857_v35 = vadd.f32 %v856_v1, %v688_v30  ;;  %v906_v1 = vld [vmem:[%s2647_s3 + $0xc8] sm:$0xff]  ;;  %v908_v30 = vld [vmem:[%s2647_s3 + $0xd8] sm:$0xff] }
 0x159   :  { %v779_v38 = vadd.f32 %v778_v45, %v610_v34  ;;  %v936_v45 = vld [vmem:[%s2647_s3 + $0x1b8] sm:$0xff] }
 0x15a   :  { %v999_v6 = vadd.f32 %v935_v33, %v857_v35 }
 0x15b   :  { %v968_v40 = vadd.f32 %v904_v37, %v779_v38  ;;  %v788_v43 = vpop.f32.mrf.mxu1 }
 0x15c   :  { %v1063_v51 = vmax.f32 %v999_v6, 0.0 }
 0x15d   :  { %v1032_v5 = vmax.f32 %v968_v40, 0.0  ;;  %v689_v60 = vpop.f32.mrf.mxu2 }
 0x15e   :  { %1127 = vst.msk [vmem:[%s2648_s4 + $0x1b0] sm:$0xff] %vm446_vm0, %v1063_v51  ;;  %v690_v11 = vadd.f32 %v1851_v61, %v689_v60  ;;  %v612_v47 = vpop.f32.mrf.mxu0  ;;  %v909_v60 = vld [vmem:[%s2647_s3 + $0xe0] sm:$0xff] }
 0x15f   :  { %1096 = vst.msk [vmem:[%s2648_s4 + $0xb8] sm:$0xff] %vm446_vm0, %v1032_v5  ;;  %v613_v49 = vadd.f32 %v1851_v61, %v612_v47  ;;  %v871_v47 = vpop.f32.mrf.mxu3 }
 0x160   :  { %v859_v50 = vadd.f32 %v858_v25, %v690_v11 }
 0x161   :  { %v782_v22 = vadd.f32 %v781_v62, %v613_v49  ;;  %v937_v62 = vld [vmem:[%s2647_s3 + $0x1c0] sm:$0xff] }
 0x162   :  { %v1000_v53 = vadd.f32 %v936_v45, %v859_v50  ;;  %v633_v45 = vadd.f32 %v2517_v15, %v1874_v13 }
 0x163   :  { %v969_v52 = vadd.f32 %v905_v48, %v782_v22  ;;  %v791_v55 = vpop.f32.mrf.mxu1  ;;  %v913_v22 = vld [vmem:[%s2647_s3 + $0x100] sm:$0xff] }
 0x164   :  { %v1064_v57 = vmax.f32 %v1000_v53, 0.0 }
 0x165   :  { %v1033_v32 = vmax.f32 %v969_v52, 0.0  ;;  %v692_v59 = vpop.f32.mrf.mxu2 }
 0x166   :  { %1128 = vst.msk [vmem:[%s2648_s4 + $0x1b8] sm:$0xff] %vm446_vm0, %v1064_v57  ;;  %v693_v44 = vadd.f32 %v1851_v61, %v692_v59  ;;  %v614_v63 = vpop.f32.mrf.mxu0  ;;  %v941_v59 = vld [vmem:[%s2647_s3 + $0x1e0] sm:$0xff] }
 0x167   :  { %1097 = vst.msk [vmem:[%s2648_s4 + $0xc0] sm:$0xff] %vm446_vm0, %v1033_v32  ;;  %v615_v14 = vadd.f32 %v1851_v61, %v614_v63 }
 0x168   :  { %v862_v0 = vadd.f32 %v861_v39, %v693_v44 }
 0x169   :  { %v784_v4 = vadd.f32 %v783_v10, %v615_v14  ;;  %v938_v10 = vld [vmem:[%s2647_s3 + $0x1c8] sm:$0xff] }
 0x16a   :  { %v1001_v41 = vadd.f32 %v937_v62, %v862_v0  ;;  %v910_v14 = vld [vmem:[%s2647_s3 + $0xe8] sm:$0xff] }
 0x16b   :  { %v970_v16 = vadd.f32 %v906_v1, %v784_v4  ;;  %v2500_v9 = vpop.f32.mrf.mxu1  ;;  %v635_v1 = vadd.f32 %v2517_v15, %v1908_v29 }
 0x16c   :  { %v1065_v46 = vmax.f32 %v1001_v41, 0.0 }
 0x16d   :  { %v1034_v7 = vmax.f32 %v970_v16, 0.0  ;;  %v694_v58 = vpop.f32.mrf.mxu2  ;;  %v873_v16 = vpop.f32.mrf.mxu3 }
 0x16e   :  { %1129 = vst.msk [vmem:[%s2648_s4 + $0x1c0] sm:$0xff] %vm446_vm0, %v1065_v46  ;;  %v695_v8 = vadd.f32 %v1851_v61, %v694_v58  ;;  %v617_v12 = vpop.f32.mrf.mxu0  ;;  %v907_v61 = vld [vmem:[%s2647_s3 + $0xd0] sm:$0xff] }
 0x16f   :  { %1098 = vst.msk [vmem:[%s2648_s4 + $0xc8] sm:$0xff] %vm446_vm0, %v1034_v7  ;;  %v618_v18 = vadd.f32 %v2517_v15, %v617_v12  ;;  %v914_v7 = vld [vmem:[%s2647_s3 + $0x108] sm:$0xff] }
 0x170   :  { %v864_v19 = vadd.f32 %v863_v56, %v695_v8 }
 0x171   :  { %v787_v20 = vadd.f32 %v786_v54, %v618_v18  ;;  %v939_v54 = vld [vmem:[%s2647_s3 + $0x1d0] sm:$0xff]  ;;  %v942_v18 = vld [vmem:[%s2647_s3 + $0x1e8] sm:$0xff] }
 0x172   :  { %v1002_v36 = vadd.f32 %v938_v10, %v864_v19 }
 0x173   :  { %v971_v42 = vadd.f32 %v907_v61, %v787_v20  ;;  %v2523_v25 = vpop.f32.mrf.mxu1 }
 0x174   :  { %v1066_v23 = vmax.f32 %v1002_v36, 0.0  ;;  %v911_v36 = vld [vmem:[%s2647_s3 + $0xf0] sm:$0xff] }
 0x175   :  { %v1035_v24 = vmax.f32 %v971_v42, 0.0  ;;  %v697_v17 = vpop.f32.mrf.mxu2 }
 0x176   :  { %1130 = vst.msk [vmem:[%s2648_s4 + $0x1c8] sm:$0xff] %vm446_vm0, %v1066_v23  ;;  %v698_v21 = vadd.f32 %v2517_v15, %v697_v17  ;;  %v619_v26 = vpop.f32.mrf.mxu0 }
 0x177   :  { %1099 = vst.msk [vmem:[%s2648_s4 + $0xd0] sm:$0xff] %vm446_vm0, %v1035_v24  ;;  %v620_v27 = vadd.f32 %v2517_v15, %v619_v26  ;;  %v876_v26 = vpop.f32.mrf.mxu3 }
 0x178   :  { %v867_v31 = vadd.f32 %v866_v3, %v698_v21 }
 0x179   :  { %v789_v2 = vadd.f32 %v788_v43, %v620_v27  ;;  %v940_v43 = vld [vmem:[%s2647_s3 + $0x1d8] sm:$0xff] }
 0x17a   :  { %v1003_v33 = vadd.f32 %v939_v54, %v867_v31 }
 0x17b   :  { %v972_v34 = vadd.f32 %v908_v30, %v789_v2  ;;  %v2541_v35 = vpop.f32.mrf.mxu1  ;;  %v912_v2 = vld [vmem:[%s2647_s3 + $0xf8] sm:$0xff] }
 0x17c   :  { %v1067_v37 = vmax.f32 %v1003_v33, 0.0 }
 0x17d   :  { %v1036_v38 = vmax.f32 %v972_v34, 0.0  ;;  %v699_v39 = vpop.f32.mrf.mxu2 }
 0x17e   :  { %1131 = vst.msk [vmem:[%s2648_s4 + $0x1d0] sm:$0xff] %vm446_vm0, %v1067_v37  ;;  %v700_v6 = vadd.f32 %v2517_v15, %v699_v39  ;;  %v622_v40 = vpop.f32.mrf.mxu0 }
 0x17f   :  { %1100 = vst.msk [vmem:[%s2648_s4 + $0xd8] sm:$0xff] %vm446_vm0, %v1036_v38  ;;  %v623_v51 = vadd.f32 %v2517_v15, %v622_v40 }
 0x180   :  { %v869_v5 = vadd.f32 %v868_v28, %v700_v6 }
 0x181   :  { %v792_v11 = vadd.f32 %v791_v55, %v623_v51 }
 0x182   :  { %v1004_v49 = vadd.f32 %v940_v43, %v869_v5  ;;  %v878_v43 = vpop.f32.mrf.mxu3 }
 0x183   :  { %v973_v50 = vadd.f32 %v909_v60, %v792_v11  ;;  %v801_v48 = vpop.f32.mrf.mxu1 }
 0x184   :  { %v1068_v53 = vmax.f32 %v1004_v49, 0.0  ;;  %v802_v52 = vadd.f32 %v801_v48, %v633_v45 }
 0x185   :  { %v1037_v56 = vmax.f32 %v973_v50, 0.0  ;;  %v702_v57 = vpop.f32.mrf.mxu2 }
 0x186   :  { %1132 = vst.msk [vmem:[%s2648_s4 + $0x1d8] sm:$0xff] %vm446_vm0, %v1068_v53  ;;  %v977_v55 = vadd.f32 %v913_v22, %v802_v52  ;;  %v703_v32 = vadd.f32 %v2517_v15, %v702_v57  ;;  %v624_v13 = vpop.f32.mrf.mxu0 }
 0x187   :  { %1101 = vst.msk [vmem:[%s2648_s4 + $0xe0] sm:$0xff] %vm446_vm0, %v1037_v56  ;;  %v625_v44 = vadd.f32 %v2517_v15, %v624_v13 }
 0x188   :  { %v1041_v63 = vmax.f32 %v977_v55, 0.0  ;;  %v872_v62 = vadd.f32 %v871_v47, %v703_v32 }
 0x189   :  { %v794_v0 = vadd.f32 %v2500_v9, %v625_v44 }
 0x18a   :  { %1105 = vst.msk [vmem:[%s2648_s4 + $0x100] sm:$0xff] %vm446_vm0, %v1041_v63  ;;  %v1005_v4 = vadd.f32 %v941_v59, %v872_v62 }
 0x18b   :  { %v974_v41 = vadd.f32 %v910_v14, %v794_v0  ;;  %v803_v46 = vpop.f32.mrf.mxu1 }
 0x18c   :  { %v1069_v58 = vmax.f32 %v1005_v4, 0.0  ;;  %v804_v3 = vadd.f32 %v803_v46, %v635_v1 }
 0x18d   :  { %v1038_v8 = vmax.f32 %v974_v41, 0.0  ;;  %v704_v9 = vpop.f32.mrf.mxu2 }
 0x18e   :  { %1133 = vst.msk [vmem:[%s2648_s4 + $0x1e0] sm:$0xff] %vm446_vm0, %v1069_v58  ;;  %v978_v29 = vadd.f32 %v914_v7, %v804_v3  ;;  %v705_v12 = vadd.f32 %v2517_v15, %v704_v9  ;;  %v627_v10 = vpop.f32.mrf.mxu0 }
 0x18f   :  { %1102 = vst.msk [vmem:[%s2648_s4 + $0xe8] sm:$0xff] %vm446_vm0, %v1038_v8  ;;  %v628_v19 = vadd.f32 %v2517_v15, %v627_v10 }
 0x190   :  { %v1042_v61 = vmax.f32 %v978_v29, 0.0  ;;  %v874_v20 = vadd.f32 %v873_v16, %v705_v12 }
 0x191   :  { %v797_v42 = vadd.f32 %v2523_v25, %v628_v19  ;;  %v943_v25 = vld [vmem:[%s2647_s3 + $0x1f0] sm:$0xff] }
 0x192   :  { %1106 = vst.msk [vmem:[%s2648_s4 + $0x108] sm:$0xff] %vm446_vm0, %v1042_v61  ;;  %v1006_v23 = vadd.f32 %v942_v18, %v874_v20 }
 0x193   :  { %v975_v24 = vadd.f32 %v911_v36, %v797_v42 }
 0x194   :  { %v1070_v17 = vmax.f32 %v1006_v23, 0.0 }
 0x195   :  { %v1039_v21 = vmax.f32 %v975_v24, 0.0  ;;  %v707_v54 = vpop.f32.mrf.mxu2 }
 0x196   :  { %1134 = vst.msk [vmem:[%s2648_s4 + $0x1e8] sm:$0xff] %vm446_vm0, %v1070_v17  ;;  %v708_v27 = vadd.f32 %v2517_v15, %v707_v54  ;;  %v629_v28 = vpop.f32.mrf.mxu0 }
 0x197   :  { %1103 = vst.msk [vmem:[%s2648_s4 + $0xf0] sm:$0xff] %vm446_vm0, %v1039_v21  ;;  %v630_v31 = vadd.f32 %v2517_v15, %v629_v28 }
 0x198   :  { %v877_v30 = vadd.f32 %v876_v26, %v708_v27 }
 0x199   :  { %v799_v33 = vadd.f32 %v2541_v35, %v630_v31  ;;  %v944_v35 = vld [vmem:[%s2647_s3 + $0x1f8] sm:$0xff] }
 0x19a   :  { %v1007_v34 = vadd.f32 %v943_v25, %v877_v30 }
 0x19b   :  { %v976_v37 = vadd.f32 %v912_v2, %v799_v33 }
 0x19c   :  { %v1071_v38 = vmax.f32 %v1007_v34, 0.0 }
 0x19d   :  { %v1040_v39 = vmax.f32 %v976_v37, 0.0  ;;  %v709_v6 = vpop.f32.mrf.mxu2 }
 0x19e   :  { %1135 = vst.msk [vmem:[%s2648_s4 + $0x1f0] sm:$0xff] %vm446_vm0, %v1071_v38  ;;  %v710_v40 = vadd.f32 %v2517_v15, %v709_v6 }
 0x19f   :  { %1104 = vst.msk [vmem:[%s2648_s4 + $0xf8] sm:$0xff] %vm446_vm0, %v1040_v39 }
 0x1a0   :  { %v879_v51 = vadd.f32 %v878_v43, %v710_v40 }
 0x1a2   :  { %v1008_v5 = vadd.f32 %v944_v35, %v879_v51 }
 0x1a4   :  { %v1072_v60 = vmax.f32 %v1008_v5, 0.0 }
 0x1a6   :  { %1136 = vst.msk [vmem:[%s2648_s4 + $0x1f8] sm:$0xff] %vm446_vm0, %v1072_v60 }

// kernel: bbn_resnet_forward.12
= control target key start
LH: loop header
LB: loop body
LE: loop exit
PB: predicated region body
PF: predicated region fallthrough
CT: control target
= control target key end

     0   :  { %vm179_vm0 = vcmask 130048   ;;  %vm318_vm1 = vcmask 261120   ;;  %s718_s1 = inlined_call_operand.vmem [shape: bf16[144,32], index: 1, kind: input, shape index: {}]   ;;  %s719_s0 = inlined_call_operand.vmem [shape: bf16[128,144], index: 0, kind: input, shape index: {}]   ;;  %s720_s2 = inlined_call_operand.vmem [shape: f32[1,32], index: 2, kind: input, shape index: {}]   ;;  %s721_s3 = inlined_call_operand.vmem [shape: f32[128,32], index: 3, kind: output, shape index: {}]  }
   0x1   :  { %v470_v0 = vld [vmem:[%s718_s1 + $0x38] sm:$0xff]  ;;  %v471_v1 = vld [vmem:[%s718_s1 + $0x40] sm:$0xff]  ;;  %v343_v3 = vld [vmem:[%s719_s0 + $0x8] sm:$0xf0] }
   0x2   :  { %v447_v2 = vld [vmem:[%s719_s0 + $0x4] sm:$0xf]  ;;  %204 = vmatpush.bf16.msra.mxu0 %v470_v0  ;;  %472 = vmatpush.bf16.msra.mxu2 %v470_v0  ;;  %v469_v5 = vld [vmem:[%s718_s1 + $0x30] sm:$0xff]  ;;  %v468_v6 = vld [vmem:[%s718_s1 + $0x28] sm:$0xff] }
   0x3   :  { %v346_v4 = vor.u32 %v447_v2, %v343_v3  ;;  %260 = vmatpush.bf16.msra.mxu1 %v471_v1  ;;  %480 = vmatpush.bf16.msra.mxu3 %v471_v1  ;;  %v457_v7 = vld [vmem:[%s719_s0 + $0x54] sm:$0xf]  ;;  %v383_v8 = vld [vmem:[%s719_s0 + $0x58] sm:$0xf0]  ;;  %v467_v10 = vld [vmem:[%s718_s1 + $0x20] sm:$0xff] }
   0x4   :  { %v386_v9 = vor.u32 %v457_v7, %v383_v8  ;;  %v466_v11 = vld [vmem:[%s718_s1 + $0x18] sm:$0xff]  ;;  %v449_v12 = vld [vmem:[%s719_s0 + $0x14] sm:$0xf]  ;;  %v464_v16 = vld [vmem:[%s718_s1 + $0x8] sm:$0xff] }
   0x5   :  { %v351_v13 = vld [vmem:[%s719_s0 + $0x18] sm:$0xf0]  ;;  %v465_v15 = vld [vmem:[%s718_s1 + $0x10] sm:$0xff]  ;;  %v459_v17 = vld [vmem:[%s719_s0 + $0x64] sm:$0xf] }
   0x6   :  { %439 = vmatmul.msk.bf16.vlgmr.msra.gmra.mxu1 %vm179_vm0, %v346_v4  ;;  %205 = vmatpush.bf16.msra.mxu0 %v469_v5  ;;  %v354_v14 = vor.u32 %v449_v12, %v351_v13  ;;  %v391_v18 = vld [vmem:[%s719_s0 + $0x68] sm:$0xf0]  ;;  %v463_v20 = vld [vmem:[%s718_s1] sm:$0xff]  ;;  %v448_v22 = vld [vmem:[%s719_s0 + $0x4] sm:$0xf0] }
   0x7   :  { %473 = vmatpush.bf16.msra.mxu2 %v469_v5  ;;  %444 = vmatmul.msk.bf16.vlgmr.msra.gmra.mxu3 %vm179_vm0, %v386_v9  ;;  %v394_v19 = vor.u32 %v459_v17, %v391_v18  ;;  %v341_v21 = vld [vmem:[%s719_s0] sm:$0xf]  ;;  %v456_v24 = vld [vmem:[%s719_s0 + $0x44] sm:$0xf0]  ;;  %v451_v27 = vld [vmem:[%s719_s0 + $0x24] sm:$0xf] }
   0x8   :  { %v373_v23 = vld [vmem:[%s719_s0 + $0x40] sm:$0xf]  ;;  %v342_v25 = vor.u32 %v448_v22, %v341_v21  ;;  %v359_v28 = vld [vmem:[%s719_s0 + $0x28] sm:$0xf0]  ;;  %v461_v30 = vld [vmem:[%s719_s0 + $0x74] sm:$0xf] }
   0x9   :  { %v374_v26 = vor.u32 %v456_v24, %v373_v23  ;;  %v362_v29 = vor.u32 %v451_v27, %v359_v28  ;;  %v399_v31 = vld [vmem:[%s719_s0 + $0x78] sm:$0xf0]  ;;  %v349_v33 = vld [vmem:[%s719_s0 + $0x10] sm:$0xf]  ;;  %v450_v34 = vld [vmem:[%s719_s0 + $0x14] sm:$0xf0] }
   0xa   :  { %206 = vmatpush.bf16.msra.mxu0 %v468_v6  ;;  %v402_v32 = vor.u32 %v461_v30, %v399_v31  ;;  %v381_v35 = vld [vmem:[%s719_s0 + $0x50] sm:$0xf]  ;;  %v458_v36 = vld [vmem:[%s719_s0 + $0x54] sm:$0xf0]  ;;  %v350_v37 = vor.u32 %v450_v34, %v349_v33  ;;  %v453_v39 = vld [vmem:[%s719_s0 + $0x34] sm:$0xf] }
   0xb   :  { %474 = vmatpush.bf16.msra.mxu2 %v468_v6  ;;  %v382_v38 = vor.u32 %v458_v36, %v381_v35  ;;  %v367_v40 = vld [vmem:[%s719_s0 + $0x38] sm:$0xf0]  ;;  %v357_v42 = vld [vmem:[%s719_s0 + $0x20] sm:$0xf]  ;;  %v452_v43 = vld [vmem:[%s719_s0 + $0x24] sm:$0xf0] }
   0xc   :  { %v370_v41 = vor.u32 %v453_v39, %v367_v40  ;;  %v389_v44 = vld [vmem:[%s719_s0 + $0x60] sm:$0xf]  ;;  %v460_v45 = vld [vmem:[%s719_s0 + $0x64] sm:$0xf0]  ;;  %v358_v46 = vor.u32 %v452_v43, %v357_v42  ;;  %v455_v48 = vld [vmem:[%s719_s0 + $0x44] sm:$0xf] }
   0xd   :  { %v390_v47 = vor.u32 %v460_v45, %v389_v44  ;;  %v375_v49 = vld [vmem:[%s719_s0 + $0x48] sm:$0xf0]  ;;  %v365_v51 = vld [vmem:[%s719_s0 + $0x30] sm:$0xf]  ;;  %v454_v52 = vld [vmem:[%s719_s0 + $0x34] sm:$0xf0] }
   0xe   :  { %207 = vmatpush.bf16.msra.mxu0 %v467_v10  ;;  %v378_v50 = vor.u32 %v455_v48, %v375_v49  ;;  %v397_v53 = vld [vmem:[%s719_s0 + $0x70] sm:$0xf]  ;;  %v462_v54 = vld [vmem:[%s719_s0 + $0x74] sm:$0xf0]  ;;  %v366_v55 = vor.u32 %v454_v52, %v365_v51  ;;  %v636_v61 = vld [vmem:[%s720_s2] ss:$0 sm:$0xff] }
   0xf   :  { %475 = vmatpush.bf16.msra.mxu2 %v467_v10  ;;  %v398_v56 = vor.u32 %v462_v54, %v397_v53 }
  0x12   :  { %208 = vmatpush.bf16.msra.mxu0 %v466_v11 }
  0x13   :  { %476 = vmatpush.bf16.msra.mxu2 %v466_v11 }
  0x16   :  { %440 = vmatmul.msk.bf16.gmra.mxu1 %vm179_vm0, %v354_v14  ;;  %209 = vmatpush.bf16.msra.mxu0 %v465_v15 }
  0x17   :  { %477 = vmatpush.bf16.msra.mxu2 %v465_v15  ;;  %445 = vmatmul.msk.bf16.gmra.mxu3 %vm179_vm0, %v394_v19 }
  0x1a   :  { %210 = vmatpush.bf16.msra.mxu0 %v464_v16 }
  0x1b   :  { %478 = vmatpush.bf16.msra.mxu2 %v464_v16 }
  0x1e   :  { %211 = vmatpush.bf16.msra.mxu0 %v463_v20 }
  0x1f   :  { %479 = vmatpush.bf16.msra.mxu2 %v463_v20 }
  0x21   :  { %212 = vmatmul.bf16.vlgmr.msra.gmra.mxu0 %v342_v25 }
  0x22   :  { %232 = vmatmul.bf16.vlgmr.msra.gmra.mxu2 %v374_v26 }
  0x26   :  { %441 = vmatmul.msk.bf16.gmra.mxu1 %vm179_vm0, %v362_v29 }
  0x27   :  { %446 = vmatmul.msk.bf16.gmra.mxu3 %vm179_vm0, %v402_v32 }
  0x31   :  { %217 = vmatmul.bf16.gmra.mxu0 %v350_v37 }
  0x32   :  { %237 = vmatmul.bf16.gmra.mxu2 %v382_v38 }
  0x36   :  { %442 = vmatmul.msk.bf16.gmra.mxu1 %vm179_vm0, %v370_v41 }
  0x41   :  { %222 = vmatmul.bf16.gmra.mxu0 %v358_v46 }
  0x42   :  { %242 = vmatmul.bf16.gmra.mxu2 %v390_v47 }
  0x46   :  { %443 = vmatmul.msk.bf16.gmra.mxu1 %vm179_vm0, %v378_v50 }
  0x51   :  { %227 = vmatmul.bf16.gmra.mxu0 %v366_v55 }
  0x52   :  { %247 = vmatmul.bf16.gmra.mxu2 %v398_v56 }
  0x83   :  { %v262_v57 = vpop.f32.mrf.mxu1 }
  0x8a   :  { %v287_v10 = vpop.f32.mrf.mxu3 }
  0x8b   :  { %v264_v58 = vpop.f32.mrf.mxu1 }
  0x92   :  { %v289_v20 = vpop.f32.mrf.mxu3 }
  0x93   :  { %v267_v59 = vpop.f32.mrf.mxu1 }
  0x9a   :  { %v292_v32 = vpop.f32.mrf.mxu3 }
  0x9b   :  { %v269_v60 = vpop.f32.mrf.mxu1 }
  0x9e   :  { %v213_v62 = vpop.f32.mrf.mxu0 }
  0x9f   :  { %v214_v63 = vadd.f32 %v636_v61, %v213_v62 }
  0xa1   :  { %v263_v0 = vadd.f32 %v262_v57, %v214_v63 }
  0xa2   :  { %v294_v48 = vpop.f32.mrf.mxu3 }
  0xa3   :  { %v302_v1 = vmax.f32 %v263_v0, 0.0  ;;  %v272_v2 = vpop.f32.mrf.mxu1 }
  0xa5   :  { %319 = vst.msk [vmem:[%s721_s3] sm:$0xff] %vm318_vm1, %v302_v1  ;;  %v233_v3 = vpop.f32.mrf.mxu2 }
  0xa6   :  { %v215_v4 = vpop.f32.mrf.mxu0  ;;  %v234_v33 = vadd.f32 %v636_v61, %v233_v3 }
  0xa7   :  { %v216_v5 = vadd.f32 %v636_v61, %v215_v4 }
  0xa9   :  { %v265_v6 = vadd.f32 %v264_v58, %v216_v5 }
  0xab   :  { %v303_v7 = vmax.f32 %v265_v6, 0.0  ;;  %v274_v8 = vpop.f32.mrf.mxu1 }
  0xad   :  { %320 = vst.msk [vmem:[%s721_s3 + $0x8] sm:$0xff] %vm318_vm1, %v303_v7  ;;  %v235_v9 = vpop.f32.mrf.mxu2 }
  0xae   :  { %v218_v11 = vpop.f32.mrf.mxu0  ;;  %v236_v45 = vadd.f32 %v636_v61, %v235_v9 }
  0xaf   :  { %v219_v12 = vadd.f32 %v636_v61, %v218_v11 }
  0xb1   :  { %v268_v13 = vadd.f32 %v267_v59, %v219_v12 }
  0xb3   :  { %v304_v14 = vmax.f32 %v268_v13, 0.0  ;;  %v277_v15 = vpop.f32.mrf.mxu1 }
  0xb5   :  { %321 = vst.msk [vmem:[%s721_s3 + $0x10] sm:$0xff] %vm318_vm1, %v304_v14  ;;  %v238_v16 = vpop.f32.mrf.mxu2 }
  0xb6   :  { %v239_v17 = vadd.f32 %v636_v61, %v238_v16  ;;  %v220_v18 = vpop.f32.mrf.mxu0 }
  0xb7   :  { %v221_v19 = vadd.f32 %v636_v61, %v220_v18 }
  0xb8   :  { %v288_v21 = vadd.f32 %v287_v10, %v239_v17 }
  0xb9   :  { %v270_v22 = vadd.f32 %v269_v60, %v221_v19  ;;  %v297_v60 = vpop.f32.mrf.mxu3 }
  0xba   :  { %v312_v23 = vmax.f32 %v288_v21, 0.0 }
  0xbb   :  { %v305_v24 = vmax.f32 %v270_v22, 0.0  ;;  %v279_v25 = vpop.f32.mrf.mxu1 }
  0xbc   :  { %329 = vst.msk [vmem:[%s721_s3 + $0x50] sm:$0xff] %vm318_vm1, %v312_v23 }
  0xbd   :  { %322 = vst.msk [vmem:[%s721_s3 + $0x18] sm:$0xff] %vm318_vm1, %v305_v24  ;;  %v240_v26 = vpop.f32.mrf.mxu2 }
  0xbe   :  { %v241_v27 = vadd.f32 %v636_v61, %v240_v26  ;;  %v223_v28 = vpop.f32.mrf.mxu0 }
  0xbf   :  { %v224_v29 = vadd.f32 %v636_v61, %v223_v28 }
  0xc0   :  { %v290_v30 = vadd.f32 %v289_v20, %v241_v27 }
  0xc1   :  { %v273_v31 = vadd.f32 %v272_v2, %v224_v29 }
  0xc2   :  { %v313_v34 = vmax.f32 %v290_v30, 0.0 }
  0xc3   :  { %v306_v35 = vmax.f32 %v273_v31, 0.0  ;;  %v282_v36 = vpop.f32.mrf.mxu1 }
  0xc4   :  { %330 = vst.msk [vmem:[%s721_s3 + $0x58] sm:$0xff] %vm318_vm1, %v313_v34  ;;  %v283_v37 = vadd.f32 %v282_v36, %v234_v33 }
  0xc5   :  { %323 = vst.msk [vmem:[%s721_s3 + $0x20] sm:$0xff] %vm318_vm1, %v306_v35  ;;  %v243_v38 = vpop.f32.mrf.mxu2 }
  0xc6   :  { %v310_v39 = vmax.f32 %v283_v37, 0.0  ;;  %v244_v40 = vadd.f32 %v636_v61, %v243_v38  ;;  %v225_v41 = vpop.f32.mrf.mxu0 }
  0xc7   :  { %v226_v42 = vadd.f32 %v636_v61, %v225_v41 }
  0xc8   :  { %327 = vst.msk [vmem:[%s721_s3 + $0x40] sm:$0xff] %vm318_vm1, %v310_v39  ;;  %v293_v43 = vadd.f32 %v292_v32, %v244_v40 }
  0xc9   :  { %v275_v44 = vadd.f32 %v274_v8, %v226_v42  ;;  %v299_v8 = vpop.f32.mrf.mxu3 }
  0xca   :  { %v314_v46 = vmax.f32 %v293_v43, 0.0 }
  0xcb   :  { %v307_v47 = vmax.f32 %v275_v44, 0.0  ;;  %v284_v49 = vpop.f32.mrf.mxu1 }
  0xcc   :  { %331 = vst.msk [vmem:[%s721_s3 + $0x60] sm:$0xff] %vm318_vm1, %v314_v46  ;;  %v285_v50 = vadd.f32 %v284_v49, %v236_v45 }
  0xcd   :  { %324 = vst.msk [vmem:[%s721_s3 + $0x28] sm:$0xff] %vm318_vm1, %v307_v47  ;;  %v245_v51 = vpop.f32.mrf.mxu2 }
  0xce   :  { %v311_v52 = vmax.f32 %v285_v50, 0.0  ;;  %v246_v53 = vadd.f32 %v636_v61, %v245_v51  ;;  %v228_v54 = vpop.f32.mrf.mxu0 }
  0xcf   :  { %v229_v55 = vadd.f32 %v636_v61, %v228_v54 }
  0xd0   :  { %328 = vst.msk [vmem:[%s721_s3 + $0x48] sm:$0xff] %vm318_vm1, %v311_v52  ;;  %v295_v56 = vadd.f32 %v294_v48, %v246_v53 }
  0xd1   :  { %v278_v57 = vadd.f32 %v277_v15, %v229_v55 }
  0xd2   :  { %v315_v58 = vmax.f32 %v295_v56, 0.0 }
  0xd3   :  { %v308_v59 = vmax.f32 %v278_v57, 0.0 }
  0xd4   :  { %332 = vst.msk [vmem:[%s721_s3 + $0x68] sm:$0xff] %vm318_vm1, %v315_v58 }
  0xd5   :  { %325 = vst.msk [vmem:[%s721_s3 + $0x30] sm:$0xff] %vm318_vm1, %v308_v59  ;;  %v248_v62 = vpop.f32.mrf.mxu2 }
  0xd6   :  { %v249_v63 = vadd.f32 %v636_v61, %v248_v62  ;;  %v230_v0 = vpop.f32.mrf.mxu0 }
  0xd7   :  { %v231_v1 = vadd.f32 %v636_v61, %v230_v0 }
  0xd8   :  { %v298_v2 = vadd.f32 %v297_v60, %v249_v63 }
  0xd9   :  { %v280_v3 = vadd.f32 %v279_v25, %v231_v1 }
  0xda   :  { %v316_v4 = vmax.f32 %v298_v2, 0.0 }
  0xdb   :  { %v309_v5 = vmax.f32 %v280_v3, 0.0 }
  0xdc   :  { %333 = vst.msk [vmem:[%s721_s3 + $0x70] sm:$0xff] %vm318_vm1, %v316_v4 }
  0xdd   :  { %326 = vst.msk [vmem:[%s721_s3 + $0x38] sm:$0xff] %vm318_vm1, %v309_v5  ;;  %v250_v6 = vpop.f32.mrf.mxu2 }
  0xde   :  { %v251_v7 = vadd.f32 %v636_v61, %v250_v6 }
  0xe0   :  { %v300_v9 = vadd.f32 %v299_v8, %v251_v7 }
  0xe2   :  { %v317_v10 = vmax.f32 %v300_v9, 0.0 }
  0xe4   :  { %334 = vst.msk [vmem:[%s721_s3 + $0x78] sm:$0xff] %vm318_vm1, %v317_v10 }

// kernel: bbn_resnet_forward.13
= control target key start
LH: loop header
LB: loop body
LE: loop exit
PB: predicated region body
PF: predicated region fallthrough
CT: control target
= control target key end

     0   :  { %vm318_vm0 = vcmask 261120   ;;  %s1166_s1 = inlined_call_operand.vmem [shape: bf16[288,32], index: 1, kind: input, shape index: {}]   ;;  %s1167_s0 = inlined_call_operand.vmem [shape: bf16[128,288], index: 0, kind: input, shape index: {}]   ;;  %s1168_s2 = inlined_call_operand.vmem [shape: f32[1,32], index: 2, kind: input, shape index: {}]   ;;  %s1169_s3 = inlined_call_operand.vmem [shape: f32[128,32], index: 3, kind: input, shape index: {}]   ;;  %s1170_s4 = inlined_call_operand.vmem [shape: f32[128,32], index: 4, kind: output, shape index: {}]  }
   0x1   :  { %v765_v0 = vld [vmem:[%s1166_s1 + $0x38] sm:$0xff]  ;;  %v775_v1 = vld [vmem:[%s1166_s1 + $0x88] sm:$0xff]  ;;  %v764_v3 = vld [vmem:[%s1166_s1 + $0x30] sm:$0xff] }
   0x2   :  { %v773_v2 = vld [vmem:[%s1166_s1 + $0x78] sm:$0xff]  ;;  %343 = vmatpush.bf16.msra.mxu0 %v765_v0  ;;  %776 = vmatpush.bf16.msra.mxu3 %v765_v0  ;;  %v774_v4 = vld [vmem:[%s1166_s1 + $0x80] sm:$0xff]  ;;  %v772_v5 = vld [vmem:[%s1166_s1 + $0x70] sm:$0xff] }
   0x3   :  { %447 = vmatpush.bf16.msra.mxu2 %v775_v1  ;;  %392 = vmatpush.bf16.msra.mxu1 %v773_v2  ;;  %v568_v6 = vld [vmem:[%s1167_s0 + $0x8] sm:$0xf]  ;;  %v736_v7 = vld [vmem:[%s1167_s0 + $0x10] sm:$0xf0]  ;;  %v762_v11 = vld [vmem:[%s1166_s1 + $0x20] sm:$0xff] }
   0x4   :  { %v569_v8 = vor.u32 %v736_v7, %v568_v6  ;;  %v763_v9 = vld [vmem:[%s1166_s1 + $0x28] sm:$0xff]  ;;  %v770_v12 = vld [vmem:[%s1166_s1 + $0x60] sm:$0xff]  ;;  %v761_v13 = vld [vmem:[%s1166_s1 + $0x18] sm:$0xff] }
   0x5   :  { %v771_v10 = vld [vmem:[%s1166_s1 + $0x68] sm:$0xff]  ;;  %v769_v14 = vld [vmem:[%s1166_s1 + $0x58] sm:$0xff]  ;;  %v760_v15 = vld [vmem:[%s1166_s1 + $0x10] sm:$0xff] }
   0x6   :  { %344 = vmatpush.bf16.msra.mxu0 %v764_v3  ;;  %777 = vmatpush.bf16.msra.mxu3 %v764_v3  ;;  %v768_v16 = vld [vmem:[%s1166_s1 + $0x50] sm:$0xff]  ;;  %v580_v17 = vld [vmem:[%s1167_s0 + $0x20] sm:$0xf]  ;;  %v739_v18 = vld [vmem:[%s1167_s0 + $0x28] sm:$0xf0] }
   0x7   :  { %448 = vmatpush.bf16.msra.mxu2 %v774_v4  ;;  %393 = vmatpush.bf16.msra.mxu1 %v772_v5  ;;  %v581_v19 = vor.u32 %v739_v18, %v580_v17  ;;  %v759_v20 = vld [vmem:[%s1166_s1 + $0x8] sm:$0xff]  ;;  %v758_v22 = vld [vmem:[%s1166_s1] sm:$0xff]  ;;  %v632_v26 = vld [vmem:[%s1167_s0 + $0x90] sm:$0xf] }
   0x8   :  { %v767_v21 = vld [vmem:[%s1166_s1 + $0x48] sm:$0xff]  ;;  %v766_v23 = vld [vmem:[%s1166_s1 + $0x40] sm:$0xff]  ;;  %v753_v27 = vld [vmem:[%s1167_s0 + $0x98] sm:$0xf0] }
   0x9   :  { %v560_v24 = vld [vmem:[%s1167_s0] sm:$0xf]  ;;  %v735_v25 = vld [vmem:[%s1167_s0 + $0x8] sm:$0xf0]  ;;  %v734_v28 = vld [vmem:[%s1167_s0 + $0x4] sm:$0xf]  ;;  %v633_v31 = vor.u32 %v753_v27, %v632_v26 }
   0xa   :  { %726 = vmatmul.msk.bf16.vlgmr.msra.gmra.mxu2 %vm318_vm0, %v569_v8  ;;  %345 = vmatpush.bf16.msra.mxu0 %v763_v9  ;;  %v562_v29 = vld [vmem:[%s1167_s0 + $0xc] sm:$0xf0]  ;;  %v561_v30 = vor.u32 %v735_v25, %v560_v24  ;;  %v592_v33 = vld [vmem:[%s1167_s0 + $0x38] sm:$0xf]  ;;  %v742_v34 = vld [vmem:[%s1167_s0 + $0x40] sm:$0xf0] }
   0xb   :  { %778 = vmatpush.bf16.msra.mxu3 %v763_v9  ;;  %394 = vmatpush.bf16.msra.mxu1 %v771_v10  ;;  %v565_v32 = vor.u32 %v734_v28, %v562_v29  ;;  %v593_v35 = vor.u32 %v742_v34, %v592_v33  ;;  %v572_v36 = vld [vmem:[%s1167_s0 + $0x18] sm:$0xf]  ;;  %v738_v37 = vld [vmem:[%s1167_s0 + $0x20] sm:$0xf0]  ;;  %v644_v38 = vld [vmem:[%s1167_s0 + $0xa8] sm:$0xf] }
   0xc   :  { %v756_v39 = vld [vmem:[%s1167_s0 + $0xb0] sm:$0xf0]  ;;  %v737_v40 = vld [vmem:[%s1167_s0 + $0x1c] sm:$0xf]  ;;  %v574_v41 = vld [vmem:[%s1167_s0 + $0x24] sm:$0xf0]  ;;  %v573_v42 = vor.u32 %v738_v37, %v572_v36 }
   0xd   :  { %v645_v43 = vor.u32 %v756_v39, %v644_v38  ;;  %v577_v44 = vor.u32 %v737_v40, %v574_v41  ;;  %v604_v45 = vld [vmem:[%s1167_s0 + $0x50] sm:$0xf]  ;;  %v745_v46 = vld [vmem:[%s1167_s0 + $0x58] sm:$0xf0]  ;;  %v752_v50 = vld [vmem:[%s1167_s0 + $0x94] sm:$0xf] }
   0xe   :  { %346 = vmatpush.bf16.msra.mxu0 %v762_v11  ;;  %v605_v47 = vor.u32 %v745_v46, %v604_v45  ;;  %v584_v48 = vld [vmem:[%s1167_s0 + $0x30] sm:$0xf]  ;;  %v741_v49 = vld [vmem:[%s1167_s0 + $0x38] sm:$0xf0]  ;;  %v634_v51 = vld [vmem:[%s1167_s0 + $0x9c] sm:$0xf0] }
   0xf   :  { %779 = vmatpush.bf16.msra.mxu3 %v762_v11  ;;  %395 = vmatpush.bf16.msra.mxu1 %v770_v12  ;;  %v740_v52 = vld [vmem:[%s1167_s0 + $0x34] sm:$0xf]  ;;  %v586_v53 = vld [vmem:[%s1167_s0 + $0x3c] sm:$0xf0]  ;;  %v585_v54 = vor.u32 %v741_v49, %v584_v48  ;;  %v637_v55 = vor.u32 %v752_v50, %v634_v51  ;;  %v616_v57 = vld [vmem:[%s1167_s0 + $0x68] sm:$0xf] }
  0x10   :  { %v589_v56 = vor.u32 %v740_v52, %v586_v53  ;;  %v748_v58 = vld [vmem:[%s1167_s0 + $0x70] sm:$0xf0]  ;;  %v596_v60 = vld [vmem:[%s1167_s0 + $0x48] sm:$0xf]  ;;  %v755_v62 = vld [vmem:[%s1167_s0 + $0xac] sm:$0xf] }
  0x11   :  { %v617_v59 = vor.u32 %v748_v58, %v616_v57  ;;  %v744_v61 = vld [vmem:[%s1167_s0 + $0x50] sm:$0xf0]  ;;  %v646_v63 = vld [vmem:[%s1167_s0 + $0xb4] sm:$0xf0]  ;;  %v743_v0 = vld [vmem:[%s1167_s0 + $0x4c] sm:$0xf] }
  0x12   :  { %347 = vmatpush.bf16.msra.mxu0 %v761_v13  ;;  %v598_v1 = vld [vmem:[%s1167_s0 + $0x54] sm:$0xf0]  ;;  %v649_v3 = vor.u32 %v755_v62, %v646_v63  ;;  %v751_v6 = vld [vmem:[%s1167_s0 + $0x88] sm:$0xf0]  ;;  %v608_v8 = vld [vmem:[%s1167_s0 + $0x60] sm:$0xf] }
  0x13   :  { %780 = vmatpush.bf16.msra.mxu3 %v761_v13  ;;  %396 = vmatpush.bf16.msra.mxu1 %v769_v14  ;;  %v601_v4 = vor.u32 %v743_v0, %v598_v1  ;;  %v747_v9 = vld [vmem:[%s1167_s0 + $0x68] sm:$0xf0]  ;;  %v610_v11 = vld [vmem:[%s1167_s0 + $0x6c] sm:$0xf0]  ;;  %v620_v17 = vld [vmem:[%s1167_s0 + $0x78] sm:$0xf] }
  0x14   :  { %v750_v18 = vld [vmem:[%s1167_s0 + $0x80] sm:$0xf0]  ;;  %v757_v24 = vld [vmem:[%s1167_s0 + $0xb8] sm:$0xf0]  ;;  %v1027_v28 = vld [vmem:[%s1168_s2] ss:$0 sm:$0xff] }
  0x15   :  { %v490_v34 = vld [vmem:[%s1169_s3] sm:$0xff]  ;;  %v492_v52 = vld [vmem:[%s1169_s3 + $0x10] sm:$0xff] }
  0x16   :  { %348 = vmatpush.bf16.msra.mxu0 %v760_v15 }
  0x17   :  { %781 = vmatpush.bf16.msra.mxu3 %v760_v15  ;;  %397 = vmatpush.bf16.msra.mxu1 %v768_v16  ;;  %v754_v15 = vld [vmem:[%s1167_s0 + $0xa0] sm:$0xf0] }
  0x1a   :  { %727 = vmatmul.msk.bf16.gmra.mxu2 %vm318_vm0, %v581_v19  ;;  %349 = vmatpush.bf16.msra.mxu0 %v759_v20  ;;  %v749_v19 = vld [vmem:[%s1167_s0 + $0x7c] sm:$0xf] }
  0x1b   :  { %782 = vmatpush.bf16.msra.mxu3 %v759_v20  ;;  %398 = vmatpush.bf16.msra.mxu1 %v767_v21  ;;  %v622_v20 = vld [vmem:[%s1167_s0 + $0x84] sm:$0xf0] }
  0x1e   :  { %350 = vmatpush.bf16.msra.mxu0 %v758_v22 }
  0x1f   :  { %783 = vmatpush.bf16.msra.mxu3 %v758_v22  ;;  %399 = vmatpush.bf16.msra.mxu1 %v766_v23  ;;  %v625_v22 = vor.u32 %v749_v19, %v622_v20 }
  0x21   :  { %351 = vmatmul.bf16.vlgmr.msra.gmra.mxu0 %v561_v30 }
  0x22   :  { %381 = vmatmul.bf16.vlgmr.msra.gmra.mxu3 %v633_v31  ;;  %400 = vmatmul.bf16.vlgmr.msra.gmra.mxu1 %v565_v32 }
  0x23   :  { %784 = vmatpush.bf16.msrb.mxu3 %v773_v2  ;;  %v597_v2 = vor.u32 %v744_v61, %v596_v60  ;;  %v493_v61 = vld [vmem:[%s1169_s3 + $0x18] sm:$0xff] }
  0x27   :  { %785 = vmatpush.bf16.msrb.mxu3 %v772_v5  ;;  %v628_v5 = vld [vmem:[%s1167_s0 + $0x80] sm:$0xf] }
  0x28   :  { %v629_v7 = vor.u32 %v751_v6, %v628_v5 }
  0x2a   :  { %728 = vmatmul.msk.bf16.gmra.mxu2 %vm318_vm0, %v593_v35 }
  0x2b   :  { %786 = vmatpush.bf16.msrb.mxu3 %v771_v10  ;;  %v746_v10 = vld [vmem:[%s1167_s0 + $0x64] sm:$0xf] }
  0x2c   :  { %v613_v13 = vor.u32 %v746_v10, %v610_v11 }
  0x2f   :  { %787 = vmatpush.bf16.msrb.mxu3 %v770_v12  ;;  %v609_v12 = vor.u32 %v747_v9, %v608_v8 }
  0x31   :  { %356 = vmatmul.bf16.gmra.mxu0 %v573_v42 }
  0x32   :  { %386 = vmatmul.bf16.gmra.mxu3 %v645_v43  ;;  %405 = vmatmul.bf16.gmra.mxu1 %v577_v44  ;;  %v491_v43 = vld [vmem:[%s1169_s3 + $0x8] sm:$0xff] }
  0x33   :  { %788 = vmatpush.bf16.msrb.mxu3 %v769_v14  ;;  %v640_v14 = vld [vmem:[%s1167_s0 + $0x98] sm:$0xf] }
  0x37   :  { %789 = vmatpush.bf16.msrb.mxu3 %v768_v16  ;;  %v641_v16 = vor.u32 %v754_v15, %v640_v14 }
  0x3a   :  { %729 = vmatmul.msk.bf16.gmra.mxu2 %vm318_vm0, %v605_v47 }
  0x3b   :  { %790 = vmatpush.bf16.msrb.mxu3 %v767_v21  ;;  %v621_v21 = vor.u32 %v750_v18, %v620_v17  ;;  %v495_v17 = vld [vmem:[%s1169_s3 + $0x28] sm:$0xff] }
  0x3f   :  { %791 = vmatpush.bf16.msrb.mxu3 %v766_v23  ;;  %v652_v23 = vld [vmem:[%s1167_s0 + $0xb0] sm:$0xf] }
  0x40   :  { %v653_v25 = vor.u32 %v757_v24, %v652_v23 }
  0x41   :  { %361 = vmatmul.bf16.gmra.mxu0 %v585_v54 }
  0x42   :  { %430 = vmatmul.bf16.vlgmr.msrb.gmra.mxu3 %v637_v55  ;;  %410 = vmatmul.bf16.gmra.mxu1 %v589_v56 }
  0x4a   :  { %730 = vmatmul.msk.bf16.gmra.mxu2 %vm318_vm0, %v617_v59 }
  0x51   :  { %366 = vmatmul.bf16.gmra.mxu0 %v597_v2 }
  0x52   :  { %435 = vmatmul.bf16.gmra.mxu3 %v649_v3  ;;  %415 = vmatmul.bf16.gmra.mxu1 %v601_v4 }
  0x5a   :  { %731 = vmatmul.msk.bf16.gmra.mxu2 %vm318_vm0, %v629_v7  ;;  %v494_v7 = vld [vmem:[%s1169_s3 + $0x20] sm:$0xff] }
  0x61   :  { %371 = vmatmul.bf16.gmra.mxu0 %v609_v12 }
  0x62   :  { %420 = vmatmul.bf16.gmra.mxu1 %v613_v13 }
  0x6a   :  { %732 = vmatmul.msk.bf16.gmra.mxu2 %vm318_vm0, %v641_v16 }
  0x71   :  { %376 = vmatmul.bf16.gmra.mxu0 %v621_v21 }
  0x72   :  { %425 = vmatmul.bf16.gmra.mxu1 %v625_v22 }
  0x7a   :  { %733 = vmatmul.msk.bf16.gmra.mxu2 %vm318_vm0, %v653_v25 }
  0x8d   :  { %v450_v26 = vpop.f32.mrf.mxu2 }
  0x95   :  { %v452_v27 = vpop.f32.mrf.mxu2 }
  0x9d   :  { %v455_v29 = vpop.f32.mrf.mxu2 }
  0x9e   :  { %v352_v30 = vpop.f32.mrf.mxu0 }
  0x9f   :  { %v353_v31 = vadd.f32 %v1027_v28, %v352_v30  ;;  %v401_v32 = vpop.f32.mrf.mxu1 }
  0xa1   :  { %v402_v33 = vadd.f32 %v401_v32, %v353_v31 }
  0xa3   :  { %v451_v35 = vadd.f32 %v450_v26, %v402_v33 }
  0xa5   :  { %v506_v36 = vadd.f32 %v490_v34, %v451_v35  ;;  %v457_v37 = vpop.f32.mrf.mxu2  ;;  %v382_v62 = vpop.f32.mrf.mxu3 }
  0xa6   :  { %v354_v38 = vpop.f32.mrf.mxu0 }
  0xa7   :  { %v522_v39 = vmax.f32 %v506_v36, 0.0  ;;  %v355_v40 = vadd.f32 %v1027_v28, %v354_v38  ;;  %v403_v41 = vpop.f32.mrf.mxu1  ;;  %v497_v38 = vld [vmem:[%s1169_s3 + $0x38] sm:$0xff] }
  0xa9   :  { %538 = vst.msk [vmem:[%s1170_s4] sm:$0xff] %vm318_vm0, %v522_v39  ;;  %v404_v42 = vadd.f32 %v403_v41, %v355_v40 }
  0xab   :  { %v453_v44 = vadd.f32 %v452_v27, %v404_v42  ;;  %v496_v27 = vld [vmem:[%s1169_s3 + $0x30] sm:$0xff] }
  0xad   :  { %v507_v45 = vadd.f32 %v491_v43, %v453_v44  ;;  %v460_v46 = vpop.f32.mrf.mxu2  ;;  %v1065_v9 = vpop.f32.mrf.mxu3 }
  0xae   :  { %v357_v47 = vpop.f32.mrf.mxu0 }
  0xaf   :  { %v523_v48 = vmax.f32 %v507_v45, 0.0  ;;  %v358_v49 = vadd.f32 %v1027_v28, %v357_v47  ;;  %v406_v50 = vpop.f32.mrf.mxu1  ;;  %v498_v47 = vld [vmem:[%s1169_s3 + $0x40] sm:$0xff] }
  0xb1   :  { %539 = vst.msk [vmem:[%s1170_s4 + $0x8] sm:$0xff] %vm318_vm0, %v523_v48  ;;  %v407_v51 = vadd.f32 %v406_v50, %v358_v49 }
  0xb3   :  { %v456_v53 = vadd.f32 %v455_v29, %v407_v51 }
  0xb5   :  { %v508_v54 = vadd.f32 %v492_v52, %v456_v53  ;;  %v462_v55 = vpop.f32.mrf.mxu2  ;;  %v1075_v22 = vpop.f32.mrf.mxu3 }
  0xb6   :  { %v359_v56 = vpop.f32.mrf.mxu0 }
  0xb7   :  { %v524_v57 = vmax.f32 %v508_v54, 0.0  ;;  %v360_v58 = vadd.f32 %v1027_v28, %v359_v56  ;;  %v408_v59 = vpop.f32.mrf.mxu1  ;;  %v383_v56 = vadd.f32 %v1027_v28, %v382_v62 }
  0xb9   :  { %540 = vst.msk [vmem:[%s1170_s4 + $0x10] sm:$0xff] %vm318_vm0, %v524_v57  ;;  %v409_v60 = vadd.f32 %v408_v59, %v360_v58  ;;  %v499_v58 = vld [vmem:[%s1169_s3 + $0x48] sm:$0xff] }
  0xbb   :  { %v458_v63 = vadd.f32 %v457_v37, %v409_v60 }
  0xbd   :  { %v509_v0 = vadd.f32 %v493_v61, %v458_v63  ;;  %v465_v1 = vpop.f32.mrf.mxu2  ;;  %v1086_v36 = vpop.f32.mrf.mxu3 }
  0xbe   :  { %v362_v2 = vpop.f32.mrf.mxu0 }
  0xbf   :  { %v525_v3 = vmax.f32 %v509_v0, 0.0  ;;  %v363_v4 = vadd.f32 %v1027_v28, %v362_v2  ;;  %v411_v5 = vpop.f32.mrf.mxu1 }
  0xc1   :  { %541 = vst.msk [vmem:[%s1170_s4 + $0x18] sm:$0xff] %vm318_vm0, %v525_v3  ;;  %v412_v6 = vadd.f32 %v411_v5, %v363_v4 }
  0xc3   :  { %v461_v8 = vadd.f32 %v460_v46, %v412_v6  ;;  %v385_v6 = vadd.f32 %v1027_v28, %v1065_v9 }
  0xc5   :  { %v510_v10 = vadd.f32 %v494_v7, %v461_v8  ;;  %v467_v11 = vpop.f32.mrf.mxu2  ;;  %v431_v48 = vpop.f32.mrf.mxu3 }
  0xc6   :  { %v364_v12 = vpop.f32.mrf.mxu0  ;;  %v432_v60 = vadd.f32 %v431_v48, %v383_v56 }
  0xc7   :  { %v526_v13 = vmax.f32 %v510_v10, 0.0  ;;  %v365_v14 = vadd.f32 %v1027_v28, %v364_v12  ;;  %v413_v15 = vpop.f32.mrf.mxu1 }
  0xc9   :  { %542 = vst.msk [vmem:[%s1170_s4 + $0x20] sm:$0xff] %vm318_vm0, %v526_v13  ;;  %v414_v16 = vadd.f32 %v413_v15, %v365_v14  ;;  %v503_v15 = vld [vmem:[%s1169_s3 + $0x68] sm:$0xff] }
  0xcb   :  { %v463_v18 = vadd.f32 %v462_v55, %v414_v16 }
  0xcd   :  { %v511_v19 = vadd.f32 %v495_v17, %v463_v18  ;;  %v470_v20 = vpop.f32.mrf.mxu2  ;;  %v433_v61 = vpop.f32.mrf.mxu3 }
  0xce   :  { %v367_v21 = vpop.f32.mrf.mxu0  ;;  %v434_v13 = vadd.f32 %v433_v61, %v385_v6 }
  0xcf   :  { %v527_v23 = vmax.f32 %v511_v19, 0.0  ;;  %v368_v24 = vadd.f32 %v1027_v28, %v367_v21  ;;  %v416_v25 = vpop.f32.mrf.mxu1 }
  0xd1   :  { %543 = vst.msk [vmem:[%s1170_s4 + $0x28] sm:$0xff] %vm318_vm0, %v527_v23  ;;  %v417_v26 = vadd.f32 %v416_v25, %v368_v24  ;;  %v388_v23 = vadd.f32 %v1027_v28, %v1075_v22 }
  0xd3   :  { %v466_v29 = vadd.f32 %v465_v1, %v417_v26  ;;  %v502_v1 = vld [vmem:[%s1169_s3 + $0x60] sm:$0xff] }
  0xd5   :  { %v512_v30 = vadd.f32 %v496_v27, %v466_v29  ;;  %v472_v31 = vpop.f32.mrf.mxu2  ;;  %v436_v18 = vpop.f32.mrf.mxu3  ;;  %v501_v27 = vld [vmem:[%s1169_s3 + $0x58] sm:$0xff] }
  0xd6   :  { %v369_v32 = vpop.f32.mrf.mxu0 }
  0xd7   :  { %v528_v33 = vmax.f32 %v512_v30, 0.0  ;;  %v370_v34 = vadd.f32 %v1027_v28, %v369_v32  ;;  %v418_v35 = vpop.f32.mrf.mxu1  ;;  %v437_v30 = vadd.f32 %v436_v18, %v388_v23  ;;  %v504_v32 = vld [vmem:[%s1169_s3 + $0x70] sm:$0xff] }
  0xd9   :  { %544 = vst.msk [vmem:[%s1170_s4 + $0x30] sm:$0xff] %vm318_vm0, %v528_v33  ;;  %v419_v37 = vadd.f32 %v418_v35, %v370_v34  ;;  %v390_v35 = vadd.f32 %v1027_v28, %v1086_v36 }
  0xdb   :  { %v468_v39 = vadd.f32 %v467_v11, %v419_v37  ;;  %v500_v11 = vld [vmem:[%s1169_s3 + $0x50] sm:$0xff] }
  0xdd   :  { %v513_v40 = vadd.f32 %v497_v38, %v468_v39  ;;  %v475_v41 = vpop.f32.mrf.mxu2  ;;  %v438_v38 = vpop.f32.mrf.mxu3 }
  0xde   :  { %v372_v42 = vpop.f32.mrf.mxu0 }
  0xdf   :  { %v529_v43 = vmax.f32 %v513_v40, 0.0  ;;  %v373_v44 = vadd.f32 %v1027_v28, %v372_v42  ;;  %v421_v45 = vpop.f32.mrf.mxu1  ;;  %v439_v40 = vadd.f32 %v438_v38, %v390_v35  ;;  %v505_v42 = vld [vmem:[%s1169_s3 + $0x78] sm:$0xff] }
  0xe1   :  { %545 = vst.msk [vmem:[%s1170_s4 + $0x38] sm:$0xff] %vm318_vm0, %v529_v43  ;;  %v422_v46 = vadd.f32 %v421_v45, %v373_v44 }
  0xe3   :  { %v471_v49 = vadd.f32 %v470_v20, %v422_v46 }
  0xe5   :  { %v514_v50 = vadd.f32 %v498_v47, %v471_v49  ;;  %v477_v51 = vpop.f32.mrf.mxu2 }
  0xe6   :  { %v374_v52 = vpop.f32.mrf.mxu0 }
  0xe7   :  { %v530_v53 = vmax.f32 %v514_v50, 0.0  ;;  %v375_v54 = vadd.f32 %v1027_v28, %v374_v52  ;;  %v423_v55 = vpop.f32.mrf.mxu1 }
  0xe9   :  { %546 = vst.msk [vmem:[%s1170_s4 + $0x40] sm:$0xff] %vm318_vm0, %v530_v53  ;;  %v424_v57 = vadd.f32 %v423_v55, %v375_v54 }
  0xeb   :  { %v473_v59 = vadd.f32 %v472_v31, %v424_v57 }
  0xed   :  { %v515_v63 = vadd.f32 %v499_v58, %v473_v59  ;;  %v480_v0 = vpop.f32.mrf.mxu2 }
  0xee   :  { %v481_v62 = vadd.f32 %v480_v0, %v432_v60  ;;  %v377_v2 = vpop.f32.mrf.mxu0 }
  0xef   :  { %v531_v3 = vmax.f32 %v515_v63, 0.0  ;;  %v378_v4 = vadd.f32 %v1027_v28, %v377_v2  ;;  %v426_v5 = vpop.f32.mrf.mxu1 }
  0xf0   :  { %v518_v7 = vadd.f32 %v502_v1, %v481_v62 }
  0xf1   :  { %547 = vst.msk [vmem:[%s1170_s4 + $0x48] sm:$0xff] %vm318_vm0, %v531_v3  ;;  %v427_v8 = vadd.f32 %v426_v5, %v378_v4 }
  0xf2   :  { %v534_v10 = vmax.f32 %v518_v7, 0.0 }
  0xf3   :  { %v476_v12 = vadd.f32 %v475_v41, %v427_v8 }
  0xf4   :  { %550 = vst.msk [vmem:[%s1170_s4 + $0x60] sm:$0xff] %vm318_vm0, %v534_v10 }
  0xf5   :  { %v516_v9 = vadd.f32 %v500_v11, %v476_v12  ;;  %v482_v14 = vpop.f32.mrf.mxu2 }
  0xf6   :  { %v483_v16 = vadd.f32 %v482_v14, %v434_v13  ;;  %v379_v17 = vpop.f32.mrf.mxu0 }
  0xf7   :  { %v532_v19 = vmax.f32 %v516_v9, 0.0  ;;  %v380_v20 = vadd.f32 %v1027_v28, %v379_v17  ;;  %v428_v21 = vpop.f32.mrf.mxu1 }
  0xf8   :  { %v519_v24 = vadd.f32 %v503_v15, %v483_v16 }
  0xf9   :  { %548 = vst.msk [vmem:[%s1170_s4 + $0x50] sm:$0xff] %vm318_vm0, %v532_v19  ;;  %v429_v25 = vadd.f32 %v428_v21, %v380_v20 }
  0xfa   :  { %v535_v26 = vmax.f32 %v519_v24, 0.0 }
  0xfb   :  { %v478_v29 = vadd.f32 %v477_v51, %v429_v25 }
  0xfc   :  { %551 = vst.msk [vmem:[%s1170_s4 + $0x68] sm:$0xff] %vm318_vm0, %v535_v26 }
  0xfd   :  { %v517_v22 = vadd.f32 %v501_v27, %v478_v29  ;;  %v485_v31 = vpop.f32.mrf.mxu2 }
  0xfe   :  { %v486_v33 = vadd.f32 %v485_v31, %v437_v30 }
  0xff   :  { %v533_v34 = vmax.f32 %v517_v22, 0.0 }
 0x100   :  { %v520_v37 = vadd.f32 %v504_v32, %v486_v33 }
 0x101   :  { %549 = vst.msk [vmem:[%s1170_s4 + $0x58] sm:$0xff] %vm318_vm0, %v533_v34 }
 0x102   :  { %v536_v39 = vmax.f32 %v520_v37, 0.0 }
 0x104   :  { %552 = vst.msk [vmem:[%s1170_s4 + $0x70] sm:$0xff] %vm318_vm0, %v536_v39 }
 0x105   :  { %v487_v41 = vpop.f32.mrf.mxu2 }
 0x106   :  { %v488_v28 = vadd.f32 %v487_v41, %v439_v40 }
 0x108   :  { %v521_v36 = vadd.f32 %v505_v42, %v488_v28 }
 0x10a   :  { %v537_v43 = vmax.f32 %v521_v36, 0.0 }
 0x10c   :  { %553 = vst.msk [vmem:[%s1170_s4 + $0x78] sm:$0xff] %vm318_vm0, %v537_v43 }

// kernel: bbn_resnet_forward.14
= control target key start
LH: loop header
LB: loop body
LE: loop exit
PB: predicated region body
PF: predicated region fallthrough
CT: control target
= control target key end

     0   :  { %vm201_vm0 = vcmask 261120   ;;  %vm269_vm1 = vcmask 523264   ;;  %s540_s1 = inlined_call_operand.vmem [shape: bf16[288,64], index: 1, kind: input, shape index: {}]   ;;  %s541_s0 = inlined_call_operand.vmem [shape: bf16[32,288], index: 0, kind: input, shape index: {}]   ;;  %s542_s2 = inlined_call_operand.vmem [shape: f32[1,64], index: 2, kind: input, shape index: {}]   ;;  %s543_s3 = inlined_call_operand.vmem [shape: f32[32,64], index: 3, kind: output, shape index: {}]  }
   0x1   :  { %v389_v0 = vld [vmem:[%s540_s1 + $0x38] sm:$0xff]  ;;  %v388_v2 = vld [vmem:[%s540_s1 + $0x30] sm:$0xff]  ;;  %v399_v3 = vld [vmem:[%s540_s1 + $0x88] sm:$0xff] }
   0x2   :  { %v397_v1 = vld [vmem:[%s540_s1 + $0x78] sm:$0xff]  ;;  %208 = vmatpush.bf16.msra.mxu0 %v389_v0  ;;  %400 = vmatpush.bf16.msra.mxu3 %v389_v0  ;;  %v396_v4 = vld [vmem:[%s540_s1 + $0x70] sm:$0xff]  ;;  %v398_v5 = vld [vmem:[%s540_s1 + $0x80] sm:$0xff] }
   0x3   :  { %227 = vmatpush.bf16.msra.mxu1 %v397_v1  ;;  %252 = vmatpush.bf16.msra.mxu2 %v399_v3  ;;  %v288_v6 = vld [vmem:[%s541_s0 + $0x8] sm:$0xf]  ;;  %v378_v7 = vld [vmem:[%s541_s0 + $0x10] sm:$0xf0]  ;;  %v386_v11 = vld [vmem:[%s540_s1 + $0x20] sm:$0xff] }
   0x4   :  { %v387_v8 = vld [vmem:[%s540_s1 + $0x28] sm:$0xff]  ;;  %v289_v10 = vor.u32 %v378_v7, %v288_v6  ;;  %v394_v12 = vld [vmem:[%s540_s1 + $0x60] sm:$0xff]  ;;  %v385_v13 = vld [vmem:[%s540_s1 + $0x18] sm:$0xff] }
   0x5   :  { %v395_v9 = vld [vmem:[%s540_s1 + $0x68] sm:$0xff]  ;;  %v393_v14 = vld [vmem:[%s540_s1 + $0x58] sm:$0xff]  ;;  %v384_v15 = vld [vmem:[%s540_s1 + $0x10] sm:$0xff] }
   0x6   :  { %209 = vmatpush.bf16.msra.mxu0 %v388_v2  ;;  %401 = vmatpush.bf16.msra.mxu3 %v388_v2  ;;  %v392_v16 = vld [vmem:[%s540_s1 + $0x50] sm:$0xff]  ;;  %v300_v17 = vld [vmem:[%s541_s0 + $0x20] sm:$0xf]  ;;  %v381_v18 = vld [vmem:[%s541_s0 + $0x28] sm:$0xf0] }
   0x7   :  { %228 = vmatpush.bf16.msra.mxu1 %v396_v4  ;;  %253 = vmatpush.bf16.msra.mxu2 %v398_v5  ;;  %v383_v19 = vld [vmem:[%s540_s1 + $0x8] sm:$0xff]  ;;  %v301_v21 = vor.u32 %v381_v18, %v300_v17  ;;  %v382_v22 = vld [vmem:[%s540_s1] sm:$0xff]  ;;  %v292_v25 = vld [vmem:[%s541_s0 + $0x18] sm:$0xf] }
   0x8   :  { %v391_v20 = vld [vmem:[%s540_s1 + $0x48] sm:$0xff]  ;;  %v280_v23 = vld [vmem:[%s541_s0] sm:$0xf]  ;;  %v380_v26 = vld [vmem:[%s541_s0 + $0x20] sm:$0xf0] }
   0x9   :  { %v377_v24 = vld [vmem:[%s541_s0 + $0x8] sm:$0xf0]  ;;  %v390_v27 = vld [vmem:[%s540_s1 + $0x40] sm:$0xff]  ;;  %v282_v29 = vld [vmem:[%s541_s0 + $0xc] sm:$0xf0]  ;;  %v293_v31 = vor.u32 %v380_v26, %v292_v25 }
   0xa   :  { %210 = vmatpush.bf16.msra.mxu0 %v387_v8  ;;  %402 = vmatpush.bf16.msra.mxu3 %v387_v8  ;;  %v376_v28 = vld [vmem:[%s541_s0 + $0x4] sm:$0xf]  ;;  %v281_v30 = vor.u32 %v377_v24, %v280_v23  ;;  %v379_v33 = vld [vmem:[%s541_s0 + $0x1c] sm:$0xf]  ;;  %v294_v34 = vld [vmem:[%s541_s0 + $0x24] sm:$0xf0] }
   0xb   :  { %229 = vmatpush.bf16.msra.mxu1 %v395_v9  ;;  %374 = vmatmul.msk.bf16.vlgmr.msra.gmra.mxu2 %vm201_vm0, %v289_v10  ;;  %v285_v32 = vor.u32 %v376_v28, %v282_v29  ;;  %v297_v35 = vor.u32 %v379_v33, %v294_v34  ;;  %v408_v37 = vld [vmem:[%s542_s2] ss:$0 sm:$0xff] }
   0xe   :  { %211 = vmatpush.bf16.msra.mxu0 %v386_v11  ;;  %403 = vmatpush.bf16.msra.mxu3 %v386_v11 }
   0xf   :  { %230 = vmatpush.bf16.msra.mxu1 %v394_v12 }
  0x12   :  { %212 = vmatpush.bf16.msra.mxu0 %v385_v13  ;;  %404 = vmatpush.bf16.msra.mxu3 %v385_v13 }
  0x13   :  { %231 = vmatpush.bf16.msra.mxu1 %v393_v14 }
  0x16   :  { %213 = vmatpush.bf16.msra.mxu0 %v384_v15  ;;  %405 = vmatpush.bf16.msra.mxu3 %v384_v15 }
  0x17   :  { %232 = vmatpush.bf16.msra.mxu1 %v392_v16 }
  0x1a   :  { %214 = vmatpush.bf16.msra.mxu0 %v383_v19  ;;  %406 = vmatpush.bf16.msra.mxu3 %v383_v19 }
  0x1b   :  { %233 = vmatpush.bf16.msra.mxu1 %v391_v20  ;;  %375 = vmatmul.msk.bf16.gmra.mxu2 %vm201_vm0, %v301_v21 }
  0x1e   :  { %215 = vmatpush.bf16.msra.mxu0 %v382_v22  ;;  %407 = vmatpush.bf16.msra.mxu3 %v382_v22 }
  0x1f   :  { %234 = vmatpush.bf16.msra.mxu1 %v390_v27 }
  0x21   :  { %216 = vmatmul.bf16.vlgmr.msra.gmra.mxu0 %v281_v30  ;;  %221 = vmatmul.bf16.vlgmr.msra.gmra.mxu3 %v293_v31 }
  0x22   :  { %235 = vmatmul.bf16.vlgmr.msra.gmra.mxu1 %v285_v32 }
  0x32   :  { %240 = vmatmul.bf16.gmra.mxu1 %v297_v35 }
  0x8e   :  { %v255_v36 = vpop.f32.mrf.mxu2 }
  0x96   :  { %v257_v44 = vpop.f32.mrf.mxu2 }
  0x9e   :  { %v217_v38 = vpop.f32.mrf.mxu0  ;;  %v260_v53 = vpop.f32.mrf.mxu2 }
  0x9f   :  { %v218_v39 = vadd.f32 %v408_v37, %v217_v38  ;;  %v236_v40 = vpop.f32.mrf.mxu1 }
  0xa1   :  { %v237_v41 = vadd.f32 %v236_v40, %v218_v39 }
  0xa3   :  { %v256_v42 = vadd.f32 %v255_v36, %v237_v41 }
  0xa4   :  { %v222_v48 = vpop.f32.mrf.mxu3 }
  0xa5   :  { %v265_v43 = vmax.f32 %v256_v42, 0.0  ;;  %v223_v51 = vadd.f32 %v408_v37, %v222_v48 }
  0xa6   :  { %v219_v45 = vpop.f32.mrf.mxu0  ;;  %v262_v62 = vpop.f32.mrf.mxu2 }
  0xa7   :  { %270 = vst.msk [vmem:[%s543_s3] sm:$0xff] %vm269_vm1, %v265_v43  ;;  %v220_v46 = vadd.f32 %v408_v37, %v219_v45  ;;  %v238_v47 = vpop.f32.mrf.mxu1 }
  0xa9   :  { %v239_v49 = vadd.f32 %v238_v47, %v220_v46 }
  0xab   :  { %v258_v50 = vadd.f32 %v257_v44, %v239_v49 }
  0xac   :  { %v224_v57 = vpop.f32.mrf.mxu3 }
  0xad   :  { %v266_v52 = vmax.f32 %v258_v50, 0.0  ;;  %v225_v59 = vadd.f32 %v408_v37, %v224_v57 }
  0xaf   :  { %271 = vst.msk [vmem:[%s543_s3 + $0x8] sm:$0xff] %vm269_vm1, %v266_v52  ;;  %v241_v54 = vpop.f32.mrf.mxu1 }
  0xb0   :  { %v242_v55 = vadd.f32 %v241_v54, %v223_v51 }
  0xb2   :  { %v261_v56 = vadd.f32 %v260_v53, %v242_v55 }
  0xb4   :  { %v267_v58 = vmax.f32 %v261_v56, 0.0 }
  0xb6   :  { %272 = vst.msk [vmem:[%s543_s3 + $0x10] sm:$0xff] %vm269_vm1, %v267_v58 }
  0xb7   :  { %v243_v60 = vpop.f32.mrf.mxu1 }
  0xb8   :  { %v244_v61 = vadd.f32 %v243_v60, %v225_v59 }
  0xba   :  { %v263_v63 = vadd.f32 %v262_v62, %v244_v61 }
  0xbc   :  { %v268_v0 = vmax.f32 %v263_v63, 0.0 }
  0xbe   :  { %273 = vst.msk [vmem:[%s543_s3 + $0x18] sm:$0xff] %vm269_vm1, %v268_v0 }

// kernel: bbn_resnet_forward.15
= control target key start
LH: loop header
LB: loop body
LE: loop exit
PB: predicated region body
PF: predicated region fallthrough
CT: control target
= control target key end

     0   :  { %vm372_vm0 = vcmask 523264   ;;  %s957_s1 = inlined_call_operand.vmem [shape: bf16[576,64], index: 1, kind: input, shape index: {}]   ;;  %s958_s2 = inlined_call_operand.vmem [shape: f32[1,64], index: 2, kind: input, shape index: {}]   ;;  %s959_s0 = inlined_call_operand.vmem [shape: bf16[32,576], index: 0, kind: input, shape index: {}]   ;;  %s960_s3 = inlined_call_operand.vmem [shape: f32[32,64], index: 3, kind: input, shape index: {}]   ;;  %s961_s4 = inlined_call_operand.vmem [shape: f32[32,64], index: 4, kind: output, shape index: {}]  }
   0x1   :  { %v697_v0 = vld [vmem:[%s957_s1 + $0x38] sm:$0xff]  ;;  %v696_v4 = vld [vmem:[%s957_s1 + $0x30] sm:$0xff]  ;;  %v695_v8 = vld [vmem:[%s957_s1 + $0x28] sm:$0xff] }
   0x2   :  { %v705_v1 = vld [vmem:[%s957_s1 + $0x78] sm:$0xff]  ;;  %379 = vmatpush.bf16.msra.mxu0 %v697_v0  ;;  %v704_v5 = vld [vmem:[%s957_s1 + $0x70] sm:$0xff]  ;;  %v703_v9 = vld [vmem:[%s957_s1 + $0x68] sm:$0xff] }
   0x3   :  { %v713_v2 = vld [vmem:[%s957_s1 + $0xb8] sm:$0xff]  ;;  %398 = vmatpush.bf16.msra.mxu1 %v705_v1  ;;  %v712_v6 = vld [vmem:[%s957_s1 + $0xb0] sm:$0xff]  ;;  %v711_v10 = vld [vmem:[%s957_s1 + $0xa8] sm:$0xff] }
   0x4   :  { %v721_v3 = vld [vmem:[%s957_s1 + $0xf8] sm:$0xff]  ;;  %417 = vmatpush.bf16.msra.mxu2 %v713_v2  ;;  %v720_v7 = vld [vmem:[%s957_s1 + $0xf0] sm:$0xff]  ;;  %v719_v11 = vld [vmem:[%s957_s1 + $0xe8] sm:$0xff] }
   0x5   :  { %436 = vmatpush.bf16.msra.mxu3 %v721_v3  ;;  %v694_v12 = vld [vmem:[%s957_s1 + $0x20] sm:$0xff]  ;;  %v693_v16 = vld [vmem:[%s957_s1 + $0x18] sm:$0xff]  ;;  %v692_v20 = vld [vmem:[%s957_s1 + $0x10] sm:$0xff] }
   0x6   :  { %380 = vmatpush.bf16.msra.mxu0 %v696_v4  ;;  %v702_v13 = vld [vmem:[%s957_s1 + $0x60] sm:$0xff]  ;;  %v701_v17 = vld [vmem:[%s957_s1 + $0x58] sm:$0xff]  ;;  %v700_v21 = vld [vmem:[%s957_s1 + $0x50] sm:$0xff] }
   0x7   :  { %399 = vmatpush.bf16.msra.mxu1 %v704_v5  ;;  %v710_v14 = vld [vmem:[%s957_s1 + $0xa0] sm:$0xff]  ;;  %v709_v18 = vld [vmem:[%s957_s1 + $0x98] sm:$0xff]  ;;  %v708_v22 = vld [vmem:[%s957_s1 + $0x90] sm:$0xff] }
   0x8   :  { %418 = vmatpush.bf16.msra.mxu2 %v712_v6  ;;  %v718_v15 = vld [vmem:[%s957_s1 + $0xe0] sm:$0xff]  ;;  %v717_v19 = vld [vmem:[%s957_s1 + $0xd8] sm:$0xff]  ;;  %v716_v23 = vld [vmem:[%s957_s1 + $0xd0] sm:$0xff] }
   0x9   :  { %437 = vmatpush.bf16.msra.mxu3 %v720_v7  ;;  %v691_v24 = vld [vmem:[%s957_s1 + $0x8] sm:$0xff]  ;;  %v690_v28 = vld [vmem:[%s957_s1] sm:$0xff]  ;;  %v682_v33 = vld [vmem:[%s959_s0 + $0x10] sm:$0xf0] }
   0xa   :  { %381 = vmatpush.bf16.msra.mxu0 %v695_v8  ;;  %v699_v25 = vld [vmem:[%s957_s1 + $0x48] sm:$0xff]  ;;  %v698_v29 = vld [vmem:[%s957_s1 + $0x40] sm:$0xff]  ;;  %v498_v35 = vld [vmem:[%s959_s0 + $0x14] sm:$0xf0] }
   0xb   :  { %400 = vmatpush.bf16.msra.mxu1 %v703_v9  ;;  %v707_v26 = vld [vmem:[%s957_s1 + $0x88] sm:$0xff]  ;;  %v706_v30 = vld [vmem:[%s957_s1 + $0x80] sm:$0xff]  ;;  %v683_v37 = vld [vmem:[%s959_s0 + $0x18] sm:$0xf0] }
   0xc   :  { %419 = vmatpush.bf16.msra.mxu2 %v711_v10  ;;  %v715_v27 = vld [vmem:[%s957_s1 + $0xc8] sm:$0xff]  ;;  %v714_v31 = vld [vmem:[%s957_s1 + $0xc0] sm:$0xff]  ;;  %v725_v40 = vld [vmem:[%s957_s1 + $0x118] sm:$0xff] }
   0xd   :  { %438 = vmatpush.bf16.msra.mxu3 %v719_v11  ;;  %v496_v32 = vld [vmem:[%s959_s0] sm:$0xf]  ;;  %v680_v34 = vld [vmem:[%s959_s0 + $0x4] sm:$0xf]  ;;  %v504_v36 = vld [vmem:[%s959_s0 + $0x8] sm:$0xf] }
   0xe   :  { %382 = vmatpush.bf16.msra.mxu0 %v694_v12  ;;  %v681_v38 = vld [vmem:[%s959_s0 + $0xc] sm:$0xf]  ;;  %v506_v39 = vld [vmem:[%s959_s0 + $0x1c] sm:$0xf0]  ;;  %v497_v41 = vor.u32 %v682_v33, %v496_v32  ;;  %v501_v42 = vor.u32 %v680_v34, %v498_v35  ;;  %v505_v43 = vor.u32 %v683_v37, %v504_v36  ;;  %v724_v45 = vld [vmem:[%s957_s1 + $0x110] sm:$0xff] }
   0xf   :  { %401 = vmatpush.bf16.msra.mxu1 %v702_v13  ;;  %v509_v44 = vor.u32 %v681_v38, %v506_v39  ;;  %v723_v46 = vld [vmem:[%s957_s1 + $0x108] sm:$0xff]  ;;  %v722_v47 = vld [vmem:[%s957_s1 + $0x100] sm:$0xff]  ;;  %v687_v49 = vld [vmem:[%s959_s0 + $0x38] sm:$0xf0] }
  0x10   :  { %420 = vmatpush.bf16.msra.mxu2 %v710_v14  ;;  %v516_v48 = vld [vmem:[%s959_s0 + $0x28] sm:$0xf]  ;;  %v685_v50 = vld [vmem:[%s959_s0 + $0x2c] sm:$0xf]  ;;  %v518_v51 = vld [vmem:[%s959_s0 + $0x3c] sm:$0xf0] }
  0x11   :  { %439 = vmatpush.bf16.msra.mxu3 %v718_v15  ;;  %v524_v52 = vld [vmem:[%s959_s0 + $0x30] sm:$0xf]  ;;  %v688_v53 = vld [vmem:[%s959_s0 + $0x40] sm:$0xf0]  ;;  %v686_v54 = vld [vmem:[%s959_s0 + $0x34] sm:$0xf]  ;;  %v517_v56 = vor.u32 %v687_v49, %v516_v48  ;;  %v521_v57 = vor.u32 %v685_v50, %v518_v51 }
  0x12   :  { %383 = vmatpush.bf16.msra.mxu0 %v693_v16  ;;  %v526_v55 = vld [vmem:[%s959_s0 + $0x44] sm:$0xf0]  ;;  %v525_v58 = vor.u32 %v688_v53, %v524_v52  ;;  %v512_v60 = vld [vmem:[%s959_s0 + $0x10] sm:$0xf]  ;;  %v684_v61 = vld [vmem:[%s959_s0 + $0x20] sm:$0xf0] }
  0x13   :  { %402 = vmatpush.bf16.msra.mxu1 %v701_v17  ;;  %v529_v59 = vor.u32 %v686_v54, %v526_v55  ;;  %v532_v62 = vld [vmem:[%s959_s0 + $0x38] sm:$0xf]  ;;  %v689_v63 = vld [vmem:[%s959_s0 + $0x48] sm:$0xf0]  ;;  %v513_v0 = vor.u32 %v684_v61, %v512_v60  ;;  %v730_v11 = vld [vmem:[%s958_s2] ss:$0 sm:$0xff] }
  0x14   :  { %421 = vmatpush.bf16.msra.mxu2 %v709_v18  ;;  %v533_v1 = vor.u32 %v689_v63, %v532_v62  ;;  %v477_v48 = vld [vmem:[%s960_s3 + $0x18] sm:$0xff] }
  0x15   :  { %440 = vmatpush.bf16.msra.mxu3 %v717_v19 }
  0x16   :  { %384 = vmatpush.bf16.msra.mxu0 %v692_v20 }
  0x17   :  { %403 = vmatpush.bf16.msra.mxu1 %v700_v21 }
  0x18   :  { %422 = vmatpush.bf16.msra.mxu2 %v708_v22 }
  0x19   :  { %441 = vmatpush.bf16.msra.mxu3 %v716_v23 }
  0x1a   :  { %385 = vmatpush.bf16.msra.mxu0 %v691_v24 }
  0x1b   :  { %404 = vmatpush.bf16.msra.mxu1 %v699_v25 }
  0x1c   :  { %423 = vmatpush.bf16.msra.mxu2 %v707_v26 }
  0x1d   :  { %442 = vmatpush.bf16.msra.mxu3 %v715_v27 }
  0x1e   :  { %386 = vmatpush.bf16.msra.mxu0 %v690_v28 }
  0x1f   :  { %405 = vmatpush.bf16.msra.mxu1 %v698_v29  ;;  %v474_v29 = vld [vmem:[%s960_s3] sm:$0xff] }
  0x20   :  { %424 = vmatpush.bf16.msra.mxu2 %v706_v30 }
  0x21   :  { %443 = vmatpush.bf16.msra.mxu3 %v714_v31  ;;  %387 = vmatmul.bf16.vlgmr.msra.gmra.mxu0 %v497_v41  ;;  %v476_v31 = vld [vmem:[%s960_s3 + $0x10] sm:$0xff] }
  0x22   :  { %459 = vmatpush.bf16.msrb.mxu0 %v725_v40  ;;  %406 = vmatmul.bf16.vlgmr.msra.gmra.mxu1 %v501_v42 }
  0x23   :  { %726 = vmatpush.bf16.msrb.mxu1 %v725_v40  ;;  %425 = vmatmul.bf16.vlgmr.msra.gmra.mxu2 %v505_v43 }
  0x24   :  { %444 = vmatmul.bf16.vlgmr.msra.gmra.mxu3 %v509_v44 }
  0x26   :  { %460 = vmatpush.bf16.msrb.mxu0 %v724_v45 }
  0x27   :  { %727 = vmatpush.bf16.msrb.mxu1 %v724_v45 }
  0x2a   :  { %461 = vmatpush.bf16.msrb.mxu0 %v723_v46 }
  0x2b   :  { %728 = vmatpush.bf16.msrb.mxu1 %v723_v46  ;;  %v475_v46 = vld [vmem:[%s960_s3 + $0x8] sm:$0xff] }
  0x2e   :  { %462 = vmatpush.bf16.msrb.mxu0 %v722_v47 }
  0x2f   :  { %729 = vmatpush.bf16.msrb.mxu1 %v722_v47 }
  0x31   :  { %392 = vmatmul.bf16.gmra.mxu0 %v517_v56 }
  0x32   :  { %411 = vmatmul.bf16.gmra.mxu1 %v521_v57 }
  0x33   :  { %430 = vmatmul.bf16.gmra.mxu2 %v525_v58 }
  0x34   :  { %449 = vmatmul.bf16.gmra.mxu3 %v529_v59 }
  0x41   :  { %678 = vmatmul.msk.bf16.vlgmr.msrb.gmra.mxu0 %vm372_vm0, %v513_v0 }
  0x42   :  { %679 = vmatmul.msk.bf16.vlgmr.msrb.gmra.mxu1 %vm372_vm0, %v533_v1 }
  0x9e   :  { %v388_v2 = vpop.f32.mrf.mxu0 }
  0x9f   :  { %v407_v3 = vpop.f32.mrf.mxu1  ;;  %v389_v13 = vadd.f32 %v730_v11, %v388_v2 }
  0xa1   :  { %v408_v18 = vadd.f32 %v407_v3, %v389_v13 }
  0xa6   :  { %v426_v4 = vpop.f32.mrf.mxu2  ;;  %v390_v6 = vpop.f32.mrf.mxu0 }
  0xa7   :  { %v445_v5 = vpop.f32.mrf.mxu3  ;;  %v409_v7 = vpop.f32.mrf.mxu1  ;;  %v427_v20 = vadd.f32 %v426_v4, %v408_v18  ;;  %v391_v23 = vadd.f32 %v730_v11, %v390_v6 }
  0xa9   :  { %v446_v25 = vadd.f32 %v445_v5, %v427_v20  ;;  %v410_v32 = vadd.f32 %v409_v7, %v391_v23 }
  0xae   :  { %v428_v8 = vpop.f32.mrf.mxu2  ;;  %v393_v9 = vpop.f32.mrf.mxu0 }
  0xaf   :  { %v412_v10 = vpop.f32.mrf.mxu1  ;;  %v447_v12 = vpop.f32.mrf.mxu3  ;;  %v394_v14 = vadd.f32 %v730_v11, %v393_v9  ;;  %v429_v36 = vadd.f32 %v428_v8, %v410_v32 }
  0xb1   :  { %v413_v19 = vadd.f32 %v412_v10, %v394_v14  ;;  %v448_v43 = vadd.f32 %v447_v12, %v429_v36 }
  0xb6   :  { %v431_v15 = vpop.f32.mrf.mxu2  ;;  %v395_v16 = vpop.f32.mrf.mxu0 }
  0xb7   :  { %v414_v17 = vpop.f32.mrf.mxu1  ;;  %v432_v21 = vadd.f32 %v431_v15, %v413_v19  ;;  %v450_v22 = vpop.f32.mrf.mxu3  ;;  %v396_v24 = vadd.f32 %v730_v11, %v395_v16 }
  0xb9   :  { %v451_v26 = vadd.f32 %v450_v22, %v432_v21  ;;  %v415_v33 = vadd.f32 %v414_v17, %v396_v24 }
  0xbe   :  { %v433_v27 = vpop.f32.mrf.mxu2  ;;  %v464_v28 = vpop.f32.mrf.mxu0 }
  0xbf   :  { %v469_v30 = vpop.f32.mrf.mxu1  ;;  %v465_v34 = vadd.f32 %v464_v28, %v446_v25  ;;  %v434_v37 = vadd.f32 %v433_v27, %v415_v33  ;;  %v452_v42 = vpop.f32.mrf.mxu3 }
  0xc0   :  { %v470_v35 = vadd.f32 %v469_v30, %v451_v26 }
  0xc1   :  { %v478_v38 = vadd.f32 %v474_v29, %v465_v34  ;;  %v453_v44 = vadd.f32 %v452_v42, %v434_v37 }
  0xc2   :  { %v480_v39 = vadd.f32 %v476_v31, %v470_v35 }
  0xc3   :  { %v482_v40 = vmax.f32 %v478_v38, 0.0 }
  0xc4   :  { %v484_v41 = vmax.f32 %v480_v39, 0.0 }
  0xc5   :  { %486 = vst.msk [vmem:[%s961_s4] sm:$0xff] %vm372_vm0, %v482_v40 }
  0xc6   :  { %488 = vst.msk [vmem:[%s961_s4 + $0x10] sm:$0xff] %vm372_vm0, %v484_v41  ;;  %v466_v45 = vpop.f32.mrf.mxu0 }
  0xc7   :  { %v471_v47 = vpop.f32.mrf.mxu1  ;;  %v467_v49 = vadd.f32 %v466_v45, %v448_v43 }
  0xc8   :  { %v472_v50 = vadd.f32 %v471_v47, %v453_v44 }
  0xc9   :  { %v479_v51 = vadd.f32 %v475_v46, %v467_v49 }
  0xca   :  { %v481_v52 = vadd.f32 %v477_v48, %v472_v50 }
  0xcb   :  { %v483_v53 = vmax.f32 %v479_v51, 0.0 }
  0xcc   :  { %v485_v54 = vmax.f32 %v481_v52, 0.0 }
  0xcd   :  { %487 = vst.msk [vmem:[%s961_s4 + $0x8] sm:$0xff] %vm372_vm0, %v483_v53 }
  0xce   :  { %489 = vst.msk [vmem:[%s961_s4 + $0x18] sm:$0xff] %vm372_vm0, %v485_v54 }

// kernel: bbn_resnet_forward.16
= control target key start
LH: loop header
LB: loop body
LE: loop exit
PB: predicated region body
PF: predicated region fallthrough
CT: control target
= control target key end

     0   :  { %vm369_vm0 = vcmask 523264   ;;  %s923_s1 = inlined_call_operand.vmem [shape: bf16[576,128], index: 1, kind: input, shape index: {}]   ;;  %s924_s2 = inlined_call_operand.vmem [shape: f32[1,128], index: 2, kind: input, shape index: {}]   ;;  %s925_s0 = inlined_call_operand.vmem [shape: bf16[32,576], index: 0, kind: input, shape index: {}]   ;;  %s926_s3 = inlined_call_operand.vmem [shape: f32[32,128], index: 3, kind: output, shape index: {}]  }
   0x1   :  { %v686_v0 = vld [vmem:[%s923_s1 + $0x38] sm:$0xff]  ;;  %v685_v4 = vld [vmem:[%s923_s1 + $0x30] sm:$0xff]  ;;  %v684_v8 = vld [vmem:[%s923_s1 + $0x28] sm:$0xff] }
   0x2   :  { %v694_v1 = vld [vmem:[%s923_s1 + $0x78] sm:$0xff]  ;;  %376 = vmatpush.bf16.msra.mxu0 %v686_v0  ;;  %v693_v5 = vld [vmem:[%s923_s1 + $0x70] sm:$0xff]  ;;  %v692_v9 = vld [vmem:[%s923_s1 + $0x68] sm:$0xff] }
   0x3   :  { %v702_v2 = vld [vmem:[%s923_s1 + $0xb8] sm:$0xff]  ;;  %395 = vmatpush.bf16.msra.mxu1 %v694_v1  ;;  %v701_v6 = vld [vmem:[%s923_s1 + $0xb0] sm:$0xff]  ;;  %v700_v10 = vld [vmem:[%s923_s1 + $0xa8] sm:$0xff] }
   0x4   :  { %v710_v3 = vld [vmem:[%s923_s1 + $0xf8] sm:$0xff]  ;;  %414 = vmatpush.bf16.msra.mxu2 %v702_v2  ;;  %v709_v7 = vld [vmem:[%s923_s1 + $0xf0] sm:$0xff]  ;;  %v708_v11 = vld [vmem:[%s923_s1 + $0xe8] sm:$0xff] }
   0x5   :  { %433 = vmatpush.bf16.msra.mxu3 %v710_v3  ;;  %v683_v12 = vld [vmem:[%s923_s1 + $0x20] sm:$0xff]  ;;  %v682_v16 = vld [vmem:[%s923_s1 + $0x18] sm:$0xff]  ;;  %v681_v20 = vld [vmem:[%s923_s1 + $0x10] sm:$0xff] }
   0x6   :  { %377 = vmatpush.bf16.msra.mxu0 %v685_v4  ;;  %v691_v13 = vld [vmem:[%s923_s1 + $0x60] sm:$0xff]  ;;  %v690_v17 = vld [vmem:[%s923_s1 + $0x58] sm:$0xff]  ;;  %v689_v21 = vld [vmem:[%s923_s1 + $0x50] sm:$0xff] }
   0x7   :  { %396 = vmatpush.bf16.msra.mxu1 %v693_v5  ;;  %v699_v14 = vld [vmem:[%s923_s1 + $0xa0] sm:$0xff]  ;;  %v698_v18 = vld [vmem:[%s923_s1 + $0x98] sm:$0xff]  ;;  %v697_v22 = vld [vmem:[%s923_s1 + $0x90] sm:$0xff] }
   0x8   :  { %415 = vmatpush.bf16.msra.mxu2 %v701_v6  ;;  %v707_v15 = vld [vmem:[%s923_s1 + $0xe0] sm:$0xff]  ;;  %v706_v19 = vld [vmem:[%s923_s1 + $0xd8] sm:$0xff]  ;;  %v705_v23 = vld [vmem:[%s923_s1 + $0xd0] sm:$0xff] }
   0x9   :  { %434 = vmatpush.bf16.msra.mxu3 %v709_v7  ;;  %v680_v24 = vld [vmem:[%s923_s1 + $0x8] sm:$0xff]  ;;  %v679_v28 = vld [vmem:[%s923_s1] sm:$0xff]  ;;  %v671_v33 = vld [vmem:[%s925_s0 + $0x10] sm:$0xf0] }
   0xa   :  { %378 = vmatpush.bf16.msra.mxu0 %v684_v8  ;;  %v688_v25 = vld [vmem:[%s923_s1 + $0x48] sm:$0xff]  ;;  %v687_v29 = vld [vmem:[%s923_s1 + $0x40] sm:$0xff]  ;;  %v487_v35 = vld [vmem:[%s925_s0 + $0x14] sm:$0xf0] }
   0xb   :  { %397 = vmatpush.bf16.msra.mxu1 %v692_v9  ;;  %v696_v26 = vld [vmem:[%s923_s1 + $0x88] sm:$0xff]  ;;  %v695_v30 = vld [vmem:[%s923_s1 + $0x80] sm:$0xff]  ;;  %v672_v37 = vld [vmem:[%s925_s0 + $0x18] sm:$0xf0] }
   0xc   :  { %416 = vmatpush.bf16.msra.mxu2 %v700_v10  ;;  %v704_v27 = vld [vmem:[%s923_s1 + $0xc8] sm:$0xff]  ;;  %v703_v31 = vld [vmem:[%s923_s1 + $0xc0] sm:$0xff]  ;;  %v714_v40 = vld [vmem:[%s923_s1 + $0x118] sm:$0xff] }
   0xd   :  { %435 = vmatpush.bf16.msra.mxu3 %v708_v11  ;;  %v485_v32 = vld [vmem:[%s925_s0] sm:$0xf]  ;;  %v669_v34 = vld [vmem:[%s925_s0 + $0x4] sm:$0xf]  ;;  %v493_v36 = vld [vmem:[%s925_s0 + $0x8] sm:$0xf] }
   0xe   :  { %379 = vmatpush.bf16.msra.mxu0 %v683_v12  ;;  %v670_v38 = vld [vmem:[%s925_s0 + $0xc] sm:$0xf]  ;;  %v495_v39 = vld [vmem:[%s925_s0 + $0x1c] sm:$0xf0]  ;;  %v486_v41 = vor.u32 %v671_v33, %v485_v32  ;;  %v490_v42 = vor.u32 %v669_v34, %v487_v35  ;;  %v494_v43 = vor.u32 %v672_v37, %v493_v36  ;;  %v713_v45 = vld [vmem:[%s923_s1 + $0x110] sm:$0xff] }
   0xf   :  { %398 = vmatpush.bf16.msra.mxu1 %v691_v13  ;;  %v498_v44 = vor.u32 %v670_v38, %v495_v39  ;;  %v712_v46 = vld [vmem:[%s923_s1 + $0x108] sm:$0xff]  ;;  %v711_v47 = vld [vmem:[%s923_s1 + $0x100] sm:$0xff]  ;;  %v676_v49 = vld [vmem:[%s925_s0 + $0x38] sm:$0xf0] }
  0x10   :  { %417 = vmatpush.bf16.msra.mxu2 %v699_v14  ;;  %v505_v48 = vld [vmem:[%s925_s0 + $0x28] sm:$0xf]  ;;  %v674_v50 = vld [vmem:[%s925_s0 + $0x2c] sm:$0xf]  ;;  %v507_v51 = vld [vmem:[%s925_s0 + $0x3c] sm:$0xf0] }
  0x11   :  { %436 = vmatpush.bf16.msra.mxu3 %v707_v15  ;;  %v513_v52 = vld [vmem:[%s925_s0 + $0x30] sm:$0xf]  ;;  %v677_v53 = vld [vmem:[%s925_s0 + $0x40] sm:$0xf0]  ;;  %v675_v54 = vld [vmem:[%s925_s0 + $0x34] sm:$0xf]  ;;  %v506_v56 = vor.u32 %v676_v49, %v505_v48  ;;  %v510_v57 = vor.u32 %v674_v50, %v507_v51 }
  0x12   :  { %380 = vmatpush.bf16.msra.mxu0 %v682_v16  ;;  %v515_v55 = vld [vmem:[%s925_s0 + $0x44] sm:$0xf0]  ;;  %v514_v58 = vor.u32 %v677_v53, %v513_v52  ;;  %v501_v60 = vld [vmem:[%s925_s0 + $0x10] sm:$0xf]  ;;  %v673_v61 = vld [vmem:[%s925_s0 + $0x20] sm:$0xf0] }
  0x13   :  { %399 = vmatpush.bf16.msra.mxu1 %v690_v17  ;;  %v518_v59 = vor.u32 %v675_v54, %v515_v55  ;;  %v521_v62 = vld [vmem:[%s925_s0 + $0x38] sm:$0xf]  ;;  %v678_v63 = vld [vmem:[%s925_s0 + $0x48] sm:$0xf0]  ;;  %v502_v0 = vor.u32 %v673_v61, %v501_v60  ;;  %v719_v11 = vld [vmem:[%s924_s2] ss:$0 sm:$0xff] }
  0x14   :  { %418 = vmatpush.bf16.msra.mxu2 %v698_v18  ;;  %v522_v1 = vor.u32 %v678_v63, %v521_v62 }
  0x15   :  { %437 = vmatpush.bf16.msra.mxu3 %v706_v19 }
  0x16   :  { %381 = vmatpush.bf16.msra.mxu0 %v681_v20 }
  0x17   :  { %400 = vmatpush.bf16.msra.mxu1 %v689_v21 }
  0x18   :  { %419 = vmatpush.bf16.msra.mxu2 %v697_v22 }
  0x19   :  { %438 = vmatpush.bf16.msra.mxu3 %v705_v23 }
  0x1a   :  { %382 = vmatpush.bf16.msra.mxu0 %v680_v24 }
  0x1b   :  { %401 = vmatpush.bf16.msra.mxu1 %v688_v25 }
  0x1c   :  { %420 = vmatpush.bf16.msra.mxu2 %v696_v26 }
  0x1d   :  { %439 = vmatpush.bf16.msra.mxu3 %v704_v27 }
  0x1e   :  { %383 = vmatpush.bf16.msra.mxu0 %v679_v28 }
  0x1f   :  { %402 = vmatpush.bf16.msra.mxu1 %v687_v29 }
  0x20   :  { %421 = vmatpush.bf16.msra.mxu2 %v695_v30 }
  0x21   :  { %440 = vmatpush.bf16.msra.mxu3 %v703_v31  ;;  %384 = vmatmul.bf16.vlgmr.msra.gmra.mxu0 %v486_v41 }
  0x22   :  { %456 = vmatpush.bf16.msrb.mxu0 %v714_v40  ;;  %403 = vmatmul.bf16.vlgmr.msra.gmra.mxu1 %v490_v42 }
  0x23   :  { %715 = vmatpush.bf16.msrb.mxu1 %v714_v40  ;;  %422 = vmatmul.bf16.vlgmr.msra.gmra.mxu2 %v494_v43 }
  0x24   :  { %441 = vmatmul.bf16.vlgmr.msra.gmra.mxu3 %v498_v44 }
  0x26   :  { %457 = vmatpush.bf16.msrb.mxu0 %v713_v45 }
  0x27   :  { %716 = vmatpush.bf16.msrb.mxu1 %v713_v45 }
  0x2a   :  { %458 = vmatpush.bf16.msrb.mxu0 %v712_v46 }
  0x2b   :  { %717 = vmatpush.bf16.msrb.mxu1 %v712_v46 }
  0x2e   :  { %459 = vmatpush.bf16.msrb.mxu0 %v711_v47 }
  0x2f   :  { %718 = vmatpush.bf16.msrb.mxu1 %v711_v47 }
  0x31   :  { %389 = vmatmul.bf16.gmra.mxu0 %v506_v56 }
  0x32   :  { %408 = vmatmul.bf16.gmra.mxu1 %v510_v57 }
  0x33   :  { %427 = vmatmul.bf16.gmra.mxu2 %v514_v58 }
  0x34   :  { %446 = vmatmul.bf16.gmra.mxu3 %v518_v59 }
  0x41   :  { %667 = vmatmul.msk.bf16.vlgmr.msrb.gmra.mxu0 %vm369_vm0, %v502_v0 }
  0x42   :  { %668 = vmatmul.msk.bf16.vlgmr.msrb.gmra.mxu1 %vm369_vm0, %v522_v1 }
  0x9e   :  { %v385_v2 = vpop.f32.mrf.mxu0 }
  0x9f   :  { %v404_v3 = vpop.f32.mrf.mxu1  ;;  %v386_v13 = vadd.f32 %v719_v11, %v385_v2 }
  0xa1   :  { %v405_v18 = vadd.f32 %v404_v3, %v386_v13 }
  0xa6   :  { %v423_v4 = vpop.f32.mrf.mxu2  ;;  %v387_v6 = vpop.f32.mrf.mxu0 }
  0xa7   :  { %v442_v5 = vpop.f32.mrf.mxu3  ;;  %v406_v7 = vpop.f32.mrf.mxu1  ;;  %v424_v20 = vadd.f32 %v423_v4, %v405_v18  ;;  %v388_v23 = vadd.f32 %v719_v11, %v387_v6 }
  0xa9   :  { %v443_v25 = vadd.f32 %v442_v5, %v424_v20  ;;  %v407_v30 = vadd.f32 %v406_v7, %v388_v23 }
  0xae   :  { %v425_v8 = vpop.f32.mrf.mxu2  ;;  %v390_v9 = vpop.f32.mrf.mxu0 }
  0xaf   :  { %v409_v10 = vpop.f32.mrf.mxu1  ;;  %v444_v12 = vpop.f32.mrf.mxu3  ;;  %v391_v14 = vadd.f32 %v719_v11, %v390_v9  ;;  %v426_v34 = vadd.f32 %v425_v8, %v407_v30 }
  0xb1   :  { %v410_v19 = vadd.f32 %v409_v10, %v391_v14  ;;  %v445_v39 = vadd.f32 %v444_v12, %v426_v34 }
  0xb6   :  { %v428_v15 = vpop.f32.mrf.mxu2  ;;  %v392_v16 = vpop.f32.mrf.mxu0 }
  0xb7   :  { %v411_v17 = vpop.f32.mrf.mxu1  ;;  %v429_v21 = vadd.f32 %v428_v15, %v410_v19  ;;  %v447_v22 = vpop.f32.mrf.mxu3  ;;  %v393_v24 = vadd.f32 %v719_v11, %v392_v16 }
  0xb9   :  { %v448_v26 = vadd.f32 %v447_v22, %v429_v21  ;;  %v412_v31 = vadd.f32 %v411_v17, %v393_v24 }
  0xbe   :  { %v430_v27 = vpop.f32.mrf.mxu2  ;;  %v461_v28 = vpop.f32.mrf.mxu0 }
  0xbf   :  { %v466_v29 = vpop.f32.mrf.mxu1  ;;  %v462_v32 = vadd.f32 %v461_v28, %v443_v25  ;;  %v431_v35 = vadd.f32 %v430_v27, %v412_v31  ;;  %v449_v38 = vpop.f32.mrf.mxu3 }
  0xc0   :  { %v467_v33 = vadd.f32 %v466_v29, %v448_v26 }
  0xc1   :  { %v471_v36 = vmax.f32 %v462_v32, 0.0  ;;  %v450_v40 = vadd.f32 %v449_v38, %v431_v35 }
  0xc2   :  { %v473_v37 = vmax.f32 %v467_v33, 0.0 }
  0xc3   :  { %475 = vst [vmem:[%s926_s3] sm:$0xff] %v471_v36 }
  0xc4   :  { %477 = vst [vmem:[%s926_s3 + $0x10] sm:$0xff] %v473_v37 }
  0xc6   :  { %v463_v41 = vpop.f32.mrf.mxu0 }
  0xc7   :  { %v468_v42 = vpop.f32.mrf.mxu1  ;;  %v464_v43 = vadd.f32 %v463_v41, %v445_v39 }
  0xc8   :  { %v469_v44 = vadd.f32 %v468_v42, %v450_v40 }
  0xc9   :  { %v472_v45 = vmax.f32 %v464_v43, 0.0 }
  0xca   :  { %v474_v46 = vmax.f32 %v469_v44, 0.0 }
  0xcb   :  { %476 = vst [vmem:[%s926_s3 + $0x8] sm:$0xff] %v472_v45 }
  0xcc   :  { %478 = vst [vmem:[%s926_s3 + $0x18] sm:$0xff] %v474_v46 }

// kernel: bbn_resnet_forward.17
= control target key start
LH: loop header
LB: loop body
LE: loop exit
PB: predicated region body
PF: predicated region fallthrough
CT: control target
= control target key end

     0   :  { %11 = vsyncpa [#allocation4], 0  ;;  %s1678_s21 = smov 0   ;;  %s1998_s0 = inlined_call_operand.vmem [shape: bf16[32,1152], index: 0, kind: input, shape index: {}]   ;;  %s1999_s1 = inlined_call_operand.vmem [shape: bf16[1152,128], index: 1, kind: input, shape index: {}]   ;;  %s2000_s2 = inlined_call_operand.vmem [shape: f32[1,128], index: 2, kind: input, shape index: {}]   ;;  %s2001_s3 = inlined_call_operand.vmem [shape: f32[32,128], index: 3, kind: input, shape index: {}]   ;;  %s2002_s4 = inlined_call_operand.vmem [shape: f32[128,10], index: 4, kind: input, shape index: {}]   ;;  %s2003_s5 = inlined_call_operand.vmem [shape: f32[1,10], index: 5, kind: input, shape index: {}]   ;;  %s2004_s6 = inlined_call_operand.hbm [shape: f32[2,10], index: 6, kind: output, shape index: {}]  }
   0x1 LB: > { %s1684_s22 = sadd.s32 4294967295, %s1639_s21   ;;  %p1161_p0 = scmp.ge.s32.totalorder %s1639_s21, 1  ;;  %s1639_s21 = sphi %s1678_s21, %s17_s21  }
   0x2   : > { %p221_p1 = scmp.lt.s32.totalorder %s1639_s21, 3 }
   0x4   : > { %p222_p2 = pnand %p1161_p0, %p221_p1 }
   0x5   : > { %s1162_s25 = sshll.u32 (!%p222_p2), %s1684_s22, 1  ;;  %p1491_p4 = scmp.ne.s32.totalorder (!%p222_p2), %s1684_s22, 1 }
   0x6   : > { %225 = sbr.rel (%p222_p2) target bundleno = 430 (0x1ae), region = 44  ;;  %p253_p3 = scmp.lt.s32.totalorder (!%p222_p2), %s1162_s25, 3 }
   0xb   : > { %v1512_v0 = vld [vmem:[%s1999_s1 + $0x38] sm:$0xff]  ;;  %v1511_v4 = vld [vmem:[%s1999_s1 + $0x30] sm:$0xff]  ;;  %v1510_v8 = vld [vmem:[%s1999_s1 + $0x28] sm:$0xff]  ;;  %s2006_s25 = smov (!%p253_p3, %s1162_s25), 3 }
   0xc   : > { %v1528_v1 = vld [vmem:[%s1999_s1 + $0xb8] sm:$0xff]  ;;  %901 = vmatpush.bf16.msra.mxu0 %v1512_v0  ;;  %v1527_v5 = vld [vmem:[%s1999_s1 + $0xb0] sm:$0xff]  ;;  %v1526_v9 = vld [vmem:[%s1999_s1 + $0xa8] sm:$0xff]  ;;  %s1580_s29 = smul.u32 36, %s2006_s25 }
   0xd   : > { %v1520_v2 = vld [vmem:[%s1999_s1 + $0x78] sm:$0xff]  ;;  %929 = vmatpush.bf16.msra.mxu2 %v1528_v1  ;;  %v1519_v6 = vld [vmem:[%s1999_s1 + $0x70] sm:$0xff]  ;;  %v1518_v10 = vld [vmem:[%s1999_s1 + $0x68] sm:$0xff] }
   0xe   : > { %v1536_v3 = vld [vmem:[%s1999_s1 + $0xf8] sm:$0xff]  ;;  %915 = vmatpush.bf16.msra.mxu1 %v1520_v2  ;;  %v1535_v7 = vld [vmem:[%s1999_s1 + $0xf0] sm:$0xff]  ;;  %v1534_v11 = vld [vmem:[%s1999_s1 + $0xe8] sm:$0xff]  ;;  %s1779_s16 = scalar_lea.vmem %s1998_s0, %s1580_s29 }
   0xf   : > { %943 = vmatpush.bf16.msra.mxu3 %v1536_v3  ;;  %v1509_v12 = vld [vmem:[%s1999_s1 + $0x20] sm:$0xff]  ;;  %v1508_v16 = vld [vmem:[%s1999_s1 + $0x18] sm:$0xff]  ;;  %v1507_v20 = vld [vmem:[%s1999_s1 + $0x10] sm:$0xff] }
  0x10   : > { %902 = vmatpush.bf16.msra.mxu0 %v1511_v4  ;;  %v1525_v13 = vld [vmem:[%s1999_s1 + $0xa0] sm:$0xff]  ;;  %v1524_v17 = vld [vmem:[%s1999_s1 + $0x98] sm:$0xff]  ;;  %v1523_v21 = vld [vmem:[%s1999_s1 + $0x90] sm:$0xff] }
  0x11   : > { %930 = vmatpush.bf16.msra.mxu2 %v1527_v5  ;;  %v1517_v14 = vld [vmem:[%s1999_s1 + $0x60] sm:$0xff]  ;;  %v1516_v18 = vld [vmem:[%s1999_s1 + $0x58] sm:$0xff]  ;;  %v1515_v22 = vld [vmem:[%s1999_s1 + $0x50] sm:$0xff] }
  0x12   : > { %916 = vmatpush.bf16.msra.mxu1 %v1519_v6  ;;  %v1533_v15 = vld [vmem:[%s1999_s1 + $0xe0] sm:$0xff]  ;;  %v1532_v19 = vld [vmem:[%s1999_s1 + $0xd8] sm:$0xff]  ;;  %v1531_v23 = vld [vmem:[%s1999_s1 + $0xd0] sm:$0xff] }
  0x13   : > { %944 = vmatpush.bf16.msra.mxu3 %v1535_v7  ;;  %v1506_v24 = vld [vmem:[%s1999_s1 + $0x8] sm:$0xff]  ;;  %v1505_v28 = vld [vmem:[%s1999_s1] sm:$0xff]  ;;  %v1544_v30 = vld [vmem:[%s1999_s1 + $0x138] sm:$0xff] }
  0x14   : > { %903 = vmatpush.bf16.msra.mxu0 %v1510_v8  ;;  %v1522_v25 = vld [vmem:[%s1999_s1 + $0x88] sm:$0xff]  ;;  %v1521_v29 = vld [vmem:[%s1999_s1 + $0x80] sm:$0xff]  ;;  %v1560_v31 = vld [vmem:[%s1999_s1 + $0x1b8] sm:$0xff] }
  0x15   : > { %931 = vmatpush.bf16.msra.mxu2 %v1526_v9  ;;  %v1514_v26 = vld [vmem:[%s1999_s1 + $0x48] sm:$0xff]  ;;  %v1513_v32 = vld [vmem:[%s1999_s1 + $0x40] sm:$0xff]  ;;  %v1552_v38 = vld [vmem:[%s1999_s1 + $0x178] sm:$0xff] }
  0x16   : > { %917 = vmatpush.bf16.msra.mxu1 %v1518_v10  ;;  %v1530_v27 = vld [vmem:[%s1999_s1 + $0xc8] sm:$0xff]  ;;  %v1529_v33 = vld [vmem:[%s1999_s1 + $0xc0] sm:$0xff]  ;;  %v1568_v39 = vld [vmem:[%s1999_s1 + $0x1f8] sm:$0xff] }
  0x17   : > { %945 = vmatpush.bf16.msra.mxu3 %v1534_v11  ;;  %v1168_v34 = vld [vmem:[%s1779_s16] sm:$0xf]  ;;  %v1500_v35 = vld [vmem:[%s1779_s16 + $0x20] sm:$0xf0]  ;;  %v1176_v36 = vld [vmem:[%s1779_s16 + $0x8] sm:$0xf] }
  0x18   : > { %904 = vmatpush.bf16.msra.mxu0 %v1509_v12  ;;  %v1501_v37 = vld [vmem:[%s1779_s16 + $0x28] sm:$0xf0]  ;;  %v1496_v40 = vld [vmem:[%s1779_s16 + $0x4] sm:$0xf]  ;;  %v1170_v41 = vld [vmem:[%s1779_s16 + $0x24] sm:$0xf0]  ;;  %v1169_v44 = vor.u32 %v1500_v35, %v1168_v34 }
  0x19   : > { %932 = vmatpush.bf16.msra.mxu2 %v1525_v13  ;;  %v1497_v42 = vld [vmem:[%s1779_s16 + $0xc] sm:$0xf]  ;;  %v1178_v43 = vld [vmem:[%s1779_s16 + $0x2c] sm:$0xf0]  ;;  %v1177_v45 = vor.u32 %v1501_v37, %v1176_v36  ;;  %v1173_v48 = vor.u32 %v1496_v40, %v1170_v41  ;;  %v1541_v56 = vld [vmem:[%s1999_s1 + $0x120] sm:$0xff] }
  0x1a   : > { %918 = vmatpush.bf16.msra.mxu1 %v1517_v14  ;;  %v1543_v46 = vld [vmem:[%s1999_s1 + $0x130] sm:$0xff]  ;;  %v1181_v49 = vor.u32 %v1497_v42, %v1178_v43  ;;  %v1542_v52 = vld [vmem:[%s1999_s1 + $0x128] sm:$0xff]  ;;  %v1557_v57 = vld [vmem:[%s1999_s1 + $0x1a0] sm:$0xff] }
  0x1b   : > { %946 = vmatpush.bf16.msra.mxu3 %v1533_v15  ;;  %v1559_v47 = vld [vmem:[%s1999_s1 + $0x1b0] sm:$0xff]  ;;  %v1558_v53 = vld [vmem:[%s1999_s1 + $0x1a8] sm:$0xff]  ;;  %v1549_v58 = vld [vmem:[%s1999_s1 + $0x160] sm:$0xff] }
  0x1c   : > { %905 = vmatpush.bf16.msra.mxu0 %v1508_v16  ;;  %v1551_v50 = vld [vmem:[%s1999_s1 + $0x170] sm:$0xff]  ;;  %v1550_v54 = vld [vmem:[%s1999_s1 + $0x168] sm:$0xff]  ;;  %v1565_v59 = vld [vmem:[%s1999_s1 + $0x1e0] sm:$0xff] }
  0x1d   : > { %933 = vmatpush.bf16.msra.mxu2 %v1524_v17  ;;  %v1567_v51 = vld [vmem:[%s1999_s1 + $0x1f0] sm:$0xff]  ;;  %v1566_v55 = vld [vmem:[%s1999_s1 + $0x1e8] sm:$0xff]  ;;  %v1540_v60 = vld [vmem:[%s1999_s1 + $0x118] sm:$0xff] }
  0x1e   : > { %919 = vmatpush.bf16.msra.mxu1 %v1516_v18  ;;  %v1556_v61 = vld [vmem:[%s1999_s1 + $0x198] sm:$0xff]  ;;  %v1539_v0 = vld [vmem:[%s1999_s1 + $0x110] sm:$0xff]  ;;  %v1538_v4 = vld [vmem:[%s1999_s1 + $0x108] sm:$0xff] }
  0x1f   : > { %947 = vmatpush.bf16.msra.mxu3 %v1532_v19  ;;  %v1548_v62 = vld [vmem:[%s1999_s1 + $0x158] sm:$0xff]  ;;  %v1555_v1 = vld [vmem:[%s1999_s1 + $0x190] sm:$0xff]  ;;  %v1554_v5 = vld [vmem:[%s1999_s1 + $0x188] sm:$0xff] }
  0x20   : > { %906 = vmatpush.bf16.msra.mxu0 %v1507_v20  ;;  %v1564_v63 = vld [vmem:[%s1999_s1 + $0x1d8] sm:$0xff]  ;;  %v1547_v2 = vld [vmem:[%s1999_s1 + $0x150] sm:$0xff]  ;;  %v1546_v6 = vld [vmem:[%s1999_s1 + $0x148] sm:$0xff] }
  0x21   : > { %934 = vmatpush.bf16.msra.mxu2 %v1523_v21  ;;  %v1563_v3 = vld [vmem:[%s1999_s1 + $0x1d0] sm:$0xff]  ;;  %v1562_v7 = vld [vmem:[%s1999_s1 + $0x1c8] sm:$0xff]  ;;  %v1537_v8 = vld [vmem:[%s1999_s1 + $0x100] sm:$0xff] }
  0x22   : > { %920 = vmatpush.bf16.msra.mxu1 %v1515_v22  ;;  %v1553_v9 = vld [vmem:[%s1999_s1 + $0x180] sm:$0xff]  ;;  %v1576_v10 = vld [vmem:[%s1999_s1 + $0x238] sm:$0xff]  ;;  %v1184_v11 = vld [vmem:[%s1779_s16 + $0x10] sm:$0xf] }
  0x23   : > { %948 = vmatpush.bf16.msra.mxu3 %v1531_v23  ;;  %v1502_v12 = vld [vmem:[%s1779_s16 + $0x30] sm:$0xf0]  ;;  %v1192_v13 = vld [vmem:[%s1779_s16 + $0x18] sm:$0xf]  ;;  %v1503_v14 = vld [vmem:[%s1779_s16 + $0x38] sm:$0xf0] }
  0x24   : > { %907 = vmatpush.bf16.msra.mxu0 %v1506_v24  ;;  %v1545_v15 = vld [vmem:[%s1999_s1 + $0x140] sm:$0xff]  ;;  %v1498_v17 = vld [vmem:[%s1779_s16 + $0x14] sm:$0xf]  ;;  %v1186_v18 = vld [vmem:[%s1779_s16 + $0x34] sm:$0xf0]  ;;  %v1185_v21 = vor.u32 %v1502_v12, %v1184_v11  ;;  %v1193_v22 = vor.u32 %v1503_v14, %v1192_v13 }
  0x25   : > { %935 = vmatpush.bf16.msra.mxu2 %v1522_v25  ;;  %v1561_v16 = vld [vmem:[%s1999_s1 + $0x1c0] sm:$0xff]  ;;  %v1499_v19 = vld [vmem:[%s1779_s16 + $0x1c] sm:$0xf]  ;;  %v1189_v23 = vor.u32 %v1498_v17, %v1186_v18  ;;  %v1575_v25 = vld [vmem:[%s1999_s1 + $0x230] sm:$0xff] }
  0x26   : > { %921 = vmatpush.bf16.msra.mxu1 %v1514_v26  ;;  %v1194_v20 = vld [vmem:[%s1779_s16 + $0x3c] sm:$0xf0]  ;;  %v1574_v26 = vld [vmem:[%s1999_s1 + $0x228] sm:$0xff] }
  0x27   : > { %949 = vmatpush.bf16.msra.mxu3 %v1530_v27  ;;  %v1197_v24 = vor.u32 %v1499_v19, %v1194_v20  ;;  %v1573_v27 = vld [vmem:[%s1999_s1 + $0x220] sm:$0xff] }
  0x28   : > { %908 = vmatpush.bf16.msra.mxu0 %v1505_v28  ;;  %v1572_v28 = vld [vmem:[%s1999_s1 + $0x218] sm:$0xff] }
  0x29   : > { %936 = vmatpush.bf16.msra.mxu2 %v1521_v29  ;;  %v1571_v29 = vld [vmem:[%s1999_s1 + $0x210] sm:$0xff] }
  0x2a   : > { %922 = vmatpush.bf16.msra.mxu1 %v1513_v32  ;;  %v1200_v32 = vld [vmem:[%s1779_s16 + $0x20] sm:$0xf] }
  0x2b   : > { %950 = vmatpush.bf16.msra.mxu3 %v1529_v33  ;;  %909 = vmatmul.bf16.vlgmr.msra.gmra.mxu0 %v1169_v44  ;;  %v1504_v33 = vld [vmem:[%s1779_s16 + $0x40] sm:$0xf0]  ;;  %s1165_s16 = sshll.u32 %s2006_s25, 3  ;;  %s1577_s25 = scalar_lea.vmem [#allocation2], %s1639_s21 }
  0x2c   : > { %957 = vmatpush.bf16.msrb.mxu0 %v1544_v30  ;;  %937 = vmatmul.bf16.vlgmr.msra.gmra.mxu2 %v1177_v45  ;;  %v1570_v30 = vld [vmem:[%s1999_s1 + $0x208] sm:$0xff]  ;;  %v1201_v34 = vor.u32 %v1504_v33, %v1200_v32  ;;  %s263_s8 = scalar_lea.vmem %s2001_s3, %s1165_s16 }
  0x2d   : > { %985 = vmatpush.bf16.msrb.mxu2 %v1560_v31  ;;  %923 = vmatmul.bf16.vlgmr.msra.gmra.mxu1 %v1173_v48  ;;  %v1569_v31 = vld [vmem:[%s1999_s1 + $0x200] sm:$0xff] }
  0x2e   : > { %971 = vmatpush.bf16.msrb.mxu1 %v1552_v38  ;;  %951 = vmatmul.bf16.vlgmr.msra.gmra.mxu3 %v1181_v49  ;;  %v1597_v38 = vld [vmem:[%s2000_s2] ss:$0 sm:$0xff] }
  0x2f   : > { %999 = vmatpush.bf16.msrb.mxu3 %v1568_v39 }
  0x30   : > { %958 = vmatpush.bf16.msrb.mxu0 %v1543_v46 }
  0x31   : > { %986 = vmatpush.bf16.msrb.mxu2 %v1559_v47 }
  0x32   : > { %972 = vmatpush.bf16.msrb.mxu1 %v1551_v50 }
  0x33   : > { %1000 = vmatpush.bf16.msrb.mxu3 %v1567_v51 }
  0x34   : > { %959 = vmatpush.bf16.msrb.mxu0 %v1542_v52 }
  0x35   : > { %987 = vmatpush.bf16.msrb.mxu2 %v1558_v53 }
  0x36   : > { %973 = vmatpush.bf16.msrb.mxu1 %v1550_v54 }
  0x37   : > { %1001 = vmatpush.bf16.msrb.mxu3 %v1566_v55 }
  0x38   : > { %960 = vmatpush.bf16.msrb.mxu0 %v1541_v56 }
  0x39   : > { %988 = vmatpush.bf16.msrb.mxu2 %v1557_v57 }
  0x3a   : > { %974 = vmatpush.bf16.msrb.mxu1 %v1549_v58 }
  0x3b   : > { %1002 = vmatpush.bf16.msrb.mxu3 %v1565_v59 }
  0x3c   : > { %961 = vmatpush.bf16.msrb.mxu0 %v1540_v60 }
  0x3d   : > { %989 = vmatpush.bf16.msrb.mxu2 %v1556_v61 }
  0x3e   : > { %975 = vmatpush.bf16.msrb.mxu1 %v1548_v62 }
  0x3f   : > { %1003 = vmatpush.bf16.msrb.mxu3 %v1564_v63 }
  0x40   : > { %962 = vmatpush.bf16.msrb.mxu0 %v1539_v0 }
  0x41   : > { %990 = vmatpush.bf16.msrb.mxu2 %v1555_v1  ;;  %v1641_v1 = vmov 16.0  }
  0x42   : > { %976 = vmatpush.bf16.msrb.mxu1 %v1547_v2  ;;  %1598 = vrcp.f32 %v1641_v1 }
  0x43   : > { %1004 = vmatpush.bf16.msrb.mxu3 %v1563_v3 }
  0x44   : > { %963 = vmatpush.bf16.msrb.mxu0 %v1538_v4 }
  0x45   : > { %991 = vmatpush.bf16.msrb.mxu2 %v1554_v5 }
  0x46   : > { %977 = vmatpush.bf16.msrb.mxu1 %v1546_v6  ;;  %v1027_v6 = vld [vmem:[%s263_s8] sm:$0xff] }
  0x47   : > { %1005 = vmatpush.bf16.msrb.mxu3 %v1562_v7 }
  0x48   : > { %964 = vmatpush.bf16.msrb.mxu0 %v1537_v8  ;;  %v1599_v7 = vpop.eup %1598 }
  0x49   : > { %992 = vmatpush.bf16.msrb.mxu2 %v1553_v9  ;;  %v1041_v13 = vmul.f32 16.0, %v1599_v7  ;;  %vm1045_vm0 = vweird.f32 %v1599_v7 }
  0x4a   : > { %978 = vmatpush.bf16.msrb.mxu1 %v1545_v15 }
  0x4b   : > { %1006 = vmatpush.bf16.msrb.mxu3 %v1561_v16  ;;  %965 = vmatmul.bf16.vlgmr.msrb.gmra.mxu0 %v1185_v21  ;;  %v1042_v17 = vsub.f32 1.0, %v1041_v13 }
  0x4c   : > { %1013 = vmatpush.bf16.msra.mxu0 %v1576_v10  ;;  %993 = vmatmul.bf16.vlgmr.msrb.gmra.mxu2 %v1193_v22  ;;  %v1028_v10 = vld [vmem:[%s263_s8 + $0x8] sm:$0xff] }
  0x4d   : > { %979 = vmatmul.bf16.vlgmr.msrb.gmra.mxu1 %v1189_v23  ;;  %v1043_v20 = vmul.f32 %v1599_v7, %v1042_v17 }
  0x4e   : > { %1007 = vmatmul.bf16.vlgmr.msrb.gmra.mxu3 %v1197_v24 }
  0x4f   : > { %v1044_v23 = vadd.f32 %v1599_v7, %v1043_v20 }
  0x50   : > { %1014 = vmatpush.bf16.msra.mxu0 %v1575_v25 }
  0x54   : > { %1015 = vmatpush.bf16.msra.mxu0 %v1574_v26  ;;  %v1046_v26 = vsel %vm1045_vm0, %v1599_v7, %v1044_v23 }
  0x58   : > { %1016 = vmatpush.bf16.msra.mxu0 %v1573_v27 }
  0x5c   : > { %1017 = vmatpush.bf16.msra.mxu0 %v1572_v28 }
  0x60   : > { %1018 = vmatpush.bf16.msra.mxu0 %v1571_v29 }
  0x64   : > { %1019 = vmatpush.bf16.msra.mxu0 %v1570_v30 }
  0x68   : > { %1020 = vmatpush.bf16.msra.mxu0 %v1569_v31 }
  0x6b   : > { %1021 = vmatmul.bf16.vlgmr.msra.gmra.mxu0 %v1201_v34 }
  0xa8   : > { %v910_v35 = vpop.f32.mrf.mxu0 }
  0xa9   : > { %v911_v41 = vadd.f32 %v1597_v38, %v910_v35 }
  0xaa   : > { %v924_v36 = vpop.f32.mrf.mxu1 }
  0xab   : > { %v925_v43 = vadd.f32 %v924_v36, %v911_v41 }
  0xaf   : > { %v938_v37 = vpop.f32.mrf.mxu2 }
  0xb0   : > { %v912_v39 = vpop.f32.mrf.mxu0  ;;  %v939_v46 = vadd.f32 %v938_v37, %v925_v43 }
  0xb1   : > { %v952_v40 = vpop.f32.mrf.mxu3  ;;  %v913_v47 = vadd.f32 %v1597_v38, %v912_v39 }
  0xb2   : > { %v926_v42 = vpop.f32.mrf.mxu1  ;;  %v953_v49 = vadd.f32 %v952_v40, %v939_v46 }
  0xb3   : > { %v927_v50 = vadd.f32 %v926_v42, %v913_v47 }
  0xb7   : > { %v940_v44 = vpop.f32.mrf.mxu2 }
  0xb8   : > { %v941_v53 = vadd.f32 %v940_v44, %v927_v50 }
  0xb9   : > { %v954_v48 = vpop.f32.mrf.mxu3 }
  0xba   : > { %v955_v57 = vadd.f32 %v954_v48, %v941_v53 }
  0xc8   : > { %v966_v45 = vpop.f32.mrf.mxu0 }
  0xc9   : > { %v967_v54 = vadd.f32 %v966_v45, %v953_v49 }
  0xca   : > { %v980_v51 = vpop.f32.mrf.mxu1 }
  0xcb   : > { %v981_v58 = vadd.f32 %v980_v51, %v967_v54 }
  0xcf   : > { %v994_v52 = vpop.f32.mrf.mxu2 }
  0xd0   : > { %v968_v55 = vpop.f32.mrf.mxu0  ;;  %v995_v61 = vadd.f32 %v994_v52, %v981_v58 }
  0xd1   : > { %v1008_v56 = vpop.f32.mrf.mxu3  ;;  %v969_v59 = vadd.f32 %v968_v55, %v955_v57 }
  0xd2   : > { %v982_v60 = vpop.f32.mrf.mxu1  ;;  %v1009_v2 = vadd.f32 %v1008_v56, %v995_v61 }
  0xd3   : > { %v983_v0 = vadd.f32 %v982_v60, %v969_v59 }
  0xd7   : > { %v996_v62 = vpop.f32.mrf.mxu2 }
  0xd8   : > { %v997_v3 = vadd.f32 %v996_v62, %v983_v0 }
  0xd9   : > { %v1010_v4 = vpop.f32.mrf.mxu3 }
  0xda   : > { %v1011_v8 = vadd.f32 %v1010_v4, %v997_v3 }
  0xe8   : > { %v1022_v63 = vpop.f32.mrf.mxu0 }
  0xe9   : > { %v1023_v5 = vadd.f32 %v1022_v63, %v1009_v2 }
  0xeb   : > { %v1029_v11 = vadd.f32 %v1027_v6, %v1023_v5 }
  0xed   : > { %v1031_v15 = vmax.f32 %v1029_v11, 0.0 }
  0xf0   : > { %v1024_v9 = vpop.f32.mrf.mxu0 }
  0xf1   : > { %v1025_v12 = vadd.f32 %v1024_v9, %v1011_v8 }
  0xf3   : > { %v1030_v14 = vadd.f32 %v1028_v10, %v1025_v12 }
  0xf5   : > { %v1032_v16 = vmax.f32 %v1030_v14, 0.0 }
  0xf7   : > { %v1033_v18 = vadd.f32 %v1032_v16, %v1031_v15 }
  0xf9   : > { %v1034_v19 = vrot.slane %v1033_v18, 4 }
  0xfb   : > { %v1035_v21 = vadd.f32 %v1034_v19, %v1033_v18 }
  0xfd   : > { %v1036_v22 = vrot.slane %v1035_v21, 2 }
  0xff   : > { %v1037_v24 = vadd.f32 %v1036_v22, %v1035_v21 }
 0x101   : > { %v1038_v25 = vrot.slane %v1037_v24, 1 }
 0x103   : > { %v1039_v27 = vadd.f32 %v1038_v25, %v1037_v24  ;;  %1053 = sbr.rel (%p1491_p4) target bundleno = 425 (0x1a9), region = 48 }
 0x105   : > { %v1047_v28 = vmul.f32 %v1046_v26, %v1039_v27 }
 0x107   : > { %1579 = vst [vmem:[%s1577_s25 - $0x1] sm:$0x1] %v1047_v28 }
 0x108   : > { %v1070_v29 = vld [vmem:[%s2002_s4 + $0x78] sm:$0xff]  ;;  %v1069_v30 = vld [vmem:[%s2002_s4 + $0x70] sm:$0xff]  ;;  %v1068_v31 = vld [vmem:[%s2002_s4 + $0x68] sm:$0xff]  ;;  %vm1095_vm1 = vcmask 74752  }
 0x109   : > { %1075 = vmatpush.msra.mxu0 %v1070_v29  ;;  %v1067_v32 = vld [vmem:[%s2002_s4 + $0x60] sm:$0xff]  ;;  %v1066_v33 = vld [vmem:[%s2002_s4 + $0x58] sm:$0xff]  ;;  %v1065_v34 = vld [vmem:[%s2002_s4 + $0x50] sm:$0xff] }
 0x10a   : > { %v1064_v35 = vld [vmem:[%s2002_s4 + $0x48] sm:$0xff]  ;;  %v1063_v36 = vld [vmem:[%s2002_s4 + $0x40] sm:$0xff]  ;;  %v1062_v37 = vld [vmem:[%s2002_s4 + $0x38] sm:$0xff] }
 0x10b   : > { %1076 = vmatpush.msra.mxu0 %v1069_v30  ;;  %v1061_v38 = vld [vmem:[%s2002_s4 + $0x30] sm:$0xff]  ;;  %v1060_v39 = vld [vmem:[%s2002_s4 + $0x28] sm:$0xff]  ;;  %v1059_v40 = vld [vmem:[%s2002_s4 + $0x20] sm:$0xff] }
 0x10c   : > { %v1058_v41 = vld [vmem:[%s2002_s4 + $0x18] sm:$0xff]  ;;  %v1057_v42 = vld [vmem:[%s2002_s4 + $0x10] sm:$0xff]  ;;  %v1056_v43 = vld [vmem:[%s2002_s4 + $0x8] sm:$0xff] }
 0x10d   : > { %1077 = vmatpush.msra.mxu0 %v1068_v31  ;;  %v1055_v44 = vld [vmem:[%s2002_s4] sm:$0xff] }
 0x10e   : > { %v1054_v45 = vld [vmem:[#allocation2] sm:$0x3] }
 0x10f   : > { %1078 = vmatpush.msra.mxu0 %v1067_v32  ;;  %v1600_v46 = vld [vmem:[%s2003_s5] ss:$0 sm:$0xff] }
 0x111   : > { %1079 = vmatpush.msra.mxu0 %v1066_v33 }
 0x113   : > { %1080 = vmatpush.msra.mxu0 %v1065_v34 }
 0x115   : > { %1081 = vmatpush.msra.mxu0 %v1064_v35 }
 0x117   : > { %1082 = vmatpush.msra.mxu0 %v1063_v36 }
 0x119   : > { %1083 = vmatpush.msra.mxu0 %v1062_v37 }
 0x11b   : > { %1084 = vmatpush.msra.mxu0 %v1061_v38 }
 0x11d   : > { %1085 = vmatpush.msra.mxu0 %v1060_v39 }
 0x11f   : > { %1086 = vmatpush.msra.mxu0 %v1059_v40 }
 0x121   : > { %1087 = vmatpush.msra.mxu0 %v1058_v41 }
 0x123   : > { %1088 = vmatpush.msra.mxu0 %v1057_v42 }
 0x125   : > { %1089 = vmatpush.msra.mxu0 %v1056_v43 }
 0x127   : > { %1090 = vmatpush.msra.mxu0 %v1055_v44 }
 0x128   : > { %1091 = vmatmul.f32.vlgmr.msra.gmra.mxu0 %v1054_v45 }
 0x1a5   : > { %v1092_v47 = vpop.f32.mrf.mxu0 }
 0x1a6   : > { %v1093_v48 = vadd.f32 %v1600_v46, %v1092_v47 }
 0x1a8   : > { %1096 = vst.msk [vmem:[#allocation3] sm:$0x3] %vm1095_vm1, %v1093_v48 }
 0x1a9 PF: > { %p1585_p5 = scmp.eq.s32.totalorder %s1684_s22, 1  ;;  %s1642_s24 = smov [#allocation3]  }
 0x1aa   : > { %s1103_s26 = sshll.u32 %s1642_s24, 4  ;;  %s1105_s29 = sshll.u32 %s2004_s6, 4  ;;  %s1104_s26 = int_to_ptr.vmem [resolvable:$true] %s1103_s26  ;;  %s1106_s29 = int_to_ptr.hbm [resolvable:$true] %s1105_s29 }
 0x1ab   : > { %1582 = dma.vmem_to_hbm [thread:$0]  (%p1585_p5), %s1104_s26, 32, %s1106_s29, [#allocation4]  }
 0x1ac   : > { %1634 = dma.done.wait (%p1585_p5), [#allocation4], 32  }
 0x1ad   : > { %1636 = vsyncadd (%p1585_p5), [#allocation4], 4294967264 }
 0x1ae PF: > { %s17_s21 = sadd.s32 1, %s1639_s21  }
 0x1af   : > { %p14_p6 = scmp.ge.s32.totalorder %s17_s21, 4  }
 0x1b1   :  { %16 = sbr.rel (!%p14_p6) target bundleno = 1 (0x1), region = 79 }
 0x1b6   :  { %1119 = vsyncpa [#allocation4], 1 }
 0x1b7   :  { %1121 = vsyncpa [#allocation4 + $0x1], 1 }

</bundles_post_ra>
